<compile_context>
chip_gen: v7x
topology: tpu7x:2x2x1
jax: 0.10.0
libtpu: 0.0.40
codegen_flags: <defaults>
</compile_context>

<pallas_src>
import functools
import math

import jax
import jax.numpy as jnp
from jax.experimental import pallas as pl
from jax.experimental.pallas import tpu as pltpu

# ---------------------------------------------------------------------------
# Config (small synthetic shapes consistent with the DETR module)
# ---------------------------------------------------------------------------
BATCH = 2
IMG_C, IMG_H, IMG_W = 3, 16, 16
BACKBONE_CH = 16          # backbone.num_channels
HIDDEN = 32               # transformer.d_model
NHEAD = 4
NUM_QUERIES = 8
NUM_CLASSES = 5           # -> class head outputs num_classes + 1 = 6
NUM_ENC_LAYERS = 1
NUM_DEC_LAYERS = 2
DIM_FFN = 64
HEAD_PAD = 128            # lane-dense padding for class / bbox head outputs
LN_EPS = 1e-5


# ---------------------------------------------------------------------------
# Pallas kernels
# ---------------------------------------------------------------------------
def _attn_block_kernel(xq_ref, posq_ref, xkv_ref, poskv_ref,
                       wqkv_ref, bqkv_ref, wo_ref, bo_ref, ln_ref,
                       o_ref, *, nhead, eps):
    """Full post-norm attention sub-layer for one batch element.

    out = LayerNorm(xq + OutProj(MHA(q=xq+posq, k=xkv+poskv, v=xkv)))
    """
    Lq, D = xq_ref.shape
    dh = D // nhead
    scale = 1.0 / math.sqrt(dh)

    xq = xq_ref[...]                                   # (Lq, D)
    xkv = xkv_ref[...]                                 # (Lk, D)
    q_in = xq + posq_ref[...]
    k_in = xkv + poskv_ref[...]

    wqkv = wqkv_ref[...]                               # (D, 3D)
    bqkv = bqkv_ref[...]                               # (1, 3D)
    q = jnp.dot(q_in, wqkv[:, 0:D],
                preferred_element_type=jnp.float32) + bqkv[:, 0:D]
    k = jnp.dot(k_in, wqkv[:, D:2 * D],
                preferred_element_type=jnp.float32) + bqkv[:, D:2 * D]
    v = jnp.dot(xkv, wqkv[:, 2 * D:3 * D],
                preferred_element_type=jnp.float32) + bqkv[:, 2 * D:3 * D]

    wo = wo_ref[...]                                   # (D, D)
    y = xq + bo_ref[...]                               # residual + out-proj bias

    # TODO(synk): for real DETR sizes (L ~ 1000) tile the KV axis with an
    # online-softmax (flash-style) grid axis instead of full score blocks.
    for h in range(nhead):                             # static head loop
        lo, hi = h * dh, (h + 1) * dh
        qh, kh, vh = q[:, lo:hi], k[:, lo:hi], v[:, lo:hi]
        s = jax.lax.dot_general(qh, kh, (((1,), (1,)), ((), ())),
                                preferred_element_type=jnp.float32) * scale
        s = s - jnp.max(s, axis=-1, keepdims=True)
        p = jnp.exp(s)
        p = p * pl.reciprocal(jnp.sum(p, axis=-1, keepdims=True), approx=True)
        oh = jnp.dot(p, vh, preferred_element_type=jnp.float32)   # (Lq, dh)
        # per-head slice of the output projection == OutProj(concat(heads))
        y = y + jnp.dot(oh, wo[lo:hi, :], preferred_element_type=jnp.float32)

    mu = jnp.mean(y, axis=-1, keepdims=True)
    var = jnp.mean((y - mu) ** 2, axis=-1, keepdims=True)
    o_ref[...] = ((y - mu) * jax.lax.rsqrt(var + eps)
                  * ln_ref[0:1, :] + ln_ref[1:2, :])


def _ffn_block_kernel(x_ref, w1_ref, b1_ref, w2_ref, b2_ref, ln_ref, o_ref,
                      *, eps):
    """out = LayerNorm(x + W2 relu(W1 x + b1) + b2)."""
    x = x_ref[...]
    h = jnp.maximum(
        jnp.dot(x, w1_ref[...], preferred_element_type=jnp.float32)
        + b1_ref[...], 0.0)
    y = x + jnp.dot(h, w2_ref[...], preferred_element_type=jnp.float32) \
        + b2_ref[...]
    mu = jnp.mean(y, axis=-1, keepdims=True)
    var = jnp.mean((y - mu) ** 2, axis=-1, keepdims=True)
    o_ref[...] = ((y - mu) * jax.lax.rsqrt(var + eps)
                  * ln_ref[0:1, :] + ln_ref[1:2, :])


def _backbone_proj_kernel(x_ref, wb_ref, bb_ref, wp_ref, bp_ref, o_ref):
    """Fused backbone 1x1 conv (+relu) and input_proj 1x1 conv."""
    t = jnp.maximum(
        jnp.dot(x_ref[...], wb_ref[...], preferred_element_type=jnp.float32)
        + bb_ref[...], 0.0)
    o_ref[...] = jnp.dot(t, wp_ref[...],
                         preferred_element_type=jnp.float32) + bp_ref[...]


def _head_kernel(hs_ref, ln_ref, wc_ref, bc_ref, w1_ref, b1_ref,
                 w2_ref, b2_ref, w3_ref, b3_ref, o_ref, *, eps):
    """dec_norm + class head + 3-layer bbox MLP (sigmoid), lane-padded output."""
    x = hs_ref[...]
    mu = jnp.mean(x, axis=-1, keepdims=True)
    var = jnp.mean((x - mu) ** 2, axis=-1, keepdims=True)
    h = (x - mu) * jax.lax.rsqrt(var + eps) * ln_ref[0:1, :] + ln_ref[1:2, :]

    cls = jnp.dot(h, wc_ref[...], preferred_element_type=jnp.float32) \
        + bc_ref[...]                                           # (M, HEAD_PAD)
    t = jnp.maximum(
        jnp.dot(h, w1_ref[...], preferred_element_type=jnp.float32)
        + b1_ref[...], 0.0)
    t = jnp.maximum(
        jnp.dot(t, w2_ref[...], preferred_element_type=jnp.float32)
        + b2_ref[...], 0.0)
    box = jax.nn.sigmoid(
        jnp.dot(t, w3_ref[...], preferred_element_type=jnp.float32)
        + b3_ref[...])                                          # (M, HEAD_PAD)
    o_ref[...] = jnp.concatenate([cls, box], axis=-1)           # (M, 2*HEAD_PAD)


# ---------------------------------------------------------------------------
# Host-side wrappers
# ---------------------------------------------------------------------------
def _row_tiling(m):
    if m % 16 == 0:
        return m // 2, 2        # two row tiles -> usable on both v7x cores
    return m, 1


def _bmap(nb):
    if nb == 1:                 # broadcast (pos embeddings stored with dim 1)
        return lambda b: (0, 0, 0)
    return lambda b: (b, 0, 0)


def attn_block(xq, posq, xkv, poskv, ap, lnp, nhead):
    B, Lq, D = xq.shape
    Lk = xkv.shape[1]
    kern = functools.partial(_attn_block_kernel, nhead=nhead, eps=LN_EPS)
    return pl.pallas_call(
        kern,
        out_shape=jax.ShapeDtypeStruct((B, Lq, D), jnp.float32),
        grid=(B,),
        in_specs=[
            pl.BlockSpec((None, Lq, D), _bmap(xq.shape[0])),
            pl.BlockSpec((None, Lq, D), _bmap(posq.shape[0])),
            pl.BlockSpec((None, Lk, D), _bmap(xkv.shape[0])),
            pl.BlockSpec((None, Lk, D), _bmap(poskv.shape[0])),
            pl.BlockSpec((D, 3 * D), lambda b: (0, 0)),
            pl.BlockSpec((1, 3 * D), lambda b: (0, 0)),
            pl.BlockSpec((D, D), lambda b: (0, 0)),
            pl.BlockSpec((1, D), lambda b: (0, 0)),
            pl.BlockSpec((2, D), lambda b: (0, 0)),
        ],
        out_specs=pl.BlockSpec((None, Lq, D), lambda b: (b, 0, 0)),
        compiler_params=pltpu.CompilerParams(
            dimension_semantics=("parallel",)),
    )(xq, posq, xkv, poskv, ap["wqkv"], ap["bqkv"], ap["wo"], ap["bo"], lnp)


def ffn_block(x, fp, lnp):
    B, L, D = x.shape
    M = B * L
    x2 = x.reshape(M, D)
    Fh = fp["w1"].shape[1]
    tm, nt = _row_tiling(M)
    out = pl.pallas_call(
        functools.partial(_ffn_block_kernel, eps=LN_EPS),
        out_shape=jax.ShapeDtypeStruct((M, D), jnp.float32),
        grid=(nt,),
        in_specs=[
            pl.BlockSpec((tm, D), lambda i: (i, 0)),
            pl.BlockSpec((D, Fh), lambda i: (0, 0)),
            pl.BlockSpec((1, Fh), lambda i: (0, 0)),
            pl.BlockSpec((Fh, D), lambda i: (0, 0)),
            pl.BlockSpec((1, D), lambda i: (0, 0)),
            pl.BlockSpec((2, D), lambda i: (0, 0)),
        ],
        out_specs=pl.BlockSpec((tm, D), lambda i: (i, 0)),
        compiler_params=pltpu.CompilerParams(
            dimension_semantics=("parallel",)),
    )(x2, fp["w1"], fp["b1"], fp["w2"], fp["b2"], lnp)
    return out.reshape(B, L, D)


def backbone_input_proj(tokens, bp, ip):
    M, C = tokens.shape
    Cb = bp["w"].shape[1]
    D = ip["w"].shape[1]
    tm, nt = _row_tiling(M)
    return pl.pallas_call(
        _backbone_proj_kernel,
        out_shape=jax.ShapeDtypeStruct((M, D), jnp.float32),
        grid=(nt,),
        in_specs=[
            pl.BlockSpec((tm, C), lambda i: (i, 0)),
            pl.BlockSpec((C, Cb), lambda i: (0, 0)),
            pl.BlockSpec((1, Cb), lambda i: (0, 0)),
            pl.BlockSpec((Cb, D), lambda i: (0, 0)),
            pl.BlockSpec((1, D), lambda i: (0, 0)),
        ],
        out_specs=pl.BlockSpec((tm, D), lambda i: (i, 0)),
        compiler_params=pltpu.CompilerParams(
            dimension_semantics=("parallel",)),
    )(tokens, bp["w"], bp["b"], ip["w"], ip["b"])


def prediction_heads(hs, params):
    """hs: (M, D) raw last-decoder-layer output -> (M, 2*HEAD_PAD)."""
    M, D = hs.shape
    tm, nt = _row_tiling(M)
    ce, be = params["class_embed"], params["bbox_embed"]
    return pl.pallas_call(
        functools.partial(_head_kernel, eps=LN_EPS),
        out_shape=jax.ShapeDtypeStruct((M, 2 * HEAD_PAD), jnp.float32),
        grid=(nt,),
        in_specs=[
            pl.BlockSpec((tm, D), lambda i: (i, 0)),
            pl.BlockSpec((2, D), lambda i: (0, 0)),
            pl.BlockSpec((D, HEAD_PAD), lambda i: (0, 0)),
            pl.BlockSpec((1, HEAD_PAD), lambda i: (0, 0)),
            pl.BlockSpec((D, D), lambda i: (0, 0)),
            pl.BlockSpec((1, D), lambda i: (0, 0)),
            pl.BlockSpec((D, D), lambda i: (0, 0)),
            pl.BlockSpec((1, D), lambda i: (0, 0)),
            pl.BlockSpec((D, HEAD_PAD), lambda i: (0, 0)),
            pl.BlockSpec((1, HEAD_PAD), lambda i: (0, 0)),
        ],
        out_specs=pl.BlockSpec((tm, 2 * HEAD_PAD), lambda i: (i, 0)),
        compiler_params=pltpu.CompilerParams(
            dimension_semantics=("parallel",)),
    )(hs, params["dec_norm"], ce["w"], ce["b"],
      be[0]["w"], be[0]["b"], be[1]["w"], be[1]["b"], be[2]["w"], be[2]["b"])


# ---------------------------------------------------------------------------
# Positional embedding (plain-JAX glue, deterministic)
# ---------------------------------------------------------------------------
def sine_pos_embed(D, H, W):
    """DETR-style sine positional embedding -> (H*W, D)."""
    npf = D // 2
    dim_t = 10000.0 ** (2.0 * (jnp.arange(npf) // 2).astype(jnp.float32) / npf)
    y = (jnp.arange(H, dtype=jnp.float32) + 1.0) / H * 2.0 * math.pi
    x = (jnp.arange(W, dtype=jnp.float32) + 1.0) / W * 2.0 * math.pi
    even = (jnp.arange(npf) % 2) == 0
    pos_y = y[:, None] / dim_t[None, :]
    pos_x = x[:, None] / dim_t[None, :]
    pos_y = jnp.where(even, jnp.sin(pos_y), jnp.cos(pos_y))   # (H, npf)
    pos_x = jnp.where(even, jnp.sin(pos_x), jnp.cos(pos_x))   # (W, npf)
    pos = jnp.concatenate(
        [jnp.broadcast_to(pos_y[:, None, :], (H, W, npf)),
         jnp.broadcast_to(pos_x[None, :, :], (H, W, npf))], axis=-1)
    return pos.reshape(H * W, D)


# ---------------------------------------------------------------------------
# Full DETR forward
# ---------------------------------------------------------------------------
def detr_forward(params, samples):
    """samples: (B, 3, H, W) NCHW, mask assumed all-valid (no padding)."""
    # TODO(synk): real DETR uses a ResNet backbone + NestedTensor padding mask;
    # here the backbone is a stride-2 1x1 conv + relu and the mask is all-valid.
    B, C, H, W = samples.shape

    xs = samples[:, :, ::2, ::2]                                # (B, 3, H/2, W/2)
    Hf, Wf = xs.shape[2], xs.shape[3]
    tokens = xs.transpose(0, 2, 3, 1).reshape(B * Hf * Wf, C)   # NHWC tokens

    # ---- backbone + input_proj (one fused kernel) --------------------------
    src = backbone_input_proj(tokens, params["backbone"], params["input_proj"])
    D = src.shape[-1]
    src = src.reshape(B, Hf * Wf, D)                            # (B, HW, D)

    pos1 = sine_pos_embed(D, Hf, Wf)[None, :, :]                # (1, HW, D)
    qpos1 = params["query_embed"][None, :, :]                   # (1, Q, D)
    Q = qpos1.shape[1]
    tgt = jnp.zeros((B, Q, D), jnp.float32)

    # ---- transformer encoder (2 fused kernels / layer) ---------------------
    memory = src
    for lp in params["encoder"]:
        memory = attn_block(memory, pos1, memory, pos1,
                            lp["self_attn"], lp["norm1"], NHEAD)
        memory = ffn_block(memory, lp["ffn"], lp["norm2"])

    # ---- transformer decoder (3 fused kernels / layer) ---------------------
    out = tgt
    for lp in params["decoder"]:
        out = attn_block(out, qpos1, out, qpos1,
                         lp["self_attn"], lp["norm1"], NHEAD)
        out = attn_block(out, qpos1, memory, pos1,
                         lp["cross_attn"], lp["norm2"], NHEAD)
        out = ffn_block(out, lp["ffn"], lp["norm3"])

    # ---- heads: last decoder layer only (aux_loss=False), dec_norm fused ---
    head = prediction_heads(out.reshape(B * Q, D), params)      # (B*Q, 256)
    logits = head[:, :NUM_CLASSES + 1].reshape(B, Q, NUM_CLASSES + 1)
    boxes = head[:, HEAD_PAD:HEAD_PAD + 4].reshape(B, Q, 4)
    return {"pred_logits": logits, "pred_boxes": boxes}


# ---------------------------------------------------------------------------
# Deterministic parameter init
# ---------------------------------------------------------------------------
def _init_linear(key, n_in, n_out):
    kw, kb = jax.random.split(key)
    w = jax.random.normal(kw, (n_in, n_out), jnp.float32) / math.sqrt(n_in)
    b = jax.random.normal(kb, (1, n_out), jnp.float32) * 0.01
    return w, b


def _init_attn(key, d):
    ks = jax.random.split(key, 4)
    wq, bq = _init_linear(ks[0], d, d)
    wk, bk = _init_linear(ks[1], d, d)
    wv, bv = _init_linear(ks[2], d, d)
    wo, bo = _init_linear(ks[3], d, d)
    return {"wqkv": jnp.concatenate([wq, wk, wv], axis=1),
            "bqkv": jnp.concatenate([bq, bk, bv], axis=1),
            "wo": wo, "bo": bo}


def _init_norm(d):
    return jnp.stack([jnp.ones((d,), jnp.float32),
                      jnp.zeros((d,), jnp.float32)])            # (2, d)


def _init_ffn(key, d, dff):
    k1, k2 = jax.random.split(key)
    w1, b1 = _init_linear(k1, d, dff)
    w2, b2 = _init_linear(k2, dff, d)
    return {"w1": w1, "b1": b1, "w2": w2, "b2": b2}


def _init_encoder_layer(key, d, dff):
    k1, k2 = jax.random.split(key)
    return {"self_attn": _init_attn(k1, d), "ffn": _init_ffn(k2, d, dff),
            "norm1": _init_norm(d), "norm2": _init_norm(d)}


def _init_decoder_layer(key, d, dff):
    k1, k2, k3 = jax.random.split(key, 3)
    return {"self_attn": _init_attn(k1, d), "cross_attn": _init_attn(k2, d),
            "ffn": _init_ffn(k3, d, dff),
            "norm1": _init_norm(d), "norm2": _init_norm(d),
            "norm3": _init_norm(d)}


def _pad_cols(w, b, width):
    n = w.shape[1]
    return (jnp.pad(w, ((0, 0), (0, width - n))),
            jnp.pad(b, ((0, 0), (0, width - n))))


def init_params(key):
    keys = jax.random.split(key, 8)
    wb, bb = _init_linear(keys[0], IMG_C, BACKBONE_CH)
    wp, bp_ = _init_linear(keys[1], BACKBONE_CH, HIDDEN)
    wc, bc = _init_linear(keys[2], HIDDEN, NUM_CLASSES + 1)
    wc, bc = _pad_cols(wc, bc, HEAD_PAD)                 # lane-dense class head
    bbox_keys = jax.random.split(keys[3], 3)
    w31, b31 = _init_linear(bbox_keys[0], HIDDEN, HIDDEN)
    w32, b32 = _init_linear(bbox_keys[1], HIDDEN, HIDDEN)
    w33, b33 = _init_linear(bbox_keys[2], HIDDEN, 4)
    w33, b33 = _pad_cols(w33, b33, HEAD_PAD)             # lane-dense bbox head
    return {
        "backbone": {"w": wb, "b": bb},
        "input_proj": {"w": wp, "b": bp_},
        "query_embed": jax.random.normal(keys[4], (NUM_QUERIES, HIDDEN),
                                         jnp.float32),
        "class_embed": {"w": wc, "b": bc},
        "bbox_embed": [{"w": w31, "b": b31}, {"w": w32, "b": b32},
                       {"w": w33, "b": b33}],
        "encoder": [_init_encoder_layer(k, HIDDEN, DIM_FFN)
                    for k in jax.random.split(keys[5], NUM_ENC_LAYERS)],
        "decoder": [_init_decoder_layer(k, HIDDEN, DIM_FFN)
                    for k in jax.random.split(keys[6], NUM_DEC_LAYERS)],
        "dec_norm": _init_norm(HIDDEN),
    }


if __name__ == "__main__":
    key = jax.random.PRNGKey(0)
    kp, kx = jax.random.split(key)
    params = init_params(kp)
    samples = jax.random.normal(kx, (BATCH, IMG_C, IMG_H, IMG_W), jnp.float32)

    fwd = jax.jit(detr_forward)
    out = fwd(params, samples)
    jax.block_until_ready(out)

    assert out["pred_logits"].shape == (BATCH, NUM_QUERIES, NUM_CLASSES + 1)
    assert out["pred_boxes"].shape == (BATCH, NUM_QUERIES, 4)
    assert bool(jnp.all(jnp.isfinite(out["pred_logits"])))
    assert bool(jnp.all((out["pred_boxes"] >= 0) & (out["pred_boxes"] <= 1)))
    print("KERNEL_OK")
</pallas_src>

<mosaic_0001>
module attributes {stable_mosaic.version = 11 : i64} {
  func.func @_attn_block_kernel(%arg0: i32, %arg1: memref<1x64x32xf32, #tpu.memory_space<vmem>>, %arg2: memref<1x64x32xf32, #tpu.memory_space<vmem>>, %arg3: memref<1x64x32xf32, #tpu.memory_space<vmem>>, %arg4: memref<1x64x32xf32, #tpu.memory_space<vmem>>, %arg5: memref<32x96xf32, #tpu.memory_space<vmem>>, %arg6: memref<1x96xf32, #tpu.memory_space<vmem>>, %arg7: memref<32x32xf32, #tpu.memory_space<vmem>>, %arg8: memref<1x32xf32, #tpu.memory_space<vmem>>, %arg9: memref<2x32xf32, #tpu.memory_space<vmem>>, %arg10: memref<1x64x32xf32, #tpu.memory_space<vmem>>) attributes {dimension_semantics = [#tpu.dimension_semantics<parallel>], iteration_bounds = array<i64: 2>, scalar_prefetch = 0 : i64, scratch_operands = 0 : i64, tpu.core_type = #tpu.core_type<tc>, window_params = [{transform_indices = @transform_0, window_bounds = array<i64: 1, 64, 32>}, {pipeline_mode = #tpu.pipeline_mode<synchronous>, transform_indices = @transform_1, window_bounds = array<i64: 1, 64, 32>}, {transform_indices = @transform_2, window_bounds = array<i64: 1, 64, 32>}, {pipeline_mode = #tpu.pipeline_mode<synchronous>, transform_indices = @transform_3, window_bounds = array<i64: 1, 64, 32>}, {pipeline_mode = #tpu.pipeline_mode<synchronous>, transform_indices = @transform_4, window_bounds = array<i64: 32, 96>}, {pipeline_mode = #tpu.pipeline_mode<synchronous>, transform_indices = @transform_5, window_bounds = array<i64: 1, 96>}, {pipeline_mode = #tpu.pipeline_mode<synchronous>, transform_indices = @transform_6, window_bounds = array<i64: 32, 32>}, {pipeline_mode = #tpu.pipeline_mode<synchronous>, transform_indices = @transform_7, window_bounds = array<i64: 1, 32>}, {pipeline_mode = #tpu.pipeline_mode<synchronous>, transform_indices = @transform_8, window_bounds = array<i64: 2, 32>}, {transform_indices = @transform_9, window_bounds = array<i64: 1, 64, 32>}]} {
    %c0 = arith.constant 0 : index
    %c0_0 = arith.constant 0 : index
    %c0_1 = arith.constant 0 : index
    %0 = vector.load %arg1[%c0, %c0_0, %c0_1] : memref<1x64x32xf32, #tpu.memory_space<vmem>>, vector<1x64x32xf32>
    %1 = vector.shape_cast %0 : vector<1x64x32xf32> to vector<64x32xf32>
    %c0_2 = arith.constant 0 : index
    %c0_3 = arith.constant 0 : index
    %c0_4 = arith.constant 0 : index
    %2 = vector.load %arg3[%c0_2, %c0_3, %c0_4] : memref<1x64x32xf32, #tpu.memory_space<vmem>>, vector<1x64x32xf32>
    %3 = vector.shape_cast %2 : vector<1x64x32xf32> to vector<64x32xf32>
    %c0_5 = arith.constant 0 : index
    %c0_6 = arith.constant 0 : index
    %c0_7 = arith.constant 0 : index
    %4 = vector.load %arg2[%c0_5, %c0_6, %c0_7] : memref<1x64x32xf32, #tpu.memory_space<vmem>>, vector<1x64x32xf32>
    %5 = vector.shape_cast %4 : vector<1x64x32xf32> to vector<64x32xf32>
    %6 = arith.addf %1, %5 : vector<64x32xf32>
    %c0_8 = arith.constant 0 : index
    %c0_9 = arith.constant 0 : index
    %c0_10 = arith.constant 0 : index
    %7 = vector.load %arg4[%c0_8, %c0_9, %c0_10] : memref<1x64x32xf32, #tpu.memory_space<vmem>>, vector<1x64x32xf32>
    %8 = vector.shape_cast %7 : vector<1x64x32xf32> to vector<64x32xf32>
    %9 = arith.addf %3, %8 : vector<64x32xf32>
    %c0_11 = arith.constant 0 : index
    %c0_12 = arith.constant 0 : index
    %10 = vector.load %arg5[%c0_11, %c0_12] : memref<32x96xf32, #tpu.memory_space<vmem>>, vector<32x96xf32>
    %c0_13 = arith.constant 0 : index
    %c0_14 = arith.constant 0 : index
    %11 = vector.load %arg6[%c0_13, %c0_14] : memref<1x96xf32, #tpu.memory_space<vmem>>, vector<1x96xf32>
    %12 = vector.extract_strided_slice %10 {offsets = [0, 0], sizes = [32, 32], strides = [1, 1]} : vector<32x96xf32> to vector<32x32xf32>
    %cst = arith.constant dense<0.000000e+00> : vector<64x32xf32>
    %13 = tpu.matmul %6, %12, %cst {dimension_numbers = #tpu.dot_dimension_numbers<[1], [0], [0], [1], [0, 0, 1, 1], [], []>} : vector<64x32xf32>, vector<32x32xf32>, vector<64x32xf32> -> vector<64x32xf32>
    %14 = vector.extract_strided_slice %11 {offsets = [0, 0], sizes = [1, 32], strides = [1, 1]} : vector<1x96xf32> to vector<1x32xf32>
    %15 = vector.broadcast %14 : vector<1x32xf32> to vector<64x32xf32>
    %16 = arith.addf %13, %15 : vector<64x32xf32>
    %17 = vector.extract_strided_slice %10 {offsets = [0, 32], sizes = [32, 32], strides = [1, 1]} : vector<32x96xf32> to vector<32x32xf32>
    %cst_15 = arith.constant dense<0.000000e+00> : vector<64x32xf32>
    %18 = tpu.matmul %9, %17, %cst_15 {dimension_numbers = #tpu.dot_dimension_numbers<[1], [0], [0], [1], [0, 0, 1, 1], [], []>} : vector<64x32xf32>, vector<32x32xf32>, vector<64x32xf32> -> vector<64x32xf32>
    %19 = vector.extract_strided_slice %11 {offsets = [0, 32], sizes = [1, 32], strides = [1, 1]} : vector<1x96xf32> to vector<1x32xf32>
    %20 = vector.broadcast %19 : vector<1x32xf32> to vector<64x32xf32>
    %21 = arith.addf %18, %20 : vector<64x32xf32>
    %22 = vector.extract_strided_slice %10 {offsets = [0, 64], sizes = [32, 32], strides = [1, 1]} : vector<32x96xf32> to vector<32x32xf32>
    %cst_16 = arith.constant dense<0.000000e+00> : vector<64x32xf32>
    %23 = tpu.matmul %3, %22, %cst_16 {dimension_numbers = #tpu.dot_dimension_numbers<[1], [0], [0], [1], [0, 0, 1, 1], [], []>} : vector<64x32xf32>, vector<32x32xf32>, vector<64x32xf32> -> vector<64x32xf32>
    %24 = vector.extract_strided_slice %11 {offsets = [0, 64], sizes = [1, 32], strides = [1, 1]} : vector<1x96xf32> to vector<1x32xf32>
    %25 = vector.broadcast %24 : vector<1x32xf32> to vector<64x32xf32>
    %26 = arith.addf %23, %25 : vector<64x32xf32>
    %c0_17 = arith.constant 0 : index
    %c0_18 = arith.constant 0 : index
    %27 = vector.load %arg7[%c0_17, %c0_18] : memref<32x32xf32, #tpu.memory_space<vmem>>, vector<32x32xf32>
    %c0_19 = arith.constant 0 : index
    %c0_20 = arith.constant 0 : index
    %28 = vector.load %arg8[%c0_19, %c0_20] : memref<1x32xf32, #tpu.memory_space<vmem>>, vector<1x32xf32>
    %29 = vector.broadcast %28 : vector<1x32xf32> to vector<64x32xf32>
    %30 = arith.addf %1, %29 : vector<64x32xf32>
    %31 = vector.extract_strided_slice %16 {offsets = [0, 0], sizes = [64, 8], strides = [1, 1]} : vector<64x32xf32> to vector<64x8xf32>
    %32 = vector.extract_strided_slice %21 {offsets = [0, 0], sizes = [64, 8], strides = [1, 1]} : vector<64x32xf32> to vector<64x8xf32>
    %33 = vector.extract_strided_slice %26 {offsets = [0, 0], sizes = [64, 8], strides = [1, 1]} : vector<64x32xf32> to vector<64x8xf32>
    %cst_21 = arith.constant dense<0.000000e+00> : vector<64x64xf32>
    %34 = tpu.matmul %31, %32, %cst_21 {dimension_numbers = #tpu.dot_dimension_numbers<[1], [1], [0], [0], [0, 0, 1, 0], [], []>} : vector<64x8xf32>, vector<64x8xf32>, vector<64x64xf32> -> vector<64x64xf32>
    %cst_22 = arith.constant 0.353553385 : f32
    %35 = vector.broadcast %cst_22 : f32 to vector<64x64xf32>
    %36 = arith.mulf %34, %35 : vector<64x64xf32>
    %cst_23 = arith.constant dense<0xFF800000> : vector<64xf32>
    %37 = vector.multi_reduction <maximumf>, %36, %cst_23 [1] : vector<64x64xf32> to vector<64xf32>
    %38 = vector.shape_cast %37 : vector<64xf32> to vector<64x1xf32>
    %39 = vector.broadcast %38 : vector<64x1xf32> to vector<64x64xf32>
    %40 = arith.subf %36, %39 : vector<64x64xf32>
    %41 = math.exp %40 : vector<64x64xf32>
    %cst_24 = arith.constant dense<0.000000e+00> : vector<64xf32>
    %42 = vector.multi_reduction <add>, %41, %cst_24 [1] : vector<64x64xf32> to vector<64xf32>
    %43 = vector.shape_cast %42 : vector<64xf32> to vector<64x1xf32>
    %44 = tpu.reciprocal %43 {approx = true} : vector<64x1xf32> -> vector<64x1xf32>
    %45 = vector.broadcast %44 : vector<64x1xf32> to vector<64x64xf32>
    %46 = arith.mulf %41, %45 : vector<64x64xf32>
    %cst_25 = arith.constant dense<0.000000e+00> : vector<64x8xf32>
    %47 = tpu.matmul %46, %33, %cst_25 {dimension_numbers = #tpu.dot_dimension_numbers<[1], [0], [0], [1], [0, 0, 1, 1], [], []>} : vector<64x64xf32>, vector<64x8xf32>, vector<64x8xf32> -> vector<64x8xf32>
    %48 = vector.extract_strided_slice %27 {offsets = [0, 0], sizes = [8, 32], strides = [1, 1]} : vector<32x32xf32> to vector<8x32xf32>
    %cst_26 = arith.constant dense<0.000000e+00> : vector<64x32xf32>
    %49 = tpu.matmul %47, %48, %cst_26 {dimension_numbers = #tpu.dot_dimension_numbers<[1], [0], [0], [1], [0, 0, 1, 1], [], []>} : vector<64x8xf32>, vector<8x32xf32>, vector<64x32xf32> -> vector<64x32xf32>
    %50 = arith.addf %30, %49 : vector<64x32xf32>
    %51 = vector.extract_strided_slice %16 {offsets = [0, 8], sizes = [64, 8], strides = [1, 1]} : vector<64x32xf32> to vector<64x8xf32>
    %52 = vector.extract_strided_slice %21 {offsets = [0, 8], sizes = [64, 8], strides = [1, 1]} : vector<64x32xf32> to vector<64x8xf32>
    %53 = vector.extract_strided_slice %26 {offsets = [0, 8], sizes = [64, 8], strides = [1, 1]} : vector<64x32xf32> to vector<64x8xf32>
    %cst_27 = arith.constant dense<0.000000e+00> : vector<64x64xf32>
    %54 = tpu.matmul %51, %52, %cst_27 {dimension_numbers = #tpu.dot_dimension_numbers<[1], [1], [0], [0], [0, 0, 1, 0], [], []>} : vector<64x8xf32>, vector<64x8xf32>, vector<64x64xf32> -> vector<64x64xf32>
    %cst_28 = arith.constant 0.353553385 : f32
    %55 = vector.broadcast %cst_28 : f32 to vector<64x64xf32>
    %56 = arith.mulf %54, %55 : vector<64x64xf32>
    %cst_29 = arith.constant dense<0xFF800000> : vector<64xf32>
    %57 = vector.multi_reduction <maximumf>, %56, %cst_29 [1] : vector<64x64xf32> to vector<64xf32>
    %58 = vector.shape_cast %57 : vector<64xf32> to vector<64x1xf32>
    %59 = vector.broadcast %58 : vector<64x1xf32> to vector<64x64xf32>
    %60 = arith.subf %56, %59 : vector<64x64xf32>
    %61 = math.exp %60 : vector<64x64xf32>
    %cst_30 = arith.constant dense<0.000000e+00> : vector<64xf32>
    %62 = vector.multi_reduction <add>, %61, %cst_30 [1] : vector<64x64xf32> to vector<64xf32>
    %63 = vector.shape_cast %62 : vector<64xf32> to vector<64x1xf32>
    %64 = tpu.reciprocal %63 {approx = true} : vector<64x1xf32> -> vector<64x1xf32>
    %65 = vector.broadcast %64 : vector<64x1xf32> to vector<64x64xf32>
    %66 = arith.mulf %61, %65 : vector<64x64xf32>
    %cst_31 = arith.constant dense<0.000000e+00> : vector<64x8xf32>
    %67 = tpu.matmul %66, %53, %cst_31 {dimension_numbers = #tpu.dot_dimension_numbers<[1], [0], [0], [1], [0, 0, 1, 1], [], []>} : vector<64x64xf32>, vector<64x8xf32>, vector<64x8xf32> -> vector<64x8xf32>
    %68 = vector.extract_strided_slice %27 {offsets = [8, 0], sizes = [8, 32], strides = [1, 1]} : vector<32x32xf32> to vector<8x32xf32>
    %cst_32 = arith.constant dense<0.000000e+00> : vector<64x32xf32>
    %69 = tpu.matmul %67, %68, %cst_32 {dimension_numbers = #tpu.dot_dimension_numbers<[1], [0], [0], [1], [0, 0, 1, 1], [], []>} : vector<64x8xf32>, vector<8x32xf32>, vector<64x32xf32> -> vector<64x32xf32>
    %70 = arith.addf %50, %69 : vector<64x32xf32>
    %71 = vector.extract_strided_slice %16 {offsets = [0, 16], sizes = [64, 8], strides = [1, 1]} : vector<64x32xf32> to vector<64x8xf32>
    %72 = vector.extract_strided_slice %21 {offsets = [0, 16], sizes = [64, 8], strides = [1, 1]} : vector<64x32xf32> to vector<64x8xf32>
    %73 = vector.extract_strided_slice %26 {offsets = [0, 16], sizes = [64, 8], strides = [1, 1]} : vector<64x32xf32> to vector<64x8xf32>
    %cst_33 = arith.constant dense<0.000000e+00> : vector<64x64xf32>
    %74 = tpu.matmul %71, %72, %cst_33 {dimension_numbers = #tpu.dot_dimension_numbers<[1], [1], [0], [0], [0, 0, 1, 0], [], []>} : vector<64x8xf32>, vector<64x8xf32>, vector<64x64xf32> -> vector<64x64xf32>
    %cst_34 = arith.constant 0.353553385 : f32
    %75 = vector.broadcast %cst_34 : f32 to vector<64x64xf32>
    %76 = arith.mulf %74, %75 : vector<64x64xf32>
    %cst_35 = arith.constant dense<0xFF800000> : vector<64xf32>
    %77 = vector.multi_reduction <maximumf>, %76, %cst_35 [1] : vector<64x64xf32> to vector<64xf32>
    %78 = vector.shape_cast %77 : vector<64xf32> to vector<64x1xf32>
    %79 = vector.broadcast %78 : vector<64x1xf32> to vector<64x64xf32>
    %80 = arith.subf %76, %79 : vector<64x64xf32>
    %81 = math.exp %80 : vector<64x64xf32>
    %cst_36 = arith.constant dense<0.000000e+00> : vector<64xf32>
    %82 = vector.multi_reduction <add>, %81, %cst_36 [1] : vector<64x64xf32> to vector<64xf32>
    %83 = vector.shape_cast %82 : vector<64xf32> to vector<64x1xf32>
    %84 = tpu.reciprocal %83 {approx = true} : vector<64x1xf32> -> vector<64x1xf32>
    %85 = vector.broadcast %84 : vector<64x1xf32> to vector<64x64xf32>
    %86 = arith.mulf %81, %85 : vector<64x64xf32>
    %cst_37 = arith.constant dense<0.000000e+00> : vector<64x8xf32>
    %87 = tpu.matmul %86, %73, %cst_37 {dimension_numbers = #tpu.dot_dimension_numbers<[1], [0], [0], [1], [0, 0, 1, 1], [], []>} : vector<64x64xf32>, vector<64x8xf32>, vector<64x8xf32> -> vector<64x8xf32>
    %88 = vector.extract_strided_slice %27 {offsets = [16, 0], sizes = [8, 32], strides = [1, 1]} : vector<32x32xf32> to vector<8x32xf32>
    %cst_38 = arith.constant dense<0.000000e+00> : vector<64x32xf32>
    %89 = tpu.matmul %87, %88, %cst_38 {dimension_numbers = #tpu.dot_dimension_numbers<[1], [0], [0], [1], [0, 0, 1, 1], [], []>} : vector<64x8xf32>, vector<8x32xf32>, vector<64x32xf32> -> vector<64x32xf32>
    %90 = arith.addf %70, %89 : vector<64x32xf32>
    %91 = vector.extract_strided_slice %16 {offsets = [0, 24], sizes = [64, 8], strides = [1, 1]} : vector<64x32xf32> to vector<64x8xf32>
    %92 = vector.extract_strided_slice %21 {offsets = [0, 24], sizes = [64, 8], strides = [1, 1]} : vector<64x32xf32> to vector<64x8xf32>
    %93 = vector.extract_strided_slice %26 {offsets = [0, 24], sizes = [64, 8], strides = [1, 1]} : vector<64x32xf32> to vector<64x8xf32>
    %cst_39 = arith.constant dense<0.000000e+00> : vector<64x64xf32>
    %94 = tpu.matmul %91, %92, %cst_39 {dimension_numbers = #tpu.dot_dimension_numbers<[1], [1], [0], [0], [0, 0, 1, 0], [], []>} : vector<64x8xf32>, vector<64x8xf32>, vector<64x64xf32> -> vector<64x64xf32>
    %cst_40 = arith.constant 0.353553385 : f32
    %95 = vector.broadcast %cst_40 : f32 to vector<64x64xf32>
    %96 = arith.mulf %94, %95 : vector<64x64xf32>
    %cst_41 = arith.constant dense<0xFF800000> : vector<64xf32>
    %97 = vector.multi_reduction <maximumf>, %96, %cst_41 [1] : vector<64x64xf32> to vector<64xf32>
    %98 = vector.shape_cast %97 : vector<64xf32> to vector<64x1xf32>
    %99 = vector.broadcast %98 : vector<64x1xf32> to vector<64x64xf32>
    %100 = arith.subf %96, %99 : vector<64x64xf32>
    %101 = math.exp %100 : vector<64x64xf32>
    %cst_42 = arith.constant dense<0.000000e+00> : vector<64xf32>
    %102 = vector.multi_reduction <add>, %101, %cst_42 [1] : vector<64x64xf32> to vector<64xf32>
    %103 = vector.shape_cast %102 : vector<64xf32> to vector<64x1xf32>
    %104 = tpu.reciprocal %103 {approx = true} : vector<64x1xf32> -> vector<64x1xf32>
    %105 = vector.broadcast %104 : vector<64x1xf32> to vector<64x64xf32>
    %106 = arith.mulf %101, %105 : vector<64x64xf32>
    %cst_43 = arith.constant dense<0.000000e+00> : vector<64x8xf32>
    %107 = tpu.matmul %106, %93, %cst_43 {dimension_numbers = #tpu.dot_dimension_numbers<[1], [0], [0], [1], [0, 0, 1, 1], [], []>} : vector<64x64xf32>, vector<64x8xf32>, vector<64x8xf32> -> vector<64x8xf32>
    %108 = vector.extract_strided_slice %27 {offsets = [24, 0], sizes = [8, 32], strides = [1, 1]} : vector<32x32xf32> to vector<8x32xf32>
    %cst_44 = arith.constant dense<0.000000e+00> : vector<64x32xf32>
    %109 = tpu.matmul %107, %108, %cst_44 {dimension_numbers = #tpu.dot_dimension_numbers<[1], [0], [0], [1], [0, 0, 1, 1], [], []>} : vector<64x8xf32>, vector<8x32xf32>, vector<64x32xf32> -> vector<64x32xf32>
    %110 = arith.addf %90, %109 : vector<64x32xf32>
    %cst_45 = arith.constant dense<0.000000e+00> : vector<64xf32>
    %111 = vector.multi_reduction <add>, %110, %cst_45 [1] : vector<64x32xf32> to vector<64xf32>
    %112 = vector.shape_cast %111 : vector<64xf32> to vector<64x1xf32>
    %cst_46 = arith.constant 3.200000e+01 : f32
    %113 = vector.broadcast %cst_46 : f32 to vector<64x1xf32>
    %114 = arith.divf %112, %113 : vector<64x1xf32>
    %115 = vector.broadcast %114 : vector<64x1xf32> to vector<64x32xf32>
    %116 = arith.subf %110, %115 : vector<64x32xf32>
    %117 = arith.mulf %116, %116 : vector<64x32xf32>
    %cst_47 = arith.constant dense<0.000000e+00> : vector<64xf32>
    %118 = vector.multi_reduction <add>, %117, %cst_47 [1] : vector<64x32xf32> to vector<64xf32>
    %119 = vector.shape_cast %118 : vector<64xf32> to vector<64x1xf32>
    %cst_48 = arith.constant 3.200000e+01 : f32
    %120 = vector.broadcast %cst_48 : f32 to vector<64x1xf32>
    %121 = arith.divf %119, %120 : vector<64x1xf32>
    %122 = vector.broadcast %114 : vector<64x1xf32> to vector<64x32xf32>
    %123 = arith.subf %110, %122 : vector<64x32xf32>
    %cst_49 = arith.constant 9.99999974E-6 : f32
    %124 = vector.broadcast %cst_49 : f32 to vector<64x1xf32>
    %125 = arith.addf %121, %124 : vector<64x1xf32>
    %126 = math.rsqrt %125 : vector<64x1xf32>
    %127 = vector.broadcast %126 : vector<64x1xf32> to vector<64x32xf32>
    %128 = arith.mulf %123, %127 : vector<64x32xf32>
    %c0_50 = arith.constant 0 : index
    %c0_51 = arith.constant 0 : index
    %129 = vector.load %arg9[%c0_50, %c0_51] : memref<2x32xf32, #tpu.memory_space<vmem>>, vector<1x32xf32>
    %130 = vector.broadcast %129 : vector<1x32xf32> to vector<64x32xf32>
    %131 = arith.mulf %128, %130 : vector<64x32xf32>
    %c1 = arith.constant 1 : index
    %c0_52 = arith.constant 0 : index
    %132 = vector.load %arg9[%c1, %c0_52] : memref<2x32xf32, #tpu.memory_space<vmem>>, vector<1x32xf32>
    %133 = vector.broadcast %132 : vector<1x32xf32> to vector<64x32xf32>
    %134 = arith.addf %131, %133 : vector<64x32xf32>
    %c0_53 = arith.constant 0 : index
    %c0_54 = arith.constant 0 : index
    %c0_55 = arith.constant 0 : index
    %135 = vector.load %arg10[%c0_53, %c0_54, %c0_55] : memref<1x64x32xf32, #tpu.memory_space<vmem>>, vector<1x64x32xf32>
    %136 = vector.shape_cast %135 : vector<1x64x32xf32> to vector<64x32xf32>
    %137 = vector.shape_cast %134 : vector<64x32xf32> to vector<1x64x32xf32>
    tpu.vector_store %arg10[%c0_53, %c0_54, %c0_55], %137 {strides = array<i32>} : memref<1x64x32xf32, #tpu.memory_space<vmem>>, vector<1x64x32xf32>,
    return
  }
  func.func @transform_0(%arg0: i32) -> (i32, i32, i32) {
    %c0_i32 = arith.constant 0 : i32
    %c0_i32_0 = arith.constant 0 : i32
    %c0_i32_1 = arith.constant 0 : i32
    return %arg0, %c0_i32, %c0_i32_0 : i32, i32, i32
  }
  func.func @transform_1(%arg0: i32) -> (i32, i32, i32) {
    %c0_i32 = arith.constant 0 : i32
    %c0_i32_0 = arith.constant 0 : i32
    %c0_i32_1 = arith.constant 0 : i32
    %c0_i32_2 = arith.constant 0 : i32
    return %c0_i32, %c0_i32_0, %c0_i32_1 : i32, i32, i32
  }
  func.func @transform_2(%arg0: i32) -> (i32, i32, i32) {
    %c0_i32 = arith.constant 0 : i32
    %c0_i32_0 = arith.constant 0 : i32
    %c0_i32_1 = arith.constant 0 : i32
    return %arg0, %c0_i32, %c0_i32_0 : i32, i32, i32
  }
  func.func @transform_3(%arg0: i32) -> (i32, i32, i32) {
    %c0_i32 = arith.constant 0 : i32
    %c0_i32_0 = arith.constant 0 : i32
    %c0_i32_1 = arith.constant 0 : i32
    %c0_i32_2 = arith.constant 0 : i32
    return %c0_i32, %c0_i32_0, %c0_i32_1 : i32, i32, i32
  }
  func.func @transform_4(%arg0: i32) -> (i32, i32) {
    %c0_i32 = arith.constant 0 : i32
    %c0_i32_0 = arith.constant 0 : i32
    %c0_i32_1 = arith.constant 0 : i32
    return %c0_i32, %c0_i32_0 : i32, i32
  }
  func.func @transform_5(%arg0: i32) -> (i32, i32) {
    %c0_i32 = arith.constant 0 : i32
    %c0_i32_0 = arith.constant 0 : i32
    %c0_i32_1 = arith.constant 0 : i32
    return %c0_i32, %c0_i32_0 : i32, i32
  }
  func.func @transform_6(%arg0: i32) -> (i32, i32) {
    %c0_i32 = arith.constant 0 : i32
    %c0_i32_0 = arith.constant 0 : i32
    %c0_i32_1 = arith.constant 0 : i32
    return %c0_i32, %c0_i32_0 : i32, i32
  }
  func.func @transform_7(%arg0: i32) -> (i32, i32) {
    %c0_i32 = arith.constant 0 : i32
    %c0_i32_0 = arith.constant 0 : i32
    %c0_i32_1 = arith.constant 0 : i32
    return %c0_i32, %c0_i32_0 : i32, i32
  }
  func.func @transform_8(%arg0: i32) -> (i32, i32) {
    %c0_i32 = arith.constant 0 : i32
    %c0_i32_0 = arith.constant 0 : i32
    %c0_i32_1 = arith.constant 0 : i32
    return %c0_i32, %c0_i32_0 : i32, i32
  }
  func.func @transform_9(%arg0: i32) -> (i32, i32, i32) {
    %c0_i32 = arith.constant 0 : i32
    %c0_i32_0 = arith.constant 0 : i32
    %c0_i32_1 = arith.constant 0 : i32
    return %arg0, %c0_i32, %c0_i32_0 : i32, i32, i32
  }
}

module attributes {stable_mosaic.version = 11 : i64} {
  func.func @_backbone_proj_kernel(%arg0: i32, %arg1: memref<64x3xf32, #tpu.memory_space<vmem>>, %arg2: memref<3x16xf32, #tpu.memory_space<vmem>>, %arg3: memref<1x16xf32, #tpu.memory_space<vmem>>, %arg4: memref<16x32xf32, #tpu.memory_space<vmem>>, %arg5: memref<1x32xf32, #tpu.memory_space<vmem>>, %arg6: memref<64x32xf32, #tpu.memory_space<vmem>>) attributes {dimension_semantics = [#tpu.dimension_semantics<parallel>], iteration_bounds = array<i64: 2>, scalar_prefetch = 0 : i64, scratch_operands = 0 : i64, tpu.core_type = #tpu.core_type<tc>, window_params = [{transform_indices = @transform_0, window_bounds = array<i64: 64, 3>}, {pipeline_mode = #tpu.pipeline_mode<synchronous>, transform_indices = @transform_1, window_bounds = array<i64: 3, 16>}, {pipeline_mode = #tpu.pipeline_mode<synchronous>, transform_indices = @transform_2, window_bounds = array<i64: 1, 16>}, {pipeline_mode = #tpu.pipeline_mode<synchronous>, transform_indices = @transform_3, window_bounds = array<i64: 16, 32>}, {pipeline_mode = #tpu.pipeline_mode<synchronous>, transform_indices = @transform_4, window_bounds = array<i64: 1, 32>}, {transform_indices = @transform_5, window_bounds = array<i64: 64, 32>}]} {
    %c0 = arith.constant 0 : index
    %c0_0 = arith.constant 0 : index
    %0 = vector.load %arg1[%c0, %c0_0] : memref<64x3xf32, #tpu.memory_space<vmem>>, vector<64x3xf32>
    %c0_1 = arith.constant 0 : index
    %c0_2 = arith.constant 0 : index
    %1 = vector.load %arg2[%c0_1, %c0_2] : memref<3x16xf32, #tpu.memory_space<vmem>>, vector<3x16xf32>
    %cst = arith.constant dense<0.000000e+00> : vector<64x16xf32>
    %2 = tpu.matmul %0, %1, %cst {dimension_numbers = #tpu.dot_dimension_numbers<[1], [0], [0], [1], [0, 0, 1, 1], [], []>} : vector<64x3xf32>, vector<3x16xf32>, vector<64x16xf32> -> vector<64x16xf32>
    %c0_3 = arith.constant 0 : index
    %c0_4 = arith.constant 0 : index
    %3 = vector.load %arg3[%c0_3, %c0_4] : memref<1x16xf32, #tpu.memory_space<vmem>>, vector<1x16xf32>
    %4 = vector.broadcast %3 : vector<1x16xf32> to vector<64x16xf32>
    %5 = arith.addf %2, %4 : vector<64x16xf32>
    %cst_5 = arith.constant 0.000000e+00 : f32
    %6 = vector.broadcast %cst_5 : f32 to vector<64x16xf32>
    %7 = arith.maximumf %5, %6 : vector<64x16xf32>
    %c0_6 = arith.constant 0 : index
    %c0_7 = arith.constant 0 : index
    %8 = vector.load %arg4[%c0_6, %c0_7] : memref<16x32xf32, #tpu.memory_space<vmem>>, vector<16x32xf32>
    %cst_8 = arith.constant dense<0.000000e+00> : vector<64x32xf32>
    %9 = tpu.matmul %7, %8, %cst_8 {dimension_numbers = #tpu.dot_dimension_numbers<[1], [0], [0], [1], [0, 0, 1, 1], [], []>} : vector<64x16xf32>, vector<16x32xf32>, vector<64x32xf32> -> vector<64x32xf32>
    %c0_9 = arith.constant 0 : index
    %c0_10 = arith.constant 0 : index
    %10 = vector.load %arg5[%c0_9, %c0_10] : memref<1x32xf32, #tpu.memory_space<vmem>>, vector<1x32xf32>
    %11 = vector.broadcast %10 : vector<1x32xf32> to vector<64x32xf32>
    %12 = arith.addf %9, %11 : vector<64x32xf32>
    %c0_11 = arith.constant 0 : index
    %c0_12 = arith.constant 0 : index
    %13 = vector.load %arg6[%c0_11, %c0_12] : memref<64x32xf32, #tpu.memory_space<vmem>>, vector<64x32xf32>
    tpu.vector_store %arg6[%c0_11, %c0_12], %12 {strides = array<i32>} : memref<64x32xf32, #tpu.memory_space<vmem>>, vector<64x32xf32>,
    return
  }
  func.func @transform_0(%arg0: i32) -> (i32, i32) {
    %c0_i32 = arith.constant 0 : i32
    %c0_i32_0 = arith.constant 0 : i32
    return %arg0, %c0_i32 : i32, i32
  }
  func.func @transform_1(%arg0: i32) -> (i32, i32) {
    %c0_i32 = arith.constant 0 : i32
    %c0_i32_0 = arith.constant 0 : i32
    %c0_i32_1 = arith.constant 0 : i32
    return %c0_i32, %c0_i32_0 : i32, i32
  }
  func.func @transform_2(%arg0: i32) -> (i32, i32) {
    %c0_i32 = arith.constant 0 : i32
    %c0_i32_0 = arith.constant 0 : i32
    %c0_i32_1 = arith.constant 0 : i32
    return %c0_i32, %c0_i32_0 : i32, i32
  }
  func.func @transform_3(%arg0: i32) -> (i32, i32) {
    %c0_i32 = arith.constant 0 : i32
    %c0_i32_0 = arith.constant 0 : i32
    %c0_i32_1 = arith.constant 0 : i32
    return %c0_i32, %c0_i32_0 : i32, i32
  }
  func.func @transform_4(%arg0: i32) -> (i32, i32) {
    %c0_i32 = arith.constant 0 : i32
    %c0_i32_0 = arith.constant 0 : i32
    %c0_i32_1 = arith.constant 0 : i32
    return %c0_i32, %c0_i32_0 : i32, i32
  }
  func.func @transform_5(%arg0: i32) -> (i32, i32) {
    %c0_i32 = arith.constant 0 : i32
    %c0_i32_0 = arith.constant 0 : i32
    return %arg0, %c0_i32 : i32, i32
  }
}

module attributes {stable_mosaic.version = 11 : i64} {
  func.func @_ffn_block_kernel(%arg0: i32, %arg1: memref<64x32xf32, #tpu.memory_space<vmem>>, %arg2: memref<32x64xf32, #tpu.memory_space<vmem>>, %arg3: memref<1x64xf32, #tpu.memory_space<vmem>>, %arg4: memref<64x32xf32, #tpu.memory_space<vmem>>, %arg5: memref<1x32xf32, #tpu.memory_space<vmem>>, %arg6: memref<2x32xf32, #tpu.memory_space<vmem>>, %arg7: memref<64x32xf32, #tpu.memory_space<vmem>>) attributes {dimension_semantics = [#tpu.dimension_semantics<parallel>], iteration_bounds = array<i64: 2>, scalar_prefetch = 0 : i64, scratch_operands = 0 : i64, tpu.core_type = #tpu.core_type<tc>, window_params = [{transform_indices = @transform_0, window_bounds = array<i64: 64, 32>}, {pipeline_mode = #tpu.pipeline_mode<synchronous>, transform_indices = @transform_1, window_bounds = array<i64: 32, 64>}, {pipeline_mode = #tpu.pipeline_mode<synchronous>, transform_indices = @transform_2, window_bounds = array<i64: 1, 64>}, {pipeline_mode = #tpu.pipeline_mode<synchronous>, transform_indices = @transform_3, window_bounds = array<i64: 64, 32>}, {pipeline_mode = #tpu.pipeline_mode<synchronous>, transform_indices = @transform_4, window_bounds = array<i64: 1, 32>}, {pipeline_mode = #tpu.pipeline_mode<synchronous>, transform_indices = @transform_5, window_bounds = array<i64: 2, 32>}, {transform_indices = @transform_6, window_bounds = array<i64: 64, 32>}]} {
    %c0 = arith.constant 0 : index
    %c0_0 = arith.constant 0 : index
    %0 = vector.load %arg1[%c0, %c0_0] : memref<64x32xf32, #tpu.memory_space<vmem>>, vector<64x32xf32>
    %c0_1 = arith.constant 0 : index
    %c0_2 = arith.constant 0 : index
    %1 = vector.load %arg2[%c0_1, %c0_2] : memref<32x64xf32, #tpu.memory_space<vmem>>, vector<32x64xf32>
    %cst = arith.constant dense<0.000000e+00> : vector<64x64xf32>
    %2 = tpu.matmul %0, %1, %cst {dimension_numbers = #tpu.dot_dimension_numbers<[1], [0], [0], [1], [0, 0, 1, 1], [], []>} : vector<64x32xf32>, vector<32x64xf32>, vector<64x64xf32> -> vector<64x64xf32>
    %c0_3 = arith.constant 0 : index
    %c0_4 = arith.constant 0 : index
    %3 = vector.load %arg3[%c0_3, %c0_4] : memref<1x64xf32, #tpu.memory_space<vmem>>, vector<1x64xf32>
    %4 = vector.broadcast %3 : vector<1x64xf32> to vector<64x64xf32>
    %5 = arith.addf %2, %4 : vector<64x64xf32>
    %cst_5 = arith.constant 0.000000e+00 : f32
    %6 = vector.broadcast %cst_5 : f32 to vector<64x64xf32>
    %7 = arith.maximumf %5, %6 : vector<64x64xf32>
    %c0_6 = arith.constant 0 : index
    %c0_7 = arith.constant 0 : index
    %8 = vector.load %arg4[%c0_6, %c0_7] : memref<64x32xf32, #tpu.memory_space<vmem>>, vector<64x32xf32>
    %cst_8 = arith.constant dense<0.000000e+00> : vector<64x32xf32>
    %9 = tpu.matmul %7, %8, %cst_8 {dimension_numbers = #tpu.dot_dimension_numbers<[1], [0], [0], [1], [0, 0, 1, 1], [], []>} : vector<64x64xf32>, vector<64x32xf32>, vector<64x32xf32> -> vector<64x32xf32>
    %10 = arith.addf %0, %9 : vector<64x32xf32>
    %c0_9 = arith.constant 0 : index
    %c0_10 = arith.constant 0 : index
    %11 = vector.load %arg5[%c0_9, %c0_10] : memref<1x32xf32, #tpu.memory_space<vmem>>, vector<1x32xf32>
    %12 = vector.broadcast %11 : vector<1x32xf32> to vector<64x32xf32>
    %13 = arith.addf %10, %12 : vector<64x32xf32>
    %cst_11 = arith.constant dense<0.000000e+00> : vector<64xf32>
    %14 = vector.multi_reduction <add>, %13, %cst_11 [1] : vector<64x32xf32> to vector<64xf32>
    %15 = vector.shape_cast %14 : vector<64xf32> to vector<64x1xf32>
    %cst_12 = arith.constant 3.200000e+01 : f32
    %16 = vector.broadcast %cst_12 : f32 to vector<64x1xf32>
    %17 = arith.divf %15, %16 : vector<64x1xf32>
    %18 = vector.broadcast %17 : vector<64x1xf32> to vector<64x32xf32>
    %19 = arith.subf %13, %18 : vector<64x32xf32>
    %20 = arith.mulf %19, %19 : vector<64x32xf32>
    %cst_13 = arith.constant dense<0.000000e+00> : vector<64xf32>
    %21 = vector.multi_reduction <add>, %20, %cst_13 [1] : vector<64x32xf32> to vector<64xf32>
    %22 = vector.shape_cast %21 : vector<64xf32> to vector<64x1xf32>
    %cst_14 = arith.constant 3.200000e+01 : f32
    %23 = vector.broadcast %cst_14 : f32 to vector<64x1xf32>
    %24 = arith.divf %22, %23 : vector<64x1xf32>
    %25 = vector.broadcast %17 : vector<64x1xf32> to vector<64x32xf32>
    %26 = arith.subf %13, %25 : vector<64x32xf32>
    %cst_15 = arith.constant 9.99999974E-6 : f32
    %27 = vector.broadcast %cst_15 : f32 to vector<64x1xf32>
    %28 = arith.addf %24, %27 : vector<64x1xf32>
    %29 = math.rsqrt %28 : vector<64x1xf32>
    %30 = vector.broadcast %29 : vector<64x1xf32> to vector<64x32xf32>
    %31 = arith.mulf %26, %30 : vector<64x32xf32>
    %c0_16 = arith.constant 0 : index
    %c0_17 = arith.constant 0 : index
    %32 = vector.load %arg6[%c0_16, %c0_17] : memref<2x32xf32, #tpu.memory_space<vmem>>, vector<1x32xf32>
    %33 = vector.broadcast %32 : vector<1x32xf32> to vector<64x32xf32>
    %34 = arith.mulf %31, %33 : vector<64x32xf32>
    %c1 = arith.constant 1 : index
    %c0_18 = arith.constant 0 : index
    %35 = vector.load %arg6[%c1, %c0_18] : memref<2x32xf32, #tpu.memory_space<vmem>>, vector<1x32xf32>
    %36 = vector.broadcast %35 : vector<1x32xf32> to vector<64x32xf32>
    %37 = arith.addf %34, %36 : vector<64x32xf32>
    %c0_19 = arith.constant 0 : index
    %c0_20 = arith.constant 0 : index
    %38 = vector.load %arg7[%c0_19, %c0_20] : memref<64x32xf32, #tpu.memory_space<vmem>>, vector<64x32xf32>
    tpu.vector_store %arg7[%c0_19, %c0_20], %37 {strides = array<i32>} : memref<64x32xf32, #tpu.memory_space<vmem>>, vector<64x32xf32>,
    return
  }
  func.func @transform_0(%arg0: i32) -> (i32, i32) {
    %c0_i32 = arith.constant 0 : i32
    %c0_i32_0 = arith.constant 0 : i32
    return %arg0, %c0_i32 : i32, i32
  }
  func.func @transform_1(%arg0: i32) -> (i32, i32) {
    %c0_i32 = arith.constant 0 : i32
    %c0_i32_0 = arith.constant 0 : i32
    %c0_i32_1 = arith.constant 0 : i32
    return %c0_i32, %c0_i32_0 : i32, i32
  }
  func.func @transform_2(%arg0: i32) -> (i32, i32) {
    %c0_i32 = arith.constant 0 : i32
    %c0_i32_0 = arith.constant 0 : i32
    %c0_i32_1 = arith.constant 0 : i32
    return %c0_i32, %c0_i32_0 : i32, i32
  }
  func.func @transform_3(%arg0: i32) -> (i32, i32) {
    %c0_i32 = arith.constant 0 : i32
    %c0_i32_0 = arith.constant 0 : i32
    %c0_i32_1 = arith.constant 0 : i32
    return %c0_i32, %c0_i32_0 : i32, i32
  }
  func.func @transform_4(%arg0: i32) -> (i32, i32) {
    %c0_i32 = arith.constant 0 : i32
    %c0_i32_0 = arith.constant 0 : i32
    %c0_i32_1 = arith.constant 0 : i32
    return %c0_i32, %c0_i32_0 : i32, i32
  }
  func.func @transform_5(%arg0: i32) -> (i32, i32) {
    %c0_i32 = arith.constant 0 : i32
    %c0_i32_0 = arith.constant 0 : i32
    %c0_i32_1 = arith.constant 0 : i32
    return %c0_i32, %c0_i32_0 : i32, i32
  }
  func.func @transform_6(%arg0: i32) -> (i32, i32) {
    %c0_i32 = arith.constant 0 : i32
    %c0_i32_0 = arith.constant 0 : i32
    return %arg0, %c0_i32 : i32, i32
  }
}

module attributes {stable_mosaic.version = 11 : i64} {
  func.func @_attn_block_kernel(%arg0: i32, %arg1: memref<1x8x32xf32, #tpu.memory_space<vmem>>, %arg2: memref<1x8x32xf32, #tpu.memory_space<vmem>>, %arg3: memref<1x8x32xf32, #tpu.memory_space<vmem>>, %arg4: memref<1x8x32xf32, #tpu.memory_space<vmem>>, %arg5: memref<32x96xf32, #tpu.memory_space<vmem>>, %arg6: memref<1x96xf32, #tpu.memory_space<vmem>>, %arg7: memref<32x32xf32, #tpu.memory_space<vmem>>, %arg8: memref<1x32xf32, #tpu.memory_space<vmem>>, %arg9: memref<2x32xf32, #tpu.memory_space<vmem>>, %arg10: memref<1x8x32xf32, #tpu.memory_space<vmem>>) attributes {dimension_semantics = [#tpu.dimension_semantics<parallel>], iteration_bounds = array<i64: 2>, scalar_prefetch = 0 : i64, scratch_operands = 0 : i64, tpu.core_type = #tpu.core_type<tc>, window_params = [{transform_indices = @transform_0, window_bounds = array<i64: 1, 8, 32>}, {pipeline_mode = #tpu.pipeline_mode<synchronous>, transform_indices = @transform_1, window_bounds = array<i64: 1, 8, 32>}, {transform_indices = @transform_2, window_bounds = array<i64: 1, 8, 32>}, {pipeline_mode = #tpu.pipeline_mode<synchronous>, transform_indices = @transform_3, window_bounds = array<i64: 1, 8, 32>}, {pipeline_mode = #tpu.pipeline_mode<synchronous>, transform_indices = @transform_4, window_bounds = array<i64: 32, 96>}, {pipeline_mode = #tpu.pipeline_mode<synchronous>, transform_indices = @transform_5, window_bounds = array<i64: 1, 96>}, {pipeline_mode = #tpu.pipeline_mode<synchronous>, transform_indices = @transform_6, window_bounds = array<i64: 32, 32>}, {pipeline_mode = #tpu.pipeline_mode<synchronous>, transform_indices = @transform_7, window_bounds = array<i64: 1, 32>}, {pipeline_mode = #tpu.pipeline_mode<synchronous>, transform_indices = @transform_8, window_bounds = array<i64: 2, 32>}, {transform_indices = @transform_9, window_bounds = array<i64: 1, 8, 32>}]} {
    %c0 = arith.constant 0 : index
    %c0_0 = arith.constant 0 : index
    %c0_1 = arith.constant 0 : index
    %0 = vector.load %arg1[%c0, %c0_0, %c0_1] : memref<1x8x32xf32, #tpu.memory_space<vmem>>, vector<1x8x32xf32>
    %1 = vector.shape_cast %0 : vector<1x8x32xf32> to vector<8x32xf32>
    %c0_2 = arith.constant 0 : index
    %c0_3 = arith.constant 0 : index
    %c0_4 = arith.constant 0 : index
    %2 = vector.load %arg3[%c0_2, %c0_3, %c0_4] : memref<1x8x32xf32, #tpu.memory_space<vmem>>, vector<1x8x32xf32>
    %3 = vector.shape_cast %2 : vector<1x8x32xf32> to vector<8x32xf32>
    %c0_5 = arith.constant 0 : index
    %c0_6 = arith.constant 0 : index
    %c0_7 = arith.constant 0 : index
    %4 = vector.load %arg2[%c0_5, %c0_6, %c0_7] : memref<1x8x32xf32, #tpu.memory_space<vmem>>, vector<1x8x32xf32>
    %5 = vector.shape_cast %4 : vector<1x8x32xf32> to vector<8x32xf32>
    %6 = arith.addf %1, %5 : vector<8x32xf32>
    %c0_8 = arith.constant 0 : index
    %c0_9 = arith.constant 0 : index
    %c0_10 = arith.constant 0 : index
    %7 = vector.load %arg4[%c0_8, %c0_9, %c0_10] : memref<1x8x32xf32, #tpu.memory_space<vmem>>, vector<1x8x32xf32>
    %8 = vector.shape_cast %7 : vector<1x8x32xf32> to vector<8x32xf32>
    %9 = arith.addf %3, %8 : vector<8x32xf32>
    %c0_11 = arith.constant 0 : index
    %c0_12 = arith.constant 0 : index
    %10 = vector.load %arg5[%c0_11, %c0_12] : memref<32x96xf32, #tpu.memory_space<vmem>>, vector<32x96xf32>
    %c0_13 = arith.constant 0 : index
    %c0_14 = arith.constant 0 : index
    %11 = vector.load %arg6[%c0_13, %c0_14] : memref<1x96xf32, #tpu.memory_space<vmem>>, vector<1x96xf32>
    %12 = vector.extract_strided_slice %10 {offsets = [0, 0], sizes = [32, 32], strides = [1, 1]} : vector<32x96xf32> to vector<32x32xf32>
    %cst = arith.constant dense<0.000000e+00> : vector<8x32xf32>
    %13 = tpu.matmul %6, %12, %cst {dimension_numbers = #tpu.dot_dimension_numbers<[1], [0], [0], [1], [0, 0, 1, 1], [], []>} : vector<8x32xf32>, vector<32x32xf32>, vector<8x32xf32> -> vector<8x32xf32>
    %14 = vector.extract_strided_slice %11 {offsets = [0, 0], sizes = [1, 32], strides = [1, 1]} : vector<1x96xf32> to vector<1x32xf32>
    %15 = vector.broadcast %14 : vector<1x32xf32> to vector<8x32xf32>
    %16 = arith.addf %13, %15 : vector<8x32xf32>
    %17 = vector.extract_strided_slice %10 {offsets = [0, 32], sizes = [32, 32], strides = [1, 1]} : vector<32x96xf32> to vector<32x32xf32>
    %cst_15 = arith.constant dense<0.000000e+00> : vector<8x32xf32>
    %18 = tpu.matmul %9, %17, %cst_15 {dimension_numbers = #tpu.dot_dimension_numbers<[1], [0], [0], [1], [0, 0, 1, 1], [], []>} : vector<8x32xf32>, vector<32x32xf32>, vector<8x32xf32> -> vector<8x32xf32>
    %19 = vector.extract_strided_slice %11 {offsets = [0, 32], sizes = [1, 32], strides = [1, 1]} : vector<1x96xf32> to vector<1x32xf32>
    %20 = vector.broadcast %19 : vector<1x32xf32> to vector<8x32xf32>
    %21 = arith.addf %18, %20 : vector<8x32xf32>
    %22 = vector.extract_strided_slice %10 {offsets = [0, 64], sizes = [32, 32], strides = [1, 1]} : vector<32x96xf32> to vector<32x32xf32>
    %cst_16 = arith.constant dense<0.000000e+00> : vector<8x32xf32>
    %23 = tpu.matmul %3, %22, %cst_16 {dimension_numbers = #tpu.dot_dimension_numbers<[1], [0], [0], [1], [0, 0, 1, 1], [], []>} : vector<8x32xf32>, vector<32x32xf32>, vector<8x32xf32> -> vector<8x32xf32>
    %24 = vector.extract_strided_slice %11 {offsets = [0, 64], sizes = [1, 32], strides = [1, 1]} : vector<1x96xf32> to vector<1x32xf32>
    %25 = vector.broadcast %24 : vector<1x32xf32> to vector<8x32xf32>
    %26 = arith.addf %23, %25 : vector<8x32xf32>
    %c0_17 = arith.constant 0 : index
    %c0_18 = arith.constant 0 : index
    %27 = vector.load %arg7[%c0_17, %c0_18] : memref<32x32xf32, #tpu.memory_space<vmem>>, vector<32x32xf32>
    %c0_19 = arith.constant 0 : index
    %c0_20 = arith.constant 0 : index
    %28 = vector.load %arg8[%c0_19, %c0_20] : memref<1x32xf32, #tpu.memory_space<vmem>>, vector<1x32xf32>
    %29 = vector.broadcast %28 : vector<1x32xf32> to vector<8x32xf32>
    %30 = arith.addf %1, %29 : vector<8x32xf32>
    %31 = vector.extract_strided_slice %16 {offsets = [0, 0], sizes = [8, 8], strides = [1, 1]} : vector<8x32xf32> to vector<8x8xf32>
    %32 = vector.extract_strided_slice %21 {offsets = [0, 0], sizes = [8, 8], strides = [1, 1]} : vector<8x32xf32> to vector<8x8xf32>
    %33 = vector.extract_strided_slice %26 {offsets = [0, 0], sizes = [8, 8], strides = [1, 1]} : vector<8x32xf32> to vector<8x8xf32>
    %cst_21 = arith.constant dense<0.000000e+00> : vector<8x8xf32>
    %34 = tpu.matmul %31, %32, %cst_21 {dimension_numbers = #tpu.dot_dimension_numbers<[1], [1], [0], [0], [0, 0, 1, 0], [], []>} : vector<8x8xf32>, vector<8x8xf32>, vector<8x8xf32> -> vector<8x8xf32>
    %cst_22 = arith.constant 0.353553385 : f32
    %35 = vector.broadcast %cst_22 : f32 to vector<8x8xf32>
    %36 = arith.mulf %34, %35 : vector<8x8xf32>
    %cst_23 = arith.constant dense<0xFF800000> : vector<8xf32>
    %37 = vector.multi_reduction <maximumf>, %36, %cst_23 [1] : vector<8x8xf32> to vector<8xf32>
    %38 = vector.shape_cast %37 : vector<8xf32> to vector<8x1xf32>
    %39 = vector.broadcast %38 : vector<8x1xf32> to vector<8x8xf32>
    %40 = arith.subf %36, %39 : vector<8x8xf32>
    %41 = math.exp %40 : vector<8x8xf32>
    %cst_24 = arith.constant dense<0.000000e+00> : vector<8xf32>
    %42 = vector.multi_reduction <add>, %41, %cst_24 [1] : vector<8x8xf32> to vector<8xf32>
    %43 = vector.shape_cast %42 : vector<8xf32> to vector<8x1xf32>
    %44 = tpu.reciprocal %43 {approx = true} : vector<8x1xf32> -> vector<8x1xf32>
    %45 = vector.broadcast %44 : vector<8x1xf32> to vector<8x8xf32>
    %46 = arith.mulf %41, %45 : vector<8x8xf32>
    %cst_25 = arith.constant dense<0.000000e+00> : vector<8x8xf32>
    %47 = tpu.matmul %46, %33, %cst_25 {dimension_numbers = #tpu.dot_dimension_numbers<[1], [0], [0], [1], [0, 0, 1, 1], [], []>} : vector<8x8xf32>, vector<8x8xf32>, vector<8x8xf32> -> vector<8x8xf32>
    %48 = vector.extract_strided_slice %27 {offsets = [0, 0], sizes = [8, 32], strides = [1, 1]} : vector<32x32xf32> to vector<8x32xf32>
    %cst_26 = arith.constant dense<0.000000e+00> : vector<8x32xf32>
    %49 = tpu.matmul %47, %48, %cst_26 {dimension_numbers = #tpu.dot_dimension_numbers<[1], [0], [0], [1], [0, 0, 1, 1], [], []>} : vector<8x8xf32>, vector<8x32xf32>, vector<8x32xf32> -> vector<8x32xf32>
    %50 = arith.addf %30, %49 : vector<8x32xf32>
    %51 = vector.extract_strided_slice %16 {offsets = [0, 8], sizes = [8, 8], strides = [1, 1]} : vector<8x32xf32> to vector<8x8xf32>
    %52 = vector.extract_strided_slice %21 {offsets = [0, 8], sizes = [8, 8], strides = [1, 1]} : vector<8x32xf32> to vector<8x8xf32>
    %53 = vector.extract_strided_slice %26 {offsets = [0, 8], sizes = [8, 8], strides = [1, 1]} : vector<8x32xf32> to vector<8x8xf32>
    %cst_27 = arith.constant dense<0.000000e+00> : vector<8x8xf32>
    %54 = tpu.matmul %51, %52, %cst_27 {dimension_numbers = #tpu.dot_dimension_numbers<[1], [1], [0], [0], [0, 0, 1, 0], [], []>} : vector<8x8xf32>, vector<8x8xf32>, vector<8x8xf32> -> vector<8x8xf32>
    %cst_28 = arith.constant 0.353553385 : f32
    %55 = vector.broadcast %cst_28 : f32 to vector<8x8xf32>
    %56 = arith.mulf %54, %55 : vector<8x8xf32>
    %cst_29 = arith.constant dense<0xFF800000> : vector<8xf32>
    %57 = vector.multi_reduction <maximumf>, %56, %cst_29 [1] : vector<8x8xf32> to vector<8xf32>
    %58 = vector.shape_cast %57 : vector<8xf32> to vector<8x1xf32>
    %59 = vector.broadcast %58 : vector<8x1xf32> to vector<8x8xf32>
    %60 = arith.subf %56, %59 : vector<8x8xf32>
    %61 = math.exp %60 : vector<8x8xf32>
    %cst_30 = arith.constant dense<0.000000e+00> : vector<8xf32>
    %62 = vector.multi_reduction <add>, %61, %cst_30 [1] : vector<8x8xf32> to vector<8xf32>
    %63 = vector.shape_cast %62 : vector<8xf32> to vector<8x1xf32>
    %64 = tpu.reciprocal %63 {approx = true} : vector<8x1xf32> -> vector<8x1xf32>
    %65 = vector.broadcast %64 : vector<8x1xf32> to vector<8x8xf32>
    %66 = arith.mulf %61, %65 : vector<8x8xf32>
    %cst_31 = arith.constant dense<0.000000e+00> : vector<8x8xf32>
    %67 = tpu.matmul %66, %53, %cst_31 {dimension_numbers = #tpu.dot_dimension_numbers<[1], [0], [0], [1], [0, 0, 1, 1], [], []>} : vector<8x8xf32>, vector<8x8xf32>, vector<8x8xf32> -> vector<8x8xf32>
    %68 = vector.extract_strided_slice %27 {offsets = [8, 0], sizes = [8, 32], strides = [1, 1]} : vector<32x32xf32> to vector<8x32xf32>
    %cst_32 = arith.constant dense<0.000000e+00> : vector<8x32xf32>
    %69 = tpu.matmul %67, %68, %cst_32 {dimension_numbers = #tpu.dot_dimension_numbers<[1], [0], [0], [1], [0, 0, 1, 1], [], []>} : vector<8x8xf32>, vector<8x32xf32>, vector<8x32xf32> -> vector<8x32xf32>
    %70 = arith.addf %50, %69 : vector<8x32xf32>
    %71 = vector.extract_strided_slice %16 {offsets = [0, 16], sizes = [8, 8], strides = [1, 1]} : vector<8x32xf32> to vector<8x8xf32>
    %72 = vector.extract_strided_slice %21 {offsets = [0, 16], sizes = [8, 8], strides = [1, 1]} : vector<8x32xf32> to vector<8x8xf32>
    %73 = vector.extract_strided_slice %26 {offsets = [0, 16], sizes = [8, 8], strides = [1, 1]} : vector<8x32xf32> to vector<8x8xf32>
    %cst_33 = arith.constant dense<0.000000e+00> : vector<8x8xf32>
    %74 = tpu.matmul %71, %72, %cst_33 {dimension_numbers = #tpu.dot_dimension_numbers<[1], [1], [0], [0], [0, 0, 1, 0], [], []>} : vector<8x8xf32>, vector<8x8xf32>, vector<8x8xf32> -> vector<8x8xf32>
    %cst_34 = arith.constant 0.353553385 : f32
    %75 = vector.broadcast %cst_34 : f32 to vector<8x8xf32>
    %76 = arith.mulf %74, %75 : vector<8x8xf32>
    %cst_35 = arith.constant dense<0xFF800000> : vector<8xf32>
    %77 = vector.multi_reduction <maximumf>, %76, %cst_35 [1] : vector<8x8xf32> to vector<8xf32>
    %78 = vector.shape_cast %77 : vector<8xf32> to vector<8x1xf32>
    %79 = vector.broadcast %78 : vector<8x1xf32> to vector<8x8xf32>
    %80 = arith.subf %76, %79 : vector<8x8xf32>
    %81 = math.exp %80 : vector<8x8xf32>
    %cst_36 = arith.constant dense<0.000000e+00> : vector<8xf32>
    %82 = vector.multi_reduction <add>, %81, %cst_36 [1] : vector<8x8xf32> to vector<8xf32>
    %83 = vector.shape_cast %82 : vector<8xf32> to vector<8x1xf32>
    %84 = tpu.reciprocal %83 {approx = true} : vector<8x1xf32> -> vector<8x1xf32>
    %85 = vector.broadcast %84 : vector<8x1xf32> to vector<8x8xf32>
    %86 = arith.mulf %81, %85 : vector<8x8xf32>
    %cst_37 = arith.constant dense<0.000000e+00> : vector<8x8xf32>
    %87 = tpu.matmul %86, %73, %cst_37 {dimension_numbers = #tpu.dot_dimension_numbers<[1], [0], [0], [1], [0, 0, 1, 1], [], []>} : vector<8x8xf32>, vector<8x8xf32>, vector<8x8xf32> -> vector<8x8xf32>
    %88 = vector.extract_strided_slice %27 {offsets = [16, 0], sizes = [8, 32], strides = [1, 1]} : vector<32x32xf32> to vector<8x32xf32>
    %cst_38 = arith.constant dense<0.000000e+00> : vector<8x32xf32>
    %89 = tpu.matmul %87, %88, %cst_38 {dimension_numbers = #tpu.dot_dimension_numbers<[1], [0], [0], [1], [0, 0, 1, 1], [], []>} : vector<8x8xf32>, vector<8x32xf32>, vector<8x32xf32> -> vector<8x32xf32>
    %90 = arith.addf %70, %89 : vector<8x32xf32>
    %91 = vector.extract_strided_slice %16 {offsets = [0, 24], sizes = [8, 8], strides = [1, 1]} : vector<8x32xf32> to vector<8x8xf32>
    %92 = vector.extract_strided_slice %21 {offsets = [0, 24], sizes = [8, 8], strides = [1, 1]} : vector<8x32xf32> to vector<8x8xf32>
    %93 = vector.extract_strided_slice %26 {offsets = [0, 24], sizes = [8, 8], strides = [1, 1]} : vector<8x32xf32> to vector<8x8xf32>
    %cst_39 = arith.constant dense<0.000000e+00> : vector<8x8xf32>
    %94 = tpu.matmul %91, %92, %cst_39 {dimension_numbers = #tpu.dot_dimension_numbers<[1], [1], [0], [0], [0, 0, 1, 0], [], []>} : vector<8x8xf32>, vector<8x8xf32>, vector<8x8xf32> -> vector<8x8xf32>
    %cst_40 = arith.constant 0.353553385 : f32
    %95 = vector.broadcast %cst_40 : f32 to vector<8x8xf32>
    %96 = arith.mulf %94, %95 : vector<8x8xf32>
    %cst_41 = arith.constant dense<0xFF800000> : vector<8xf32>
    %97 = vector.multi_reduction <maximumf>, %96, %cst_41 [1] : vector<8x8xf32> to vector<8xf32>
    %98 = vector.shape_cast %97 : vector<8xf32> to vector<8x1xf32>
    %99 = vector.broadcast %98 : vector<8x1xf32> to vector<8x8xf32>
    %100 = arith.subf %96, %99 : vector<8x8xf32>
    %101 = math.exp %100 : vector<8x8xf32>
    %cst_42 = arith.constant dense<0.000000e+00> : vector<8xf32>
    %102 = vector.multi_reduction <add>, %101, %cst_42 [1] : vector<8x8xf32> to vector<8xf32>
    %103 = vector.shape_cast %102 : vector<8xf32> to vector<8x1xf32>
    %104 = tpu.reciprocal %103 {approx = true} : vector<8x1xf32> -> vector<8x1xf32>
    %105 = vector.broadcast %104 : vector<8x1xf32> to vector<8x8xf32>
    %106 = arith.mulf %101, %105 : vector<8x8xf32>
    %cst_43 = arith.constant dense<0.000000e+00> : vector<8x8xf32>
    %107 = tpu.matmul %106, %93, %cst_43 {dimension_numbers = #tpu.dot_dimension_numbers<[1], [0], [0], [1], [0, 0, 1, 1], [], []>} : vector<8x8xf32>, vector<8x8xf32>, vector<8x8xf32> -> vector<8x8xf32>
    %108 = vector.extract_strided_slice %27 {offsets = [24, 0], sizes = [8, 32], strides = [1, 1]} : vector<32x32xf32> to vector<8x32xf32>
    %cst_44 = arith.constant dense<0.000000e+00> : vector<8x32xf32>
    %109 = tpu.matmul %107, %108, %cst_44 {dimension_numbers = #tpu.dot_dimension_numbers<[1], [0], [0], [1], [0, 0, 1, 1], [], []>} : vector<8x8xf32>, vector<8x32xf32>, vector<8x32xf32> -> vector<8x32xf32>
    %110 = arith.addf %90, %109 : vector<8x32xf32>
    %cst_45 = arith.constant dense<0.000000e+00> : vector<8xf32>
    %111 = vector.multi_reduction <add>, %110, %cst_45 [1] : vector<8x32xf32> to vector<8xf32>
    %112 = vector.shape_cast %111 : vector<8xf32> to vector<8x1xf32>
    %cst_46 = arith.constant 3.200000e+01 : f32
    %113 = vector.broadcast %cst_46 : f32 to vector<8x1xf32>
    %114 = arith.divf %112, %113 : vector<8x1xf32>
    %115 = vector.broadcast %114 : vector<8x1xf32> to vector<8x32xf32>
    %116 = arith.subf %110, %115 : vector<8x32xf32>
    %117 = arith.mulf %116, %116 : vector<8x32xf32>
    %cst_47 = arith.constant dense<0.000000e+00> : vector<8xf32>
    %118 = vector.multi_reduction <add>, %117, %cst_47 [1] : vector<8x32xf32> to vector<8xf32>
    %119 = vector.shape_cast %118 : vector<8xf32> to vector<8x1xf32>
    %cst_48 = arith.constant 3.200000e+01 : f32
    %120 = vector.broadcast %cst_48 : f32 to vector<8x1xf32>
    %121 = arith.divf %119, %120 : vector<8x1xf32>
    %122 = vector.broadcast %114 : vector<8x1xf32> to vector<8x32xf32>
    %123 = arith.subf %110, %122 : vector<8x32xf32>
    %cst_49 = arith.constant 9.99999974E-6 : f32
    %124 = vector.broadcast %cst_49 : f32 to vector<8x1xf32>
    %125 = arith.addf %121, %124 : vector<8x1xf32>
    %126 = math.rsqrt %125 : vector<8x1xf32>
    %127 = vector.broadcast %126 : vector<8x1xf32> to vector<8x32xf32>
    %128 = arith.mulf %123, %127 : vector<8x32xf32>
    %c0_50 = arith.constant 0 : index
    %c0_51 = arith.constant 0 : index
    %129 = vector.load %arg9[%c0_50, %c0_51] : memref<2x32xf32, #tpu.memory_space<vmem>>, vector<1x32xf32>
    %130 = vector.broadcast %129 : vector<1x32xf32> to vector<8x32xf32>
    %131 = arith.mulf %128, %130 : vector<8x32xf32>
    %c1 = arith.constant 1 : index
    %c0_52 = arith.constant 0 : index
    %132 = vector.load %arg9[%c1, %c0_52] : memref<2x32xf32, #tpu.memory_space<vmem>>, vector<1x32xf32>
    %133 = vector.broadcast %132 : vector<1x32xf32> to vector<8x32xf32>
    %134 = arith.addf %131, %133 : vector<8x32xf32>
    %c0_53 = arith.constant 0 : index
    %c0_54 = arith.constant 0 : index
    %c0_55 = arith.constant 0 : index
    %135 = vector.load %arg10[%c0_53, %c0_54, %c0_55] : memref<1x8x32xf32, #tpu.memory_space<vmem>>, vector<1x8x32xf32>
    %136 = vector.shape_cast %135 : vector<1x8x32xf32> to vector<8x32xf32>
    %137 = vector.shape_cast %134 : vector<8x32xf32> to vector<1x8x32xf32>
    tpu.vector_store %arg10[%c0_53, %c0_54, %c0_55], %137 {strides = array<i32>} : memref<1x8x32xf32, #tpu.memory_space<vmem>>, vector<1x8x32xf32>,
    return
  }
  func.func @transform_0(%arg0: i32) -> (i32, i32, i32) {
    %c0_i32 = arith.constant 0 : i32
    %c0_i32_0 = arith.constant 0 : i32
    %c0_i32_1 = arith.constant 0 : i32
    return %arg0, %c0_i32, %c0_i32_0 : i32, i32, i32
  }
  func.func @transform_1(%arg0: i32) -> (i32, i32, i32) {
    %c0_i32 = arith.constant 0 : i32
    %c0_i32_0 = arith.constant 0 : i32
    %c0_i32_1 = arith.constant 0 : i32
    %c0_i32_2 = arith.constant 0 : i32
    return %c0_i32, %c0_i32_0, %c0_i32_1 : i32, i32, i32
  }
  func.func @transform_2(%arg0: i32) -> (i32, i32, i32) {
    %c0_i32 = arith.constant 0 : i32
    %c0_i32_0 = arith.constant 0 : i32
    %c0_i32_1 = arith.constant 0 : i32
    return %arg0, %c0_i32, %c0_i32_0 : i32, i32, i32
  }
  func.func @transform_3(%arg0: i32) -> (i32, i32, i32) {
    %c0_i32 = arith.constant 0 : i32
    %c0_i32_0 = arith.constant 0 : i32
    %c0_i32_1 = arith.constant 0 : i32
    %c0_i32_2 = arith.constant 0 : i32
    return %c0_i32, %c0_i32_0, %c0_i32_1 : i32, i32, i32
  }
  func.func @transform_4(%arg0: i32) -> (i32, i32) {
    %c0_i32 = arith.constant 0 : i32
    %c0_i32_0 = arith.constant 0 : i32
    %c0_i32_1 = arith.constant 0 : i32
    return %c0_i32, %c0_i32_0 : i32, i32
  }
  func.func @transform_5(%arg0: i32) -> (i32, i32) {
    %c0_i32 = arith.constant 0 : i32
    %c0_i32_0 = arith.constant 0 : i32
    %c0_i32_1 = arith.constant 0 : i32
    return %c0_i32, %c0_i32_0 : i32, i32
  }
  func.func @transform_6(%arg0: i32) -> (i32, i32) {
    %c0_i32 = arith.constant 0 : i32
    %c0_i32_0 = arith.constant 0 : i32
    %c0_i32_1 = arith.constant 0 : i32
    return %c0_i32, %c0_i32_0 : i32, i32
  }
  func.func @transform_7(%arg0: i32) -> (i32, i32) {
    %c0_i32 = arith.constant 0 : i32
    %c0_i32_0 = arith.constant 0 : i32
    %c0_i32_1 = arith.constant 0 : i32
    return %c0_i32, %c0_i32_0 : i32, i32
  }
  func.func @transform_8(%arg0: i32) -> (i32, i32) {
    %c0_i32 = arith.constant 0 : i32
    %c0_i32_0 = arith.constant 0 : i32
    %c0_i32_1 = arith.constant 0 : i32
    return %c0_i32, %c0_i32_0 : i32, i32
  }
  func.func @transform_9(%arg0: i32) -> (i32, i32, i32) {
    %c0_i32 = arith.constant 0 : i32
    %c0_i32_0 = arith.constant 0 : i32
    %c0_i32_1 = arith.constant 0 : i32
    return %arg0, %c0_i32, %c0_i32_0 : i32, i32, i32
  }
}

module attributes {stable_mosaic.version = 11 : i64} {
  func.func @_ffn_block_kernel(%arg0: i32, %arg1: memref<8x32xf32, #tpu.memory_space<vmem>>, %arg2: memref<32x64xf32, #tpu.memory_space<vmem>>, %arg3: memref<1x64xf32, #tpu.memory_space<vmem>>, %arg4: memref<64x32xf32, #tpu.memory_space<vmem>>, %arg5: memref<1x32xf32, #tpu.memory_space<vmem>>, %arg6: memref<2x32xf32, #tpu.memory_space<vmem>>, %arg7: memref<8x32xf32, #tpu.memory_space<vmem>>) attributes {dimension_semantics = [#tpu.dimension_semantics<parallel>], iteration_bounds = array<i64: 2>, scalar_prefetch = 0 : i64, scratch_operands = 0 : i64, tpu.core_type = #tpu.core_type<tc>, window_params = [{transform_indices = @transform_0, window_bounds = array<i64: 8, 32>}, {pipeline_mode = #tpu.pipeline_mode<synchronous>, transform_indices = @transform_1, window_bounds = array<i64: 32, 64>}, {pipeline_mode = #tpu.pipeline_mode<synchronous>, transform_indices = @transform_2, window_bounds = array<i64: 1, 64>}, {pipeline_mode = #tpu.pipeline_mode<synchronous>, transform_indices = @transform_3, window_bounds = array<i64: 64, 32>}, {pipeline_mode = #tpu.pipeline_mode<synchronous>, transform_indices = @transform_4, window_bounds = array<i64: 1, 32>}, {pipeline_mode = #tpu.pipeline_mode<synchronous>, transform_indices = @transform_5, window_bounds = array<i64: 2, 32>}, {transform_indices = @transform_6, window_bounds = array<i64: 8, 32>}]} {
    %c0 = arith.constant 0 : index
    %c0_0 = arith.constant 0 : index
    %0 = vector.load %arg1[%c0, %c0_0] : memref<8x32xf32, #tpu.memory_space<vmem>>, vector<8x32xf32>
    %c0_1 = arith.constant 0 : index
    %c0_2 = arith.constant 0 : index
    %1 = vector.load %arg2[%c0_1, %c0_2] : memref<32x64xf32, #tpu.memory_space<vmem>>, vector<32x64xf32>
    %cst = arith.constant dense<0.000000e+00> : vector<8x64xf32>
    %2 = tpu.matmul %0, %1, %cst {dimension_numbers = #tpu.dot_dimension_numbers<[1], [0], [0], [1], [0, 0, 1, 1], [], []>} : vector<8x32xf32>, vector<32x64xf32>, vector<8x64xf32> -> vector<8x64xf32>
    %c0_3 = arith.constant 0 : index
    %c0_4 = arith.constant 0 : index
    %3 = vector.load %arg3[%c0_3, %c0_4] : memref<1x64xf32, #tpu.memory_space<vmem>>, vector<1x64xf32>
    %4 = vector.broadcast %3 : vector<1x64xf32> to vector<8x64xf32>
    %5 = arith.addf %2, %4 : vector<8x64xf32>
    %cst_5 = arith.constant 0.000000e+00 : f32
    %6 = vector.broadcast %cst_5 : f32 to vector<8x64xf32>
    %7 = arith.maximumf %5, %6 : vector<8x64xf32>
    %c0_6 = arith.constant 0 : index
    %c0_7 = arith.constant 0 : index
    %8 = vector.load %arg4[%c0_6, %c0_7] : memref<64x32xf32, #tpu.memory_space<vmem>>, vector<64x32xf32>
    %cst_8 = arith.constant dense<0.000000e+00> : vector<8x32xf32>
    %9 = tpu.matmul %7, %8, %cst_8 {dimension_numbers = #tpu.dot_dimension_numbers<[1], [0], [0], [1], [0, 0, 1, 1], [], []>} : vector<8x64xf32>, vector<64x32xf32>, vector<8x32xf32> -> vector<8x32xf32>
    %10 = arith.addf %0, %9 : vector<8x32xf32>
    %c0_9 = arith.constant 0 : index
    %c0_10 = arith.constant 0 : index
    %11 = vector.load %arg5[%c0_9, %c0_10] : memref<1x32xf32, #tpu.memory_space<vmem>>, vector<1x32xf32>
    %12 = vector.broadcast %11 : vector<1x32xf32> to vector<8x32xf32>
    %13 = arith.addf %10, %12 : vector<8x32xf32>
    %cst_11 = arith.constant dense<0.000000e+00> : vector<8xf32>
    %14 = vector.multi_reduction <add>, %13, %cst_11 [1] : vector<8x32xf32> to vector<8xf32>
    %15 = vector.shape_cast %14 : vector<8xf32> to vector<8x1xf32>
    %cst_12 = arith.constant 3.200000e+01 : f32
    %16 = vector.broadcast %cst_12 : f32 to vector<8x1xf32>
    %17 = arith.divf %15, %16 : vector<8x1xf32>
    %18 = vector.broadcast %17 : vector<8x1xf32> to vector<8x32xf32>
    %19 = arith.subf %13, %18 : vector<8x32xf32>
    %20 = arith.mulf %19, %19 : vector<8x32xf32>
    %cst_13 = arith.constant dense<0.000000e+00> : vector<8xf32>
    %21 = vector.multi_reduction <add>, %20, %cst_13 [1] : vector<8x32xf32> to vector<8xf32>
    %22 = vector.shape_cast %21 : vector<8xf32> to vector<8x1xf32>
    %cst_14 = arith.constant 3.200000e+01 : f32
    %23 = vector.broadcast %cst_14 : f32 to vector<8x1xf32>
    %24 = arith.divf %22, %23 : vector<8x1xf32>
    %25 = vector.broadcast %17 : vector<8x1xf32> to vector<8x32xf32>
    %26 = arith.subf %13, %25 : vector<8x32xf32>
    %cst_15 = arith.constant 9.99999974E-6 : f32
    %27 = vector.broadcast %cst_15 : f32 to vector<8x1xf32>
    %28 = arith.addf %24, %27 : vector<8x1xf32>
    %29 = math.rsqrt %28 : vector<8x1xf32>
    %30 = vector.broadcast %29 : vector<8x1xf32> to vector<8x32xf32>
    %31 = arith.mulf %26, %30 : vector<8x32xf32>
    %c0_16 = arith.constant 0 : index
    %c0_17 = arith.constant 0 : index
    %32 = vector.load %arg6[%c0_16, %c0_17] : memref<2x32xf32, #tpu.memory_space<vmem>>, vector<1x32xf32>
    %33 = vector.broadcast %32 : vector<1x32xf32> to vector<8x32xf32>
    %34 = arith.mulf %31, %33 : vector<8x32xf32>
    %c1 = arith.constant 1 : index
    %c0_18 = arith.constant 0 : index
    %35 = vector.load %arg6[%c1, %c0_18] : memref<2x32xf32, #tpu.memory_space<vmem>>, vector<1x32xf32>
    %36 = vector.broadcast %35 : vector<1x32xf32> to vector<8x32xf32>
    %37 = arith.addf %34, %36 : vector<8x32xf32>
    %c0_19 = arith.constant 0 : index
    %c0_20 = arith.constant 0 : index
    %38 = vector.load %arg7[%c0_19, %c0_20] : memref<8x32xf32, #tpu.memory_space<vmem>>, vector<8x32xf32>
    tpu.vector_store %arg7[%c0_19, %c0_20], %37 {strides = array<i32>} : memref<8x32xf32, #tpu.memory_space<vmem>>, vector<8x32xf32>,
    return
  }
  func.func @transform_0(%arg0: i32) -> (i32, i32) {
    %c0_i32 = arith.constant 0 : i32
    %c0_i32_0 = arith.constant 0 : i32
    return %arg0, %c0_i32 : i32, i32
  }
  func.func @transform_1(%arg0: i32) -> (i32, i32) {
    %c0_i32 = arith.constant 0 : i32
    %c0_i32_0 = arith.constant 0 : i32
    %c0_i32_1 = arith.constant 0 : i32
    return %c0_i32, %c0_i32_0 : i32, i32
  }
  func.func @transform_2(%arg0: i32) -> (i32, i32) {
    %c0_i32 = arith.constant 0 : i32
    %c0_i32_0 = arith.constant 0 : i32
    %c0_i32_1 = arith.constant 0 : i32
    return %c0_i32, %c0_i32_0 : i32, i32
  }
  func.func @transform_3(%arg0: i32) -> (i32, i32) {
    %c0_i32 = arith.constant 0 : i32
    %c0_i32_0 = arith.constant 0 : i32
    %c0_i32_1 = arith.constant 0 : i32
    return %c0_i32, %c0_i32_0 : i32, i32
  }
  func.func @transform_4(%arg0: i32) -> (i32, i32) {
    %c0_i32 = arith.constant 0 : i32
    %c0_i32_0 = arith.constant 0 : i32
    %c0_i32_1 = arith.constant 0 : i32
    return %c0_i32, %c0_i32_0 : i32, i32
  }
  func.func @transform_5(%arg0: i32) -> (i32, i32) {
    %c0_i32 = arith.constant 0 : i32
    %c0_i32_0 = arith.constant 0 : i32
    %c0_i32_1 = arith.constant 0 : i32
    return %c0_i32, %c0_i32_0 : i32, i32
  }
  func.func @transform_6(%arg0: i32) -> (i32, i32) {
    %c0_i32 = arith.constant 0 : i32
    %c0_i32_0 = arith.constant 0 : i32
    return %arg0, %c0_i32 : i32, i32
  }
}

module attributes {stable_mosaic.version = 11 : i64} {
  func.func @_attn_block_kernel(%arg0: i32, %arg1: memref<1x8x32xf32, #tpu.memory_space<vmem>>, %arg2: memref<1x8x32xf32, #tpu.memory_space<vmem>>, %arg3: memref<1x64x32xf32, #tpu.memory_space<vmem>>, %arg4: memref<1x64x32xf32, #tpu.memory_space<vmem>>, %arg5: memref<32x96xf32, #tpu.memory_space<vmem>>, %arg6: memref<1x96xf32, #tpu.memory_space<vmem>>, %arg7: memref<32x32xf32, #tpu.memory_space<vmem>>, %arg8: memref<1x32xf32, #tpu.memory_space<vmem>>, %arg9: memref<2x32xf32, #tpu.memory_space<vmem>>, %arg10: memref<1x8x32xf32, #tpu.memory_space<vmem>>) attributes {dimension_semantics = [#tpu.dimension_semantics<parallel>], iteration_bounds = array<i64: 2>, scalar_prefetch = 0 : i64, scratch_operands = 0 : i64, tpu.core_type = #tpu.core_type<tc>, window_params = [{transform_indices = @transform_0, window_bounds = array<i64: 1, 8, 32>}, {pipeline_mode = #tpu.pipeline_mode<synchronous>, transform_indices = @transform_1, window_bounds = array<i64: 1, 8, 32>}, {transform_indices = @transform_2, window_bounds = array<i64: 1, 64, 32>}, {pipeline_mode = #tpu.pipeline_mode<synchronous>, transform_indices = @transform_3, window_bounds = array<i64: 1, 64, 32>}, {pipeline_mode = #tpu.pipeline_mode<synchronous>, transform_indices = @transform_4, window_bounds = array<i64: 32, 96>}, {pipeline_mode = #tpu.pipeline_mode<synchronous>, transform_indices = @transform_5, window_bounds = array<i64: 1, 96>}, {pipeline_mode = #tpu.pipeline_mode<synchronous>, transform_indices = @transform_6, window_bounds = array<i64: 32, 32>}, {pipeline_mode = #tpu.pipeline_mode<synchronous>, transform_indices = @transform_7, window_bounds = array<i64: 1, 32>}, {pipeline_mode = #tpu.pipeline_mode<synchronous>, transform_indices = @transform_8, window_bounds = array<i64: 2, 32>}, {transform_indices = @transform_9, window_bounds = array<i64: 1, 8, 32>}]} {
    %c0 = arith.constant 0 : index
    %c0_0 = arith.constant 0 : index
    %c0_1 = arith.constant 0 : index
    %0 = vector.load %arg1[%c0, %c0_0, %c0_1] : memref<1x8x32xf32, #tpu.memory_space<vmem>>, vector<1x8x32xf32>
    %1 = vector.shape_cast %0 : vector<1x8x32xf32> to vector<8x32xf32>
    %c0_2 = arith.constant 0 : index
    %c0_3 = arith.constant 0 : index
    %c0_4 = arith.constant 0 : index
    %2 = vector.load %arg3[%c0_2, %c0_3, %c0_4] : memref<1x64x32xf32, #tpu.memory_space<vmem>>, vector<1x64x32xf32>
    %3 = vector.shape_cast %2 : vector<1x64x32xf32> to vector<64x32xf32>
    %c0_5 = arith.constant 0 : index
    %c0_6 = arith.constant 0 : index
    %c0_7 = arith.constant 0 : index
    %4 = vector.load %arg2[%c0_5, %c0_6, %c0_7] : memref<1x8x32xf32, #tpu.memory_space<vmem>>, vector<1x8x32xf32>
    %5 = vector.shape_cast %4 : vector<1x8x32xf32> to vector<8x32xf32>
    %6 = arith.addf %1, %5 : vector<8x32xf32>
    %c0_8 = arith.constant 0 : index
    %c0_9 = arith.constant 0 : index
    %c0_10 = arith.constant 0 : index
    %7 = vector.load %arg4[%c0_8, %c0_9, %c0_10] : memref<1x64x32xf32, #tpu.memory_space<vmem>>, vector<1x64x32xf32>
    %8 = vector.shape_cast %7 : vector<1x64x32xf32> to vector<64x32xf32>
    %9 = arith.addf %3, %8 : vector<64x32xf32>
    %c0_11 = arith.constant 0 : index
    %c0_12 = arith.constant 0 : index
    %10 = vector.load %arg5[%c0_11, %c0_12] : memref<32x96xf32, #tpu.memory_space<vmem>>, vector<32x96xf32>
    %c0_13 = arith.constant 0 : index
    %c0_14 = arith.constant 0 : index
    %11 = vector.load %arg6[%c0_13, %c0_14] : memref<1x96xf32, #tpu.memory_space<vmem>>, vector<1x96xf32>
    %12 = vector.extract_strided_slice %10 {offsets = [0, 0], sizes = [32, 32], strides = [1, 1]} : vector<32x96xf32> to vector<32x32xf32>
    %cst = arith.constant dense<0.000000e+00> : vector<8x32xf32>
    %13 = tpu.matmul %6, %12, %cst {dimension_numbers = #tpu.dot_dimension_numbers<[1], [0], [0], [1], [0, 0, 1, 1], [], []>} : vector<8x32xf32>, vector<32x32xf32>, vector<8x32xf32> -> vector<8x32xf32>
    %14 = vector.extract_strided_slice %11 {offsets = [0, 0], sizes = [1, 32], strides = [1, 1]} : vector<1x96xf32> to vector<1x32xf32>
    %15 = vector.broadcast %14 : vector<1x32xf32> to vector<8x32xf32>
    %16 = arith.addf %13, %15 : vector<8x32xf32>
    %17 = vector.extract_strided_slice %10 {offsets = [0, 32], sizes = [32, 32], strides = [1, 1]} : vector<32x96xf32> to vector<32x32xf32>
    %cst_15 = arith.constant dense<0.000000e+00> : vector<64x32xf32>
    %18 = tpu.matmul %9, %17, %cst_15 {dimension_numbers = #tpu.dot_dimension_numbers<[1], [0], [0], [1], [0, 0, 1, 1], [], []>} : vector<64x32xf32>, vector<32x32xf32>, vector<64x32xf32> -> vector<64x32xf32>
    %19 = vector.extract_strided_slice %11 {offsets = [0, 32], sizes = [1, 32], strides = [1, 1]} : vector<1x96xf32> to vector<1x32xf32>
    %20 = vector.broadcast %19 : vector<1x32xf32> to vector<64x32xf32>
    %21 = arith.addf %18, %20 : vector<64x32xf32>
    %22 = vector.extract_strided_slice %10 {offsets = [0, 64], sizes = [32, 32], strides = [1, 1]} : vector<32x96xf32> to vector<32x32xf32>
    %cst_16 = arith.constant dense<0.000000e+00> : vector<64x32xf32>
    %23 = tpu.matmul %3, %22, %cst_16 {dimension_numbers = #tpu.dot_dimension_numbers<[1], [0], [0], [1], [0, 0, 1, 1], [], []>} : vector<64x32xf32>, vector<32x32xf32>, vector<64x32xf32> -> vector<64x32xf32>
    %24 = vector.extract_strided_slice %11 {offsets = [0, 64], sizes = [1, 32], strides = [1, 1]} : vector<1x96xf32> to vector<1x32xf32>
    %25 = vector.broadcast %24 : vector<1x32xf32> to vector<64x32xf32>
    %26 = arith.addf %23, %25 : vector<64x32xf32>
    %c0_17 = arith.constant 0 : index
    %c0_18 = arith.constant 0 : index
    %27 = vector.load %arg7[%c0_17, %c0_18] : memref<32x32xf32, #tpu.memory_space<vmem>>, vector<32x32xf32>
    %c0_19 = arith.constant 0 : index
    %c0_20 = arith.constant 0 : index
    %28 = vector.load %arg8[%c0_19, %c0_20] : memref<1x32xf32, #tpu.memory_space<vmem>>, vector<1x32xf32>
    %29 = vector.broadcast %28 : vector<1x32xf32> to vector<8x32xf32>
    %30 = arith.addf %1, %29 : vector<8x32xf32>
    %31 = vector.extract_strided_slice %16 {offsets = [0, 0], sizes = [8, 8], strides = [1, 1]} : vector<8x32xf32> to vector<8x8xf32>
    %32 = vector.extract_strided_slice %21 {offsets = [0, 0], sizes = [64, 8], strides = [1, 1]} : vector<64x32xf32> to vector<64x8xf32>
    %33 = vector.extract_strided_slice %26 {offsets = [0, 0], sizes = [64, 8], strides = [1, 1]} : vector<64x32xf32> to vector<64x8xf32>
    %cst_21 = arith.constant dense<0.000000e+00> : vector<8x64xf32>
    %34 = tpu.matmul %31, %32, %cst_21 {dimension_numbers = #tpu.dot_dimension_numbers<[1], [1], [0], [0], [0, 0, 1, 0], [], []>} : vector<8x8xf32>, vector<64x8xf32>, vector<8x64xf32> -> vector<8x64xf32>
    %cst_22 = arith.constant 0.353553385 : f32
    %35 = vector.broadcast %cst_22 : f32 to vector<8x64xf32>
    %36 = arith.mulf %34, %35 : vector<8x64xf32>
    %cst_23 = arith.constant dense<0xFF800000> : vector<8xf32>
    %37 = vector.multi_reduction <maximumf>, %36, %cst_23 [1] : vector<8x64xf32> to vector<8xf32>
    %38 = vector.shape_cast %37 : vector<8xf32> to vector<8x1xf32>
    %39 = vector.broadcast %38 : vector<8x1xf32> to vector<8x64xf32>
    %40 = arith.subf %36, %39 : vector<8x64xf32>
    %41 = math.exp %40 : vector<8x64xf32>
    %cst_24 = arith.constant dense<0.000000e+00> : vector<8xf32>
    %42 = vector.multi_reduction <add>, %41, %cst_24 [1] : vector<8x64xf32> to vector<8xf32>
    %43 = vector.shape_cast %42 : vector<8xf32> to vector<8x1xf32>
    %44 = tpu.reciprocal %43 {approx = true} : vector<8x1xf32> -> vector<8x1xf32>
    %45 = vector.broadcast %44 : vector<8x1xf32> to vector<8x64xf32>
    %46 = arith.mulf %41, %45 : vector<8x64xf32>
    %cst_25 = arith.constant dense<0.000000e+00> : vector<8x8xf32>
    %47 = tpu.matmul %46, %33, %cst_25 {dimension_numbers = #tpu.dot_dimension_numbers<[1], [0], [0], [1], [0, 0, 1, 1], [], []>} : vector<8x64xf32>, vector<64x8xf32>, vector<8x8xf32> -> vector<8x8xf32>
    %48 = vector.extract_strided_slice %27 {offsets = [0, 0], sizes = [8, 32], strides = [1, 1]} : vector<32x32xf32> to vector<8x32xf32>
    %cst_26 = arith.constant dense<0.000000e+00> : vector<8x32xf32>
    %49 = tpu.matmul %47, %48, %cst_26 {dimension_numbers = #tpu.dot_dimension_numbers<[1], [0], [0], [1], [0, 0, 1, 1], [], []>} : vector<8x8xf32>, vector<8x32xf32>, vector<8x32xf32> -> vector<8x32xf32>
    %50 = arith.addf %30, %49 : vector<8x32xf32>
    %51 = vector.extract_strided_slice %16 {offsets = [0, 8], sizes = [8, 8], strides = [1, 1]} : vector<8x32xf32> to vector<8x8xf32>
    %52 = vector.extract_strided_slice %21 {offsets = [0, 8], sizes = [64, 8], strides = [1, 1]} : vector<64x32xf32> to vector<64x8xf32>
    %53 = vector.extract_strided_slice %26 {offsets = [0, 8], sizes = [64, 8], strides = [1, 1]} : vector<64x32xf32> to vector<64x8xf32>
    %cst_27 = arith.constant dense<0.000000e+00> : vector<8x64xf32>
    %54 = tpu.matmul %51, %52, %cst_27 {dimension_numbers = #tpu.dot_dimension_numbers<[1], [1], [0], [0], [0, 0, 1, 0], [], []>} : vector<8x8xf32>, vector<64x8xf32>, vector<8x64xf32> -> vector<8x64xf32>
    %cst_28 = arith.constant 0.353553385 : f32
    %55 = vector.broadcast %cst_28 : f32 to vector<8x64xf32>
    %56 = arith.mulf %54, %55 : vector<8x64xf32>
    %cst_29 = arith.constant dense<0xFF800000> : vector<8xf32>
    %57 = vector.multi_reduction <maximumf>, %56, %cst_29 [1] : vector<8x64xf32> to vector<8xf32>
    %58 = vector.shape_cast %57 : vector<8xf32> to vector<8x1xf32>
    %59 = vector.broadcast %58 : vector<8x1xf32> to vector<8x64xf32>
    %60 = arith.subf %56, %59 : vector<8x64xf32>
    %61 = math.exp %60 : vector<8x64xf32>
    %cst_30 = arith.constant dense<0.000000e+00> : vector<8xf32>
    %62 = vector.multi_reduction <add>, %61, %cst_30 [1] : vector<8x64xf32> to vector<8xf32>
    %63 = vector.shape_cast %62 : vector<8xf32> to vector<8x1xf32>
    %64 = tpu.reciprocal %63 {approx = true} : vector<8x1xf32> -> vector<8x1xf32>
    %65 = vector.broadcast %64 : vector<8x1xf32> to vector<8x64xf32>
    %66 = arith.mulf %61, %65 : vector<8x64xf32>
    %cst_31 = arith.constant dense<0.000000e+00> : vector<8x8xf32>
    %67 = tpu.matmul %66, %53, %cst_31 {dimension_numbers = #tpu.dot_dimension_numbers<[1], [0], [0], [1], [0, 0, 1, 1], [], []>} : vector<8x64xf32>, vector<64x8xf32>, vector<8x8xf32> -> vector<8x8xf32>
    %68 = vector.extract_strided_slice %27 {offsets = [8, 0], sizes = [8, 32], strides = [1, 1]} : vector<32x32xf32> to vector<8x32xf32>
    %cst_32 = arith.constant dense<0.000000e+00> : vector<8x32xf32>
    %69 = tpu.matmul %67, %68, %cst_32 {dimension_numbers = #tpu.dot_dimension_numbers<[1], [0], [0], [1], [0, 0, 1, 1], [], []>} : vector<8x8xf32>, vector<8x32xf32>, vector<8x32xf32> -> vector<8x32xf32>
    %70 = arith.addf %50, %69 : vector<8x32xf32>
    %71 = vector.extract_strided_slice %16 {offsets = [0, 16], sizes = [8, 8], strides = [1, 1]} : vector<8x32xf32> to vector<8x8xf32>
    %72 = vector.extract_strided_slice %21 {offsets = [0, 16], sizes = [64, 8], strides = [1, 1]} : vector<64x32xf32> to vector<64x8xf32>
    %73 = vector.extract_strided_slice %26 {offsets = [0, 16], sizes = [64, 8], strides = [1, 1]} : vector<64x32xf32> to vector<64x8xf32>
    %cst_33 = arith.constant dense<0.000000e+00> : vector<8x64xf32>
    %74 = tpu.matmul %71, %72, %cst_33 {dimension_numbers = #tpu.dot_dimension_numbers<[1], [1], [0], [0], [0, 0, 1, 0], [], []>} : vector<8x8xf32>, vector<64x8xf32>, vector<8x64xf32> -> vector<8x64xf32>
    %cst_34 = arith.constant 0.353553385 : f32
    %75 = vector.broadcast %cst_34 : f32 to vector<8x64xf32>
    %76 = arith.mulf %74, %75 : vector<8x64xf32>
    %cst_35 = arith.constant dense<0xFF800000> : vector<8xf32>
    %77 = vector.multi_reduction <maximumf>, %76, %cst_35 [1] : vector<8x64xf32> to vector<8xf32>
    %78 = vector.shape_cast %77 : vector<8xf32> to vector<8x1xf32>
    %79 = vector.broadcast %78 : vector<8x1xf32> to vector<8x64xf32>
    %80 = arith.subf %76, %79 : vector<8x64xf32>
    %81 = math.exp %80 : vector<8x64xf32>
    %cst_36 = arith.constant dense<0.000000e+00> : vector<8xf32>
    %82 = vector.multi_reduction <add>, %81, %cst_36 [1] : vector<8x64xf32> to vector<8xf32>
    %83 = vector.shape_cast %82 : vector<8xf32> to vector<8x1xf32>
    %84 = tpu.reciprocal %83 {approx = true} : vector<8x1xf32> -> vector<8x1xf32>
    %85 = vector.broadcast %84 : vector<8x1xf32> to vector<8x64xf32>
    %86 = arith.mulf %81, %85 : vector<8x64xf32>
    %cst_37 = arith.constant dense<0.000000e+00> : vector<8x8xf32>
    %87 = tpu.matmul %86, %73, %cst_37 {dimension_numbers = #tpu.dot_dimension_numbers<[1], [0], [0], [1], [0, 0, 1, 1], [], []>} : vector<8x64xf32>, vector<64x8xf32>, vector<8x8xf32> -> vector<8x8xf32>
    %88 = vector.extract_strided_slice %27 {offsets = [16, 0], sizes = [8, 32], strides = [1, 1]} : vector<32x32xf32> to vector<8x32xf32>
    %cst_38 = arith.constant dense<0.000000e+00> : vector<8x32xf32>
    %89 = tpu.matmul %87, %88, %cst_38 {dimension_numbers = #tpu.dot_dimension_numbers<[1], [0], [0], [1], [0, 0, 1, 1], [], []>} : vector<8x8xf32>, vector<8x32xf32>, vector<8x32xf32> -> vector<8x32xf32>
    %90 = arith.addf %70, %89 : vector<8x32xf32>
    %91 = vector.extract_strided_slice %16 {offsets = [0, 24], sizes = [8, 8], strides = [1, 1]} : vector<8x32xf32> to vector<8x8xf32>
    %92 = vector.extract_strided_slice %21 {offsets = [0, 24], sizes = [64, 8], strides = [1, 1]} : vector<64x32xf32> to vector<64x8xf32>
    %93 = vector.extract_strided_slice %26 {offsets = [0, 24], sizes = [64, 8], strides = [1, 1]} : vector<64x32xf32> to vector<64x8xf32>
    %cst_39 = arith.constant dense<0.000000e+00> : vector<8x64xf32>
    %94 = tpu.matmul %91, %92, %cst_39 {dimension_numbers = #tpu.dot_dimension_numbers<[1], [1], [0], [0], [0, 0, 1, 0], [], []>} : vector<8x8xf32>, vector<64x8xf32>, vector<8x64xf32> -> vector<8x64xf32>
    %cst_40 = arith.constant 0.353553385 : f32
    %95 = vector.broadcast %cst_40 : f32 to vector<8x64xf32>
    %96 = arith.mulf %94, %95 : vector<8x64xf32>
    %cst_41 = arith.constant dense<0xFF800000> : vector<8xf32>
    %97 = vector.multi_reduction <maximumf>, %96, %cst_41 [1] : vector<8x64xf32> to vector<8xf32>
    %98 = vector.shape_cast %97 : vector<8xf32> to vector<8x1xf32>
    %99 = vector.broadcast %98 : vector<8x1xf32> to vector<8x64xf32>
    %100 = arith.subf %96, %99 : vector<8x64xf32>
    %101 = math.exp %100 : vector<8x64xf32>
    %cst_42 = arith.constant dense<0.000000e+00> : vector<8xf32>
    %102 = vector.multi_reduction <add>, %101, %cst_42 [1] : vector<8x64xf32> to vector<8xf32>
    %103 = vector.shape_cast %102 : vector<8xf32> to vector<8x1xf32>
    %104 = tpu.reciprocal %103 {approx = true} : vector<8x1xf32> -> vector<8x1xf32>
    %105 = vector.broadcast %104 : vector<8x1xf32> to vector<8x64xf32>
    %106 = arith.mulf %101, %105 : vector<8x64xf32>
    %cst_43 = arith.constant dense<0.000000e+00> : vector<8x8xf32>
    %107 = tpu.matmul %106, %93, %cst_43 {dimension_numbers = #tpu.dot_dimension_numbers<[1], [0], [0], [1], [0, 0, 1, 1], [], []>} : vector<8x64xf32>, vector<64x8xf32>, vector<8x8xf32> -> vector<8x8xf32>
    %108 = vector.extract_strided_slice %27 {offsets = [24, 0], sizes = [8, 32], strides = [1, 1]} : vector<32x32xf32> to vector<8x32xf32>
    %cst_44 = arith.constant dense<0.000000e+00> : vector<8x32xf32>
    %109 = tpu.matmul %107, %108, %cst_44 {dimension_numbers = #tpu.dot_dimension_numbers<[1], [0], [0], [1], [0, 0, 1, 1], [], []>} : vector<8x8xf32>, vector<8x32xf32>, vector<8x32xf32> -> vector<8x32xf32>
    %110 = arith.addf %90, %109 : vector<8x32xf32>
    %cst_45 = arith.constant dense<0.000000e+00> : vector<8xf32>
    %111 = vector.multi_reduction <add>, %110, %cst_45 [1] : vector<8x32xf32> to vector<8xf32>
    %112 = vector.shape_cast %111 : vector<8xf32> to vector<8x1xf32>
    %cst_46 = arith.constant 3.200000e+01 : f32
    %113 = vector.broadcast %cst_46 : f32 to vector<8x1xf32>
    %114 = arith.divf %112, %113 : vector<8x1xf32>
    %115 = vector.broadcast %114 : vector<8x1xf32> to vector<8x32xf32>
    %116 = arith.subf %110, %115 : vector<8x32xf32>
    %117 = arith.mulf %116, %116 : vector<8x32xf32>
    %cst_47 = arith.constant dense<0.000000e+00> : vector<8xf32>
    %118 = vector.multi_reduction <add>, %117, %cst_47 [1] : vector<8x32xf32> to vector<8xf32>
    %119 = vector.shape_cast %118 : vector<8xf32> to vector<8x1xf32>
    %cst_48 = arith.constant 3.200000e+01 : f32
    %120 = vector.broadcast %cst_48 : f32 to vector<8x1xf32>
    %121 = arith.divf %119, %120 : vector<8x1xf32>
    %122 = vector.broadcast %114 : vector<8x1xf32> to vector<8x32xf32>
    %123 = arith.subf %110, %122 : vector<8x32xf32>
    %cst_49 = arith.constant 9.99999974E-6 : f32
    %124 = vector.broadcast %cst_49 : f32 to vector<8x1xf32>
    %125 = arith.addf %121, %124 : vector<8x1xf32>
    %126 = math.rsqrt %125 : vector<8x1xf32>
    %127 = vector.broadcast %126 : vector<8x1xf32> to vector<8x32xf32>
    %128 = arith.mulf %123, %127 : vector<8x32xf32>
    %c0_50 = arith.constant 0 : index
    %c0_51 = arith.constant 0 : index
    %129 = vector.load %arg9[%c0_50, %c0_51] : memref<2x32xf32, #tpu.memory_space<vmem>>, vector<1x32xf32>
    %130 = vector.broadcast %129 : vector<1x32xf32> to vector<8x32xf32>
    %131 = arith.mulf %128, %130 : vector<8x32xf32>
    %c1 = arith.constant 1 : index
    %c0_52 = arith.constant 0 : index
    %132 = vector.load %arg9[%c1, %c0_52] : memref<2x32xf32, #tpu.memory_space<vmem>>, vector<1x32xf32>
    %133 = vector.broadcast %132 : vector<1x32xf32> to vector<8x32xf32>
    %134 = arith.addf %131, %133 : vector<8x32xf32>
    %c0_53 = arith.constant 0 : index
    %c0_54 = arith.constant 0 : index
    %c0_55 = arith.constant 0 : index
    %135 = vector.load %arg10[%c0_53, %c0_54, %c0_55] : memref<1x8x32xf32, #tpu.memory_space<vmem>>, vector<1x8x32xf32>
    %136 = vector.shape_cast %135 : vector<1x8x32xf32> to vector<8x32xf32>
    %137 = vector.shape_cast %134 : vector<8x32xf32> to vector<1x8x32xf32>
    tpu.vector_store %arg10[%c0_53, %c0_54, %c0_55], %137 {strides = array<i32>} : memref<1x8x32xf32, #tpu.memory_space<vmem>>, vector<1x8x32xf32>,
    return
  }
  func.func @transform_0(%arg0: i32) -> (i32, i32, i32) {
    %c0_i32 = arith.constant 0 : i32
    %c0_i32_0 = arith.constant 0 : i32
    %c0_i32_1 = arith.constant 0 : i32
    return %arg0, %c0_i32, %c0_i32_0 : i32, i32, i32
  }
  func.func @transform_1(%arg0: i32) -> (i32, i32, i32) {
    %c0_i32 = arith.constant 0 : i32
    %c0_i32_0 = arith.constant 0 : i32
    %c0_i32_1 = arith.constant 0 : i32
    %c0_i32_2 = arith.constant 0 : i32
    return %c0_i32, %c0_i32_0, %c0_i32_1 : i32, i32, i32
  }
  func.func @transform_2(%arg0: i32) -> (i32, i32, i32) {
    %c0_i32 = arith.constant 0 : i32
    %c0_i32_0 = arith.constant 0 : i32
    %c0_i32_1 = arith.constant 0 : i32
    return %arg0, %c0_i32, %c0_i32_0 : i32, i32, i32
  }
  func.func @transform_3(%arg0: i32) -> (i32, i32, i32) {
    %c0_i32 = arith.constant 0 : i32
    %c0_i32_0 = arith.constant 0 : i32
    %c0_i32_1 = arith.constant 0 : i32
    %c0_i32_2 = arith.constant 0 : i32
    return %c0_i32, %c0_i32_0, %c0_i32_1 : i32, i32, i32
  }
  func.func @transform_4(%arg0: i32) -> (i32, i32) {
    %c0_i32 = arith.constant 0 : i32
    %c0_i32_0 = arith.constant 0 : i32
    %c0_i32_1 = arith.constant 0 : i32
    return %c0_i32, %c0_i32_0 : i32, i32
  }
  func.func @transform_5(%arg0: i32) -> (i32, i32) {
    %c0_i32 = arith.constant 0 : i32
    %c0_i32_0 = arith.constant 0 : i32
    %c0_i32_1 = arith.constant 0 : i32
    return %c0_i32, %c0_i32_0 : i32, i32
  }
  func.func @transform_6(%arg0: i32) -> (i32, i32) {
    %c0_i32 = arith.constant 0 : i32
    %c0_i32_0 = arith.constant 0 : i32
    %c0_i32_1 = arith.constant 0 : i32
    return %c0_i32, %c0_i32_0 : i32, i32
  }
  func.func @transform_7(%arg0: i32) -> (i32, i32) {
    %c0_i32 = arith.constant 0 : i32
    %c0_i32_0 = arith.constant 0 : i32
    %c0_i32_1 = arith.constant 0 : i32
    return %c0_i32, %c0_i32_0 : i32, i32
  }
  func.func @transform_8(%arg0: i32) -> (i32, i32) {
    %c0_i32 = arith.constant 0 : i32
    %c0_i32_0 = arith.constant 0 : i32
    %c0_i32_1 = arith.constant 0 : i32
    return %c0_i32, %c0_i32_0 : i32, i32
  }
  func.func @transform_9(%arg0: i32) -> (i32, i32, i32) {
    %c0_i32 = arith.constant 0 : i32
    %c0_i32_0 = arith.constant 0 : i32
    %c0_i32_1 = arith.constant 0 : i32
    return %arg0, %c0_i32, %c0_i32_0 : i32, i32, i32
  }
}

module attributes {stable_mosaic.version = 11 : i64} {
  func.func @_head_kernel(%arg0: i32, %arg1: memref<8x32xf32, #tpu.memory_space<vmem>>, %arg2: memref<2x32xf32, #tpu.memory_space<vmem>>, %arg3: memref<32x128xf32, #tpu.memory_space<vmem>>, %arg4: memref<1x128xf32, #tpu.memory_space<vmem>>, %arg5: memref<32x32xf32, #tpu.memory_space<vmem>>, %arg6: memref<1x32xf32, #tpu.memory_space<vmem>>, %arg7: memref<32x32xf32, #tpu.memory_space<vmem>>, %arg8: memref<1x32xf32, #tpu.memory_space<vmem>>, %arg9: memref<32x128xf32, #tpu.memory_space<vmem>>, %arg10: memref<1x128xf32, #tpu.memory_space<vmem>>, %arg11: memref<8x256xf32, #tpu.memory_space<vmem>>) attributes {dimension_semantics = [#tpu.dimension_semantics<parallel>], iteration_bounds = array<i64: 2>, scalar_prefetch = 0 : i64, scratch_operands = 0 : i64, tpu.core_type = #tpu.core_type<tc>, window_params = [{transform_indices = @transform_0, window_bounds = array<i64: 8, 32>}, {pipeline_mode = #tpu.pipeline_mode<synchronous>, transform_indices = @transform_1, window_bounds = array<i64: 2, 32>}, {pipeline_mode = #tpu.pipeline_mode<synchronous>, transform_indices = @transform_2, window_bounds = array<i64: 32, 128>}, {pipeline_mode = #tpu.pipeline_mode<synchronous>, transform_indices = @transform_3, window_bounds = array<i64: 1, 128>}, {pipeline_mode = #tpu.pipeline_mode<synchronous>, transform_indices = @transform_4, window_bounds = array<i64: 32, 32>}, {pipeline_mode = #tpu.pipeline_mode<synchronous>, transform_indices = @transform_5, window_bounds = array<i64: 1, 32>}, {pipeline_mode = #tpu.pipeline_mode<synchronous>, transform_indices = @transform_6, window_bounds = array<i64: 32, 32>}, {pipeline_mode = #tpu.pipeline_mode<synchronous>, transform_indices = @transform_7, window_bounds = array<i64: 1, 32>}, {pipeline_mode = #tpu.pipeline_mode<synchronous>, transform_indices = @transform_8, window_bounds = array<i64: 32, 128>}, {pipeline_mode = #tpu.pipeline_mode<synchronous>, transform_indices = @transform_9, window_bounds = array<i64: 1, 128>}, {transform_indices = @transform_10, window_bounds = array<i64: 8, 256>}]} {
    %c0 = arith.constant 0 : index
    %c0_0 = arith.constant 0 : index
    %0 = vector.load %arg1[%c0, %c0_0] : memref<8x32xf32, #tpu.memory_space<vmem>>, vector<8x32xf32>
    %cst = arith.constant dense<0.000000e+00> : vector<8xf32>
    %1 = vector.multi_reduction <add>, %0, %cst [1] : vector<8x32xf32> to vector<8xf32>
    %2 = vector.shape_cast %1 : vector<8xf32> to vector<8x1xf32>
    %cst_1 = arith.constant 3.200000e+01 : f32
    %3 = vector.broadcast %cst_1 : f32 to vector<8x1xf32>
    %4 = arith.divf %2, %3 : vector<8x1xf32>
    %5 = vector.broadcast %4 : vector<8x1xf32> to vector<8x32xf32>
    %6 = arith.subf %0, %5 : vector<8x32xf32>
    %7 = arith.mulf %6, %6 : vector<8x32xf32>
    %cst_2 = arith.constant dense<0.000000e+00> : vector<8xf32>
    %8 = vector.multi_reduction <add>, %7, %cst_2 [1] : vector<8x32xf32> to vector<8xf32>
    %9 = vector.shape_cast %8 : vector<8xf32> to vector<8x1xf32>
    %cst_3 = arith.constant 3.200000e+01 : f32
    %10 = vector.broadcast %cst_3 : f32 to vector<8x1xf32>
    %11 = arith.divf %9, %10 : vector<8x1xf32>
    %12 = vector.broadcast %4 : vector<8x1xf32> to vector<8x32xf32>
    %13 = arith.subf %0, %12 : vector<8x32xf32>
    %cst_4 = arith.constant 9.99999974E-6 : f32
    %14 = vector.broadcast %cst_4 : f32 to vector<8x1xf32>
    %15 = arith.addf %11, %14 : vector<8x1xf32>
    %16 = math.rsqrt %15 : vector<8x1xf32>
    %17 = vector.broadcast %16 : vector<8x1xf32> to vector<8x32xf32>
    %18 = arith.mulf %13, %17 : vector<8x32xf32>
    %c0_5 = arith.constant 0 : index
    %c0_6 = arith.constant 0 : index
    %19 = vector.load %arg2[%c0_5, %c0_6] : memref<2x32xf32, #tpu.memory_space<vmem>>, vector<1x32xf32>
    %20 = vector.broadcast %19 : vector<1x32xf32> to vector<8x32xf32>
    %21 = arith.mulf %18, %20 : vector<8x32xf32>
    %c1 = arith.constant 1 : index
    %c0_7 = arith.constant 0 : index
    %22 = vector.load %arg2[%c1, %c0_7] : memref<2x32xf32, #tpu.memory_space<vmem>>, vector<1x32xf32>
    %23 = vector.broadcast %22 : vector<1x32xf32> to vector<8x32xf32>
    %24 = arith.addf %21, %23 : vector<8x32xf32>
    %c0_8 = arith.constant 0 : index
    %c0_9 = arith.constant 0 : index
    %25 = vector.load %arg3[%c0_8, %c0_9] : memref<32x128xf32, #tpu.memory_space<vmem>>, vector<32x128xf32>
    %cst_10 = arith.constant dense<0.000000e+00> : vector<8x128xf32>
    %26 = tpu.matmul %24, %25, %cst_10 {dimension_numbers = #tpu.dot_dimension_numbers<[1], [0], [0], [1], [0, 0, 1, 1], [], []>} : vector<8x32xf32>, vector<32x128xf32>, vector<8x128xf32> -> vector<8x128xf32>
    %c0_11 = arith.constant 0 : index
    %c0_12 = arith.constant 0 : index
    %27 = vector.load %arg4[%c0_11, %c0_12] : memref<1x128xf32, #tpu.memory_space<vmem>>, vector<1x128xf32>
    %28 = vector.broadcast %27 : vector<1x128xf32> to vector<8x128xf32>
    %29 = arith.addf %26, %28 : vector<8x128xf32>
    %c0_13 = arith.constant 0 : index
    %c0_14 = arith.constant 0 : index
    %30 = vector.load %arg5[%c0_13, %c0_14] : memref<32x32xf32, #tpu.memory_space<vmem>>, vector<32x32xf32>
    %cst_15 = arith.constant dense<0.000000e+00> : vector<8x32xf32>
    %31 = tpu.matmul %24, %30, %cst_15 {dimension_numbers = #tpu.dot_dimension_numbers<[1], [0], [0], [1], [0, 0, 1, 1], [], []>} : vector<8x32xf32>, vector<32x32xf32>, vector<8x32xf32> -> vector<8x32xf32>
    %c0_16 = arith.constant 0 : index
    %c0_17 = arith.constant 0 : index
    %32 = vector.load %arg6[%c0_16, %c0_17] : memref<1x32xf32, #tpu.memory_space<vmem>>, vector<1x32xf32>
    %33 = vector.broadcast %32 : vector<1x32xf32> to vector<8x32xf32>
    %34 = arith.addf %31, %33 : vector<8x32xf32>
    %cst_18 = arith.constant 0.000000e+00 : f32
    %35 = vector.broadcast %cst_18 : f32 to vector<8x32xf32>
    %36 = arith.maximumf %34, %35 : vector<8x32xf32>
    %c0_19 = arith.constant 0 : index
    %c0_20 = arith.constant 0 : index
    %37 = vector.load %arg7[%c0_19, %c0_20] : memref<32x32xf32, #tpu.memory_space<vmem>>, vector<32x32xf32>
    %cst_21 = arith.constant dense<0.000000e+00> : vector<8x32xf32>
    %38 = tpu.matmul %36, %37, %cst_21 {dimension_numbers = #tpu.dot_dimension_numbers<[1], [0], [0], [1], [0, 0, 1, 1], [], []>} : vector<8x32xf32>, vector<32x32xf32>, vector<8x32xf32> -> vector<8x32xf32>
    %c0_22 = arith.constant 0 : index
    %c0_23 = arith.constant 0 : index
    %39 = vector.load %arg8[%c0_22, %c0_23] : memref<1x32xf32, #tpu.memory_space<vmem>>, vector<1x32xf32>
    %40 = vector.broadcast %39 : vector<1x32xf32> to vector<8x32xf32>
    %41 = arith.addf %38, %40 : vector<8x32xf32>
    %cst_24 = arith.constant 0.000000e+00 : f32
    %42 = vector.broadcast %cst_24 : f32 to vector<8x32xf32>
    %43 = arith.maximumf %41, %42 : vector<8x32xf32>
    %c0_25 = arith.constant 0 : index
    %c0_26 = arith.constant 0 : index
    %44 = vector.load %arg9[%c0_25, %c0_26] : memref<32x128xf32, #tpu.memory_space<vmem>>, vector<32x128xf32>
    %cst_27 = arith.constant dense<0.000000e+00> : vector<8x128xf32>
    %45 = tpu.matmul %43, %44, %cst_27 {dimension_numbers = #tpu.dot_dimension_numbers<[1], [0], [0], [1], [0, 0, 1, 1], [], []>} : vector<8x32xf32>, vector<32x128xf32>, vector<8x128xf32> -> vector<8x128xf32>
    %c0_28 = arith.constant 0 : index
    %c0_29 = arith.constant 0 : index
    %46 = vector.load %arg10[%c0_28, %c0_29] : memref<1x128xf32, #tpu.memory_space<vmem>>, vector<1x128xf32>
    %47 = vector.broadcast %46 : vector<1x128xf32> to vector<8x128xf32>
    %48 = arith.addf %45, %47 : vector<8x128xf32>
    %49 = arith.negf %48 : vector<8x128xf32>
    %50 = math.exp %49 : vector<8x128xf32>
    %cst_30 = arith.constant 1.000000e+00 : f32
    %51 = vector.broadcast %cst_30 : f32 to vector<8x128xf32>
    %52 = arith.addf %51, %50 : vector<8x128xf32>
    %53 = arith.divf %51, %52 : vector<8x128xf32>
    %54 = tpu.concatenate %29, %53 in 1 : vector<8x128xf32>, vector<8x128xf32> -> vector<8x256xf32>
    %c0_31 = arith.constant 0 : index
    %c0_32 = arith.constant 0 : index
    %55 = vector.load %arg11[%c0_31, %c0_32] : memref<8x256xf32, #tpu.memory_space<vmem>>, vector<8x256xf32>
    tpu.vector_store %arg11[%c0_31, %c0_32], %54 {strides = array<i32>} : memref<8x256xf32, #tpu.memory_space<vmem>>, vector<8x256xf32>,
    return
  }
  func.func @transform_0(%arg0: i32) -> (i32, i32) {
    %c0_i32 = arith.constant 0 : i32
    %c0_i32_0 = arith.constant 0 : i32
    return %arg0, %c0_i32 : i32, i32
  }
  func.func @transform_1(%arg0: i32) -> (i32, i32) {
    %c0_i32 = arith.constant 0 : i32
    %c0_i32_0 = arith.constant 0 : i32
    %c0_i32_1 = arith.constant 0 : i32
    return %c0_i32, %c0_i32_0 : i32, i32
  }
  func.func @transform_2(%arg0: i32) -> (i32, i32) {
    %c0_i32 = arith.constant 0 : i32
    %c0_i32_0 = arith.constant 0 : i32
    %c0_i32_1 = arith.constant 0 : i32
    return %c0_i32, %c0_i32_0 : i32, i32
  }
  func.func @transform_3(%arg0: i32) -> (i32, i32) {
    %c0_i32 = arith.constant 0 : i32
    %c0_i32_0 = arith.constant 0 : i32
    %c0_i32_1 = arith.constant 0 : i32
    return %c0_i32, %c0_i32_0 : i32, i32
  }
  func.func @transform_4(%arg0: i32) -> (i32, i32) {
    %c0_i32 = arith.constant 0 : i32
    %c0_i32_0 = arith.constant 0 : i32
    %c0_i32_1 = arith.constant 0 : i32
    return %c0_i32, %c0_i32_0 : i32, i32
  }
  func.func @transform_5(%arg0: i32) -> (i32, i32) {
    %c0_i32 = arith.constant 0 : i32
    %c0_i32_0 = arith.constant 0 : i32
    %c0_i32_1 = arith.constant 0 : i32
    return %c0_i32, %c0_i32_0 : i32, i32
  }
  func.func @transform_6(%arg0: i32) -> (i32, i32) {
    %c0_i32 = arith.constant 0 : i32
    %c0_i32_0 = arith.constant 0 : i32
    %c0_i32_1 = arith.constant 0 : i32
    return %c0_i32, %c0_i32_0 : i32, i32
  }
  func.func @transform_7(%arg0: i32) -> (i32, i32) {
    %c0_i32 = arith.constant 0 : i32
    %c0_i32_0 = arith.constant 0 : i32
    %c0_i32_1 = arith.constant 0 : i32
    return %c0_i32, %c0_i32_0 : i32, i32
  }
  func.func @transform_8(%arg0: i32) -> (i32, i32) {
    %c0_i32 = arith.constant 0 : i32
    %c0_i32_0 = arith.constant 0 : i32
    %c0_i32_1 = arith.constant 0 : i32
    return %c0_i32, %c0_i32_0 : i32, i32
  }
  func.func @transform_9(%arg0: i32) -> (i32, i32) {
    %c0_i32 = arith.constant 0 : i32
    %c0_i32_0 = arith.constant 0 : i32
    %c0_i32_1 = arith.constant 0 : i32
    return %c0_i32, %c0_i32_0 : i32, i32
  }
  func.func @transform_10(%arg0: i32) -> (i32, i32) {
    %c0_i32 = arith.constant 0 : i32
    %c0_i32_0 = arith.constant 0 : i32
    return %arg0, %c0_i32 : i32, i32
  }
}

</mosaic_0001>

<bundles_post_ra>
// kernel: detr_forward.12
= control target key start
LH: loop header
LB: loop body
LE: loop exit
PB: predicated region body
PF: predicated region fallthrough
CT: control target
= control target key end

     0   :  { %s974_s21 = smov 0   ;;  %s1168_s0 = inlined_call_operand.vmem [shape: f32[128,32], index: 0, kind: input, shape index: {}]   ;;  %s1169_s1 = inlined_call_operand.vmem [shape: f32[32,64], index: 1, kind: input, shape index: {}]   ;;  %s1170_s2 = inlined_call_operand.vmem [shape: f32[1,64], index: 2, kind: input, shape index: {}]   ;;  %s1171_s3 = inlined_call_operand.vmem [shape: f32[64,32], index: 3, kind: input, shape index: {}]   ;;  %s1172_s4 = inlined_call_operand.vmem [shape: f32[1,32], index: 4, kind: input, shape index: {}]   ;;  %s1173_s5 = inlined_call_operand.vmem [shape: f32[2,32], index: 5, kind: input, shape index: {}]   ;;  %s1174_s6 = inlined_call_operand.vmem [shape: f32[128,32], index: 6, kind: output, shape index: {}]  }
   0x1 LB: > { %s768_s22 = sadd.s32 4294967295, %s937_s21   ;;  %p772_p0 = scmp.ge.s32.totalorder %s937_s21, 1  ;;  %s937_s21 = sphi %s974_s21, %s16_s21  }
   0x2   : > { %p213_p1 = scmp.lt.s32.totalorder %s937_s21, 3 }
   0x4   : > { %p214_p2 = pnand %p772_p0, %p213_p1 }
   0x5   : > { %v263_v0 = vld [vmem:[%s1169_s1] sm:$0xff] (!%p214_p2)  ;;  %v264_v1 = vld [vmem:[%s1169_s1 + $0x8] sm:$0xff] (!%p214_p2)  ;;  %v265_v2 = vld [vmem:[%s1169_s1 + $0x10] sm:$0xff] (!%p214_p2)  ;;  %s773_s29 = sshll.u32 (!%p214_p2), %s768_s22, 3  ;;  %vm274_vm0 = vcmask (!%p214_p2), 261120   ;;  %vm420_vm1 = vcmask (!%p214_p2), 523264  }
   0x6   : > { %217 = sbr.rel (%p214_p2) target bundleno = 783 (0x30f), region = 44  ;;  %v875_v3 = vpack.c.bf16 (!%p214_p2), %v264_v1, %v263_v0  ;;  %v266_v4 = vld [vmem:[%s1169_s1 + $0x18] sm:$0xff] (!%p214_p2)  ;;  %p244_p3 = scmp.lt.s32.totalorder (!%p214_p2), %s773_s29, 15  ;;  %v412_v5 = vld [vmem:[%s1171_s3] sm:$0xff] (!%p214_p2)  ;;  %v413_v6 = vld [vmem:[%s1171_s3 + $0x8] sm:$0xff] (!%p214_p2) }
   0x7   : > { %v879_v7 = vpack.c.bf16 (!%p214_p2), %v266_v4, %v265_v2  ;;  %v883_v8 = vpack.c.bf16 (!%p214_p2), %v413_v6, %v412_v5  ;;  %v414_v9 = vld [vmem:[%s1171_s3 + $0x10] sm:$0xff] (!%p214_p2)  ;;  %v415_v10 = vld [vmem:[%s1171_s3 + $0x18] sm:$0xff] (!%p214_p2)  ;;  %v416_v12 = vld [vmem:[%s1171_s3 + $0x20] sm:$0xff] (!%p214_p2) }
   0x8   : > { %876 = vmatprep.subr.bf16.mxu0 (!%p214_p2), %v875_v3  ;;  %v887_v11 = vpack.c.bf16 (!%p214_p2), %v415_v10, %v414_v9  ;;  %v417_v13 = vld [vmem:[%s1171_s3 + $0x28] sm:$0xff] (!%p214_p2)  ;;  %v418_v23 = vld [vmem:[%s1171_s3 + $0x30] sm:$0xff] (!%p214_p2)  ;;  %v419_v24 = vld [vmem:[%s1171_s3 + $0x38] sm:$0xff] (!%p214_p2) }
   0x9   : > { %878 = vmatpush3.bf16.msra.mxu0 (!%p214_p2), %v875_v3  ;;  %899 = vmatprep.subr.bf16.mxu1 (!%p214_p2), %v883_v8  ;;  %v891_v16 = vpack.c.bf16 (!%p214_p2), %v417_v13, %v416_v12  ;;  %v895_v25 = vpack.c.bf16 (!%p214_p2), %v419_v24, %v418_v23  ;;  %v777_v26 = vld [vmem:[%s1170_s2] ss:$0 sm:$0xff] (!%p214_p2) }
   0xa   : > { %880 = vmatprep.subr.bf16.mxu0 (!%p214_p2), %v879_v7  ;;  %903 = vmatpush3.bf16.msra.mxu1 (!%p214_p2), %v883_v8  ;;  %v794_v52 = vld [vmem:[%s1172_s4] ss:$0 sm:$0xff] (!%p214_p2) }
   0xb   : > { %900 = vmatprep.subr.bf16.mxu1 (!%p214_p2), %v887_v11 }
   0xd   : > { %s1176_s29 = smov (!%p244_p3, %s773_s29), 15  ;;  %882 = vmatpush3.bf16.msra.mxu0 %v879_v7 }
   0xe   : > { %s774_s16 = sshll.u32 %s1176_s29, 3  ;;  %884 = vmatprep.subr.bf16.mxu0 %v883_v8  ;;  %904 = vmatpush3.bf16.msra.mxu1 %v887_v11 }
   0xf   : > { %s247_s24 = scalar_lea.vmem %s1168_s0, %s774_s16  ;;  %901 = vmatprep.subr.bf16.mxu1 %v891_v16  ;;  %s1140_s17 = scalar_lea.vmem %s1174_s6, %s774_s16 }
  0x10   : > { %v1020_v14 = vld [vmem:[%s247_s24] sm:$0xff]  ;;  %v1024_v15 = vld [vmem:[%s247_s24 + $0x8] sm:$0xff]  ;;  %v1026_v17 = vld [vmem:[%s247_s24 + $0x10] sm:$0xff] }
  0x11   : > { %835 = vmatprep.mubr.msk.f32.mxu0 %vm274_vm0, %v1020_v14  ;;  %v1032_v18 = vld [vmem:[%s247_s24 + $0x18] sm:$0xff]  ;;  %v1034_v19 = vld [vmem:[%s247_s24 + $0x20] sm:$0xff]  ;;  %v1040_v20 = vld [vmem:[%s247_s24 + $0x28] sm:$0xff] }
  0x12   : > { %836 = vmatmul.mubr.msk.f32.vlgmr.msra.gmra.mrb[0].mxu0 %vm274_vm0, %v1024_v15  ;;  %905 = vmatpush3.bf16.msra.mxu1 %v891_v16  ;;  %v1042_v21 = vld [vmem:[%s247_s24 + $0x30] sm:$0xff]  ;;  %v1048_v22 = vld [vmem:[%s247_s24 + $0x38] sm:$0xff] }
  0x13   : > { %838 = vmatprep.mubr.msk.f32.mxu0 %vm274_vm0, %v1026_v17  ;;  %886 = vmatpush3.bf16.msra.mxu0 %v883_v8 }
  0x14   : > { %888 = vmatprep.subr.bf16.mxu0 %v887_v11  ;;  %902 = vmatprep.subr.bf16.mxu1 %v895_v25 }
  0x16   : > { %839 = vmatmul.mubr.msk.f32.gmra.mrb[2].mxu0 %vm274_vm0, %v1032_v18  ;;  %906 = vmatpush3.bf16.msra.mxu1 %v895_v25 }
  0x17   : > { %841 = vmatprep.mubr.msk.f32.mxu0 %vm274_vm0, %v1034_v19  ;;  %890 = vmatpush3.bf16.msra.mxu0 %v887_v11 }
  0x18   : > { %892 = vmatprep.subr.bf16.mxu0 %v891_v16 }
  0x1a   : > { %842 = vmatmul.mubr.msk.f32.gmra.mrb[4].mxu0 %vm274_vm0, %v1040_v20 }
  0x1b   : > { %844 = vmatprep.mubr.msk.f32.mxu0 %vm274_vm0, %v1042_v21  ;;  %894 = vmatpush3.bf16.msra.mxu0 %v891_v16 }
  0x1c   : > { %896 = vmatprep.subr.bf16.mxu0 %v895_v25 }
  0x1e   : > { %845 = vmatmul.mubr.msk.f32.gmra.mrb[6].mxu0 %vm274_vm0, %v1048_v22 }
  0x1f   : > { %898 = vmatpush3.bf16.msra.mxu0 %v895_v25 }
  0xe5   : > { %v837_v27 = vpop.f32.mrb[0].mxu0 }
  0xe6   : > { %v371_v28 = vadd.f32 %v837_v27, %v777_v26  ;;  %v365_v29 = vpop.f32.mrb[1].mxu0 }
  0xe7   : > { %v366_v30 = vadd.f32 %v777_v26, %v365_v29 }
  0xe8   : > { %v405_v33 = vmax.f32 %v371_v28, 0.0 }
  0xe9   : > { %v404_v31 = vmax.f32 %v366_v30, 0.0  ;;  %v840_v32 = vpop.f32.mrb[2].mxu0 }
  0xea   : > { %v381_v34 = vadd.f32 %v840_v32, %v777_v26  ;;  %v375_v35 = vpop.f32.mrb[3].mxu0 }
  0xeb   : > { %v376_v36 = vadd.f32 %v777_v26, %v375_v35  ;;  %863 = vmatprep.mubr.msk.f32.mxu0 %vm420_vm1, %v404_v31 }
  0xec   : > { %864 = vmatmul.mubr.msk.f32.vlgmr.msra.gmra.mrb[8].mxu0 %vm420_vm1, %v405_v33  ;;  %v407_v39 = vmax.f32 %v381_v34, 0.0 }
  0xed   : > { %v406_v37 = vmax.f32 %v376_v36, 0.0  ;;  %v843_v38 = vpop.f32.mrb[4].mxu0 }
  0xee   : > { %v391_v40 = vadd.f32 %v843_v38, %v777_v26  ;;  %v385_v41 = vpop.f32.mrb[5].mxu0 }
  0xef   : > { %v386_v42 = vadd.f32 %v777_v26, %v385_v41  ;;  %866 = vmatprep.mubr.msk.f32.mxu1 %vm420_vm1, %v406_v37 }
  0xf0   : > { %v409_v43 = vmax.f32 %v391_v40, 0.0  ;;  %867 = vmatmul.mubr.msk.f32.vlgmr.msra.gmra.mrb[0].mxu1 %vm420_vm1, %v407_v39 }
  0xf1   : > { %v408_v44 = vmax.f32 %v386_v42, 0.0  ;;  %v846_v45 = vpop.f32.mrb[6].mxu0 }
  0xf2   : > { %v401_v46 = vadd.f32 %v846_v45, %v777_v26  ;;  %v395_v47 = vpop.f32.mrb[7].mxu0 }
  0xf3   : > { %v396_v48 = vadd.f32 %v777_v26, %v395_v47  ;;  %869 = vmatprep.mubr.msk.f32.mxu1 %vm420_vm1, %v408_v44 }
  0xf4   : > { %v411_v49 = vmax.f32 %v401_v46, 0.0  ;;  %870 = vmatmul.mubr.msk.f32.gmra.mrb[2].mxu1 %vm420_vm1, %v409_v43 }
  0xf5   : > { %v410_v50 = vmax.f32 %v396_v48, 0.0 }
  0xf7   : > { %872 = vmatprep.mubr.msk.f32.mxu1 %vm420_vm1, %v410_v50 }
  0xf8   : > { %873 = vmatmul.mubr.msk.f32.gmra.mrb[4].mxu1 %vm420_vm1, %v411_v49 }
 0x1bf   : > { %v865_v51 = vpop.f32.mrb[8].mxu0 }
 0x1c0   : > { %v551_v53 = vadd.f32 %v865_v51, %v1024_v15  ;;  %v511_v54 = vpop.f32.mrb[9].mxu0 }
 0x1c1   : > { %v550_v55 = vadd.f32 %v511_v54, %v1020_v14 }
 0x1c2   : > { %v566_v56 = vadd.f32 %v794_v52, %v551_v53 }
 0x1c3   : > { %v868_v57 = vpop.f32.mrb[0].mxu1  ;;  %v565_v61 = vadd.f32 %v794_v52, %v550_v55 }
 0x1c4   : > { %v553_v58 = vadd.f32 %v868_v57, %v1032_v18  ;;  %v521_v59 = vpop.f32.mrb[1].mxu1  ;;  %v576_v60 = vsel %vm274_vm0, %v566_v56, 0.0 }
 0x1c5   : > { %v552_v62 = vadd.f32 %v521_v59, %v1026_v17  ;;  %577 = vadd.xlane.f32.xlu0 %v576_v60  ;;  %v573_v4 = vsel %vm274_vm0, %v565_v61, 0.0 }
 0x1c6   : > { %v568_v63 = vadd.f32 %v794_v52, %v553_v58 }
 0x1c7   : > { %v871_v0 = vpop.f32.mrb[2].mxu1  ;;  %v567_v5 = vadd.f32 %v794_v52, %v552_v62 }
 0x1c8   : > { %v555_v1 = vadd.f32 %v871_v0, %v1040_v20  ;;  %v531_v2 = vpop.f32.mrb[3].mxu1  ;;  %v582_v3 = vsel %vm274_vm0, %v568_v63, 0.0 }
 0x1c9   : > { %v554_v6 = vadd.f32 %v531_v2, %v1034_v19  ;;  %583 = vadd.xlane.f32.xlu1 %v582_v3  ;;  %574 = vadd.xlane.f32.xlu0 %v573_v4  ;;  %v579_v11 = vsel %vm274_vm0, %v567_v5, 0.0 }
 0x1ca   : > { %v570_v12 = vadd.f32 %v794_v52, %v555_v1 }
 0x1cb   : > { %v874_v7 = vpop.f32.mrb[4].mxu1  ;;  %v569_v8 = vadd.f32 %v794_v52, %v554_v6 }
 0x1cc   : > { %v557_v9 = vadd.f32 %v874_v7, %v1048_v22  ;;  %v541_v10 = vpop.f32.mrb[5].mxu1  ;;  %v588_v16 = vsel %vm274_vm0, %v570_v12, 0.0 }
 0x1cd   : > { %v556_v13 = vadd.f32 %v541_v10, %v1042_v21  ;;  %580 = vadd.xlane.f32.xlu1 %v579_v11  ;;  %v585_v14 = vsel %vm274_vm0, %v569_v8, 0.0 }
 0x1ce   : > { %586 = vadd.xlane.f32.xlu0 %v585_v14  ;;  %v572_v17 = vadd.f32 %v794_v52, %v557_v9 }
 0x1cf   : > { %v571_v15 = vadd.f32 %v794_v52, %v556_v13  ;;  %v795_v13 = vld [vmem:[%s1173_s5] ss:$0 sm:$0xff] }
 0x1d0   : > { %v594_v19 = vsel %vm274_vm0, %v572_v17, 0.0 }
 0x1d1   : > { %589 = vadd.xlane.f32.xlu1 %v588_v16  ;;  %v591_v18 = vsel %vm274_vm0, %v571_v15, 0.0 }
 0x1d2   : > { %592 = vadd.xlane.f32.xlu0 %v591_v18 }
 0x1d5   : > { %595 = vadd.xlane.f32.xlu1 %v594_v19  ;;  %v796_v19 = vld [vmem:[%s1173_s5 + $0x1] ss:$0 sm:$0xff] }
 0x252   : > { %v578_v20 = vpop.xlane.xlu0 %577 }
 0x253   : > { %v599_v22 = vmul.f32 0.03125, %v578_v20 }
 0x255   : > { %v1088_v23 = vsub.f32 %v566_v56, %v599_v22 }
 0x256   : > { %v584_v21 = vpop.xlane.xlu1 %583  ;;  %v575_v24 = vpop.xlane.xlu0 %574 }
 0x257   : > { %v601_v25 = vmul.f32 0.03125, %v584_v21  ;;  %v598_v26 = vmul.f32 0.03125, %v575_v24  ;;  %v615_v27 = vmul.f32 %v1088_v23, %v1088_v23 }
 0x259   : > { %v1092_v28 = vsub.f32 %v568_v63, %v601_v25  ;;  %v1094_v29 = vsub.f32 %v565_v61, %v598_v26  ;;  %v625_v30 = vsel %vm274_vm0, %v615_v27, 0.0 }
 0x25a   : > { %v581_v31 = vpop.xlane.xlu1 %580  ;;  %626 = vadd.xlane.f32.xlu1 %v625_v30 }
 0x25b   : > { %v600_v32 = vmul.f32 0.03125, %v581_v31  ;;  %v587_v33 = vpop.xlane.xlu0 %586  ;;  %v617_v34 = vmul.f32 %v1092_v28, %v1092_v28  ;;  %v614_v35 = vmul.f32 %v1094_v29, %v1094_v29 }
 0x25c   : > { %v602_v36 = vmul.f32 0.03125, %v587_v33 }
 0x25d   : > { %v1101_v37 = vsub.f32 %v567_v5, %v600_v32  ;;  %v631_v38 = vsel %vm274_vm0, %v617_v34, 0.0  ;;  %v622_v39 = vsel %vm274_vm0, %v614_v35, 0.0 }
 0x25e   : > { %v1105_v40 = vsub.f32 %v569_v8, %v602_v36  ;;  %v590_v41 = vpop.xlane.xlu1 %589  ;;  %632 = vadd.xlane.f32.xlu1 %v631_v38  ;;  %623 = vadd.xlane.f32.xlu0 %v622_v39 }
 0x25f   : > { %v603_v42 = vmul.f32 0.03125, %v590_v41  ;;  %v593_v43 = vpop.xlane.xlu0 %592  ;;  %v616_v44 = vmul.f32 %v1101_v37, %v1101_v37 }
 0x260   : > { %v604_v45 = vmul.f32 0.03125, %v593_v43  ;;  %v618_v48 = vmul.f32 %v1105_v40, %v1105_v40 }
 0x261   : > { %v1109_v46 = vsub.f32 %v570_v12, %v603_v42  ;;  %v628_v47 = vsel %vm274_vm0, %v616_v44, 0.0 }
 0x262   : > { %v1114_v49 = vsub.f32 %v571_v15, %v604_v45  ;;  %v596_v50 = vpop.xlane.xlu1 %595  ;;  %629 = vadd.xlane.f32.xlu0 %v628_v47  ;;  %v634_v55 = vsel %vm274_vm0, %v618_v48, 0.0 }
 0x263   : > { %v605_v51 = vmul.f32 0.03125, %v596_v50  ;;  %v619_v52 = vmul.f32 %v1109_v46, %v1109_v46 }
 0x264   : > { %v620_v56 = vmul.f32 %v1114_v49, %v1114_v49 }
 0x265   : > { %v1118_v53 = vsub.f32 %v572_v17, %v605_v51  ;;  %v637_v54 = vsel %vm274_vm0, %v619_v52, 0.0 }
 0x266   : > { %638 = vadd.xlane.f32.xlu1 %v637_v54  ;;  %635 = vadd.xlane.f32.xlu0 %v634_v55  ;;  %v640_v59 = vsel %vm274_vm0, %v620_v56, 0.0 }
 0x267   : > { %v621_v57 = vmul.f32 %v1118_v53, %v1118_v53 }
 0x269   : > { %v643_v58 = vsel %vm274_vm0, %v621_v57, 0.0 }
 0x26a   : > { %644 = vadd.xlane.f32.xlu1 %v643_v58  ;;  %641 = vadd.xlane.f32.xlu0 %v640_v59 }
 0x2e7   : > { %v627_v60 = vpop.xlane.xlu1 %626 }
 0x2e8   : > { %v647_v61 = vmul.f32 0.03125, %v627_v60 }
 0x2ea   : > { %v655_v62 = vadd.f32 1e-05, %v647_v61 }
 0x2eb   : > { %v633_v63 = vpop.xlane.xlu1 %632  ;;  %v624_v0 = vpop.xlane.xlu0 %623 }
 0x2ec   : > { %915 = vrsqrt.f32 %v655_v62  ;;  %v649_v1 = vmul.f32 0.03125, %v633_v63  ;;  %v646_v2 = vmul.f32 0.03125, %v624_v0 }
 0x2ee   : > { %v657_v3 = vadd.f32 1e-05, %v649_v1  ;;  %v654_v4 = vadd.f32 1e-05, %v646_v2 }
 0x2ef   : > { %v630_v5 = vpop.xlane.xlu0 %629 }
 0x2f0   : > { %917 = vrsqrt.f32 %v657_v3  ;;  %v648_v6 = vmul.f32 0.03125, %v630_v5 }
 0x2f1   : > { %919 = vrsqrt.f32 %v654_v4 }
 0x2f2   : > { %v656_v7 = vadd.f32 1e-05, %v648_v6 }
 0x2f3   : > { %v639_v8 = vpop.xlane.xlu1 %638  ;;  %v636_v9 = vpop.xlane.xlu0 %635 }
 0x2f4   : > { %921 = vrsqrt.f32 %v656_v7  ;;  %v651_v10 = vmul.f32 0.03125, %v639_v8  ;;  %v650_v11 = vmul.f32 0.03125, %v636_v9 }
 0x2f6   : > { %v916_v12 = vpop.eup %915  ;;  %v659_v14 = vadd.f32 1e-05, %v651_v10  ;;  %v658_v15 = vadd.f32 1e-05, %v650_v11 }
 0x2f7   : > { %v671_v16 = vmul.f32 %v916_v12, %v1088_v23  ;;  %v645_v17 = vpop.xlane.xlu1 %644  ;;  %v642_v18 = vpop.xlane.xlu0 %641 }
 0x2f8   : > { %923 = vrsqrt.f32 %v659_v14  ;;  %v653_v20 = vmul.f32 0.03125, %v645_v17  ;;  %v652_v22 = vmul.f32 0.03125, %v642_v18 }
 0x2f9   : > { %v684_v21 = vmul.f32 %v795_v13, %v671_v16  ;;  %925 = vrsqrt.f32 %v658_v15 }
 0x2fa   : > { %v918_v24 = vpop.eup %917  ;;  %v661_v23 = vadd.f32 1e-05, %v653_v20  ;;  %v660_v25 = vadd.f32 1e-05, %v652_v22 }
 0x2fb   : > { %v920_v26 = vpop.eup %919  ;;  %v697_v27 = vadd.f32 %v796_v19, %v684_v21  ;;  %v673_v30 = vmul.f32 %v918_v24, %v1092_v28 }
 0x2fc   : > { %v670_v31 = vmul.f32 %v920_v26, %v1094_v29  ;;  %927 = vrsqrt.f32 %v661_v23 }
 0x2fd   : > { %705 = vst.msk [vmem:[%s1140_s17 + $0x8] sm:$0xff] %vm274_vm0, %v697_v27  ;;  %v686_v32 = vmul.f32 %v795_v13, %v673_v30  ;;  %929 = vrsqrt.f32 %v660_v25 }
 0x2fe   : > { %v922_v33 = vpop.eup %921  ;;  %v683_v34 = vmul.f32 %v795_v13, %v670_v31 }
 0x2ff   : > { %v699_v35 = vadd.f32 %v796_v19, %v686_v32  ;;  %v672_v36 = vmul.f32 %v922_v33, %v1101_v37 }
 0x300   : > { %v696_v38 = vadd.f32 %v796_v19, %v683_v34 }
 0x301   : > { %707 = vst.msk [vmem:[%s1140_s17 + $0x18] sm:$0xff] %vm274_vm0, %v699_v35  ;;  %v685_v39 = vmul.f32 %v795_v13, %v672_v36 }
 0x302   : > { %v924_v41 = vpop.eup %923  ;;  %704 = vst.msk [vmem:[%s1140_s17] sm:$0xff] %vm274_vm0, %v696_v38 }
 0x303   : > { %v926_v28 = vpop.eup %925  ;;  %v698_v29 = vadd.f32 %v796_v19, %v685_v39  ;;  %v675_v42 = vmul.f32 %v924_v41, %v1109_v46 }
 0x304   : > { %v674_v43 = vmul.f32 %v926_v28, %v1105_v40 }
 0x305   : > { %706 = vst.msk [vmem:[%s1140_s17 + $0x10] sm:$0xff] %vm274_vm0, %v698_v29  ;;  %v688_v37 = vmul.f32 %v795_v13, %v675_v42 }
 0x306   : > { %v928_v44 = vpop.eup %927  ;;  %v687_v45 = vmul.f32 %v795_v13, %v674_v43 }
 0x307   : > { %v930_v47 = vpop.eup %929  ;;  %v701_v48 = vadd.f32 %v796_v19, %v688_v37  ;;  %v677_v50 = vmul.f32 %v928_v44, %v1118_v53 }
 0x308   : > { %v700_v51 = vadd.f32 %v796_v19, %v687_v45  ;;  %v676_v52 = vmul.f32 %v930_v47, %v1114_v49 }
 0x309   : > { %709 = vst.msk [vmem:[%s1140_s17 + $0x28] sm:$0xff] %vm274_vm0, %v701_v48  ;;  %v690_v54 = vmul.f32 %v795_v13, %v677_v50 }
 0x30a   : > { %708 = vst.msk [vmem:[%s1140_s17 + $0x20] sm:$0xff] %vm274_vm0, %v700_v51  ;;  %v689_v40 = vmul.f32 %v795_v13, %v676_v52 }
 0x30b   : > { %v703_v46 = vadd.f32 %v796_v19, %v690_v54 }
 0x30c   : > { %v702_v55 = vadd.f32 %v796_v19, %v689_v40 }
 0x30d   : > { %711 = vst.msk [vmem:[%s1140_s17 + $0x38] sm:$0xff] %vm274_vm0, %v703_v46 }
 0x30e   : > { %710 = vst.msk [vmem:[%s1140_s17 + $0x30] sm:$0xff] %vm274_vm0, %v702_v55 }
 0x30f PF: > { %s16_s21 = sadd.s32 1, %s937_s21  }
 0x310   : > { %p13_p4 = scmp.ge.s32.totalorder %s16_s21, 4  }
 0x312   :  { %15 = sbr.rel (!%p13_p4) target bundleno = 1 (0x1), region = 74 }

// kernel: detr_forward.10
= control target key start
LH: loop header
LB: loop body
LE: loop exit
PB: predicated region body
PF: predicated region fallthrough
CT: control target
= control target key end

     0   :  { %s719_s18 = smov 0   ;;  %s782_s0 = inlined_call_operand.vmem [shape: f32[128,3], index: 0, kind: input, shape index: {}]   ;;  %s783_s1 = inlined_call_operand.vmem [shape: f32[3,16], index: 1, kind: input, shape index: {}]   ;;  %s784_s2 = inlined_call_operand.vmem [shape: f32[1,16], index: 2, kind: input, shape index: {}]   ;;  %s785_s3 = inlined_call_operand.vmem [shape: f32[16,32], index: 3, kind: input, shape index: {}]   ;;  %s786_s4 = inlined_call_operand.vmem [shape: f32[1,32], index: 4, kind: input, shape index: {}]   ;;  %s787_s5 = inlined_call_operand.vmem [shape: f32[128,32], index: 5, kind: output, shape index: {}]  }
   0x1 LB: > { %s590_s19 = sadd.s32 4294967295, %s687_s18   ;;  %p594_p0 = scmp.ge.s32.totalorder %s687_s18, 1  ;;  %s687_s18 = sphi %s719_s18, %s15_s18  }
   0x2   : > { %p188_p1 = scmp.lt.s32.totalorder %s687_s18, 3 }
   0x4   : > { %p189_p2 = pnand %p594_p0, %p188_p1 }
   0x5   : > { %v236_v0 = vld [vmem:[%s783_s1] sm:$0x7] (!%p189_p2)  ;;  %vm269_vm0 = vcmask (!%p189_p2), 1042432   ;;  %s595_s22 = sshll.u32 (!%p189_p2), %s590_s19, 3  ;;  %vm244_vm1 = vcmask (!%p189_p2), 23552   ;;  %v387_v10 = vld [vmem:[%s785_s3 + $0x8] sm:$0xff] (!%p189_p2) }
   0x6   : > { %192 = sbr.rel (%p189_p2) target bundleno = 464 (0x1d0), region = 40  ;;  %639 = vmatprep.subr.msk.mxu0 (!%p189_p2), %vm269_vm0, %v236_v0  ;;  %p217_p3 = scmp.lt.s32.totalorder (!%p189_p2), %s595_s22, 15  ;;  %v386_v9 = vld [vmem:[%s785_s3] sm:$0xff] (!%p189_p2)  ;;  %vm395_vm2 = vcmask (!%p189_p2), 130048   ;;  %vm525_vm3 = vcmask (!%p189_p2), 261120  }
   0x7   : > { %640 = vmatpush3.msk.msra.mxu0 (!%p189_p2), %vm269_vm0, %v236_v0  ;;  %v669_v11 = vpack.c.bf16 (!%p189_p2), %v387_v10, %v386_v9  ;;  %v599_v12 = vld [vmem:[%s784_s2] ss:$0 sm:$0xff] (!%p189_p2) }
   0x8   : > { %v609_v37 = vld [vmem:[%s786_s4] ss:$0 sm:$0xff] (!%p189_p2) }
   0x9   : > { %670 = vmatprep.subr.bf16.mxu1 (!%p189_p2), %v669_v11 }
   0xa   : > { %672 = vmatpush3.bf16.msra.mxu1 (!%p189_p2), %v669_v11 }
   0xd   : > { %s789_s22 = smov (!%p217_p3, %s595_s22), 15 }
   0xe   : > { %s596_s23 = sshll.u32 %s789_s22, 3 }
   0xf   : > { %s220_s26 = scalar_lea.vmem %s782_s0, %s596_s23  ;;  %s226_s12 = scalar_lea.vmem %s787_s5, %s596_s23 }
  0x10   : > { %v228_v1 = vld [vmem:[%s220_s26] sm:$0xff]  ;;  %v229_v2 = vld [vmem:[%s220_s26 + $0x8] sm:$0xff]  ;;  %v230_v3 = vld [vmem:[%s220_s26 + $0x10] sm:$0xff] }
  0x11   : > { %641 = vmatprep.mubr.msk.f32.mxu0 %vm244_vm1, %v228_v1  ;;  %v231_v4 = vld [vmem:[%s220_s26 + $0x18] sm:$0xff]  ;;  %v232_v5 = vld [vmem:[%s220_s26 + $0x20] sm:$0xff]  ;;  %v233_v6 = vld [vmem:[%s220_s26 + $0x28] sm:$0xff] }
  0x12   : > { %642 = vmatmul.mubr.msk.f32.vlgmr.msra.gmra.mrb[0].mxu0 %vm244_vm1, %v229_v2  ;;  %v234_v7 = vld [vmem:[%s220_s26 + $0x30] sm:$0xff]  ;;  %v235_v8 = vld [vmem:[%s220_s26 + $0x38] sm:$0xff] }
  0x13   : > { %644 = vmatprep.mubr.msk.f32.mxu0 %vm244_vm1, %v230_v3 }
  0x16   : > { %645 = vmatmul.mubr.msk.f32.gmra.mrb[2].mxu0 %vm244_vm1, %v231_v4 }
  0x17   : > { %647 = vmatprep.mubr.msk.f32.mxu0 %vm244_vm1, %v232_v5 }
  0x1a   : > { %648 = vmatmul.mubr.msk.f32.gmra.mrb[4].mxu0 %vm244_vm1, %v233_v6 }
  0x1b   : > { %650 = vmatprep.mubr.msk.f32.mxu0 %vm244_vm1, %v234_v7 }
  0x1e   : > { %651 = vmatmul.mubr.msk.f32.gmra.mrb[6].mxu0 %vm244_vm1, %v235_v8 }
  0xe5   : > { %v643_v13 = vpop.f32.mrb[0].mxu0 }
  0xe6   : > { %v345_v14 = vadd.f32 %v643_v13, %v599_v12  ;;  %v339_v15 = vpop.f32.mrb[1].mxu0 }
  0xe7   : > { %v340_v16 = vadd.f32 %v599_v12, %v339_v15 }
  0xe8   : > { %v379_v19 = vmax.f32 %v345_v14, 0.0 }
  0xe9   : > { %v378_v17 = vmax.f32 %v340_v16, 0.0  ;;  %v646_v18 = vpop.f32.mrb[2].mxu0 }
  0xea   : > { %v355_v20 = vadd.f32 %v646_v18, %v599_v12  ;;  %v349_v21 = vpop.f32.mrb[3].mxu0 }
  0xeb   : > { %v350_v22 = vadd.f32 %v599_v12, %v349_v21  ;;  %657 = vmatprep.mubr.msk.f32.mxu1 %vm395_vm2, %v378_v17 }
  0xec   : > { %658 = vmatmul.mubr.msk.f32.vlgmr.msra.gmra.mrb[0].mxu1 %vm395_vm2, %v379_v19  ;;  %v381_v25 = vmax.f32 %v355_v20, 0.0 }
  0xed   : > { %v380_v23 = vmax.f32 %v350_v22, 0.0  ;;  %v649_v24 = vpop.f32.mrb[4].mxu0 }
  0xee   : > { %v365_v26 = vadd.f32 %v649_v24, %v599_v12  ;;  %v359_v27 = vpop.f32.mrb[5].mxu0 }
  0xef   : > { %v360_v28 = vadd.f32 %v599_v12, %v359_v27  ;;  %660 = vmatprep.mubr.msk.f32.mxu1 %vm395_vm2, %v380_v23 }
  0xf0   : > { %661 = vmatmul.mubr.msk.f32.gmra.mrb[2].mxu1 %vm395_vm2, %v381_v25  ;;  %v383_v31 = vmax.f32 %v365_v26, 0.0 }
  0xf1   : > { %v382_v29 = vmax.f32 %v360_v28, 0.0  ;;  %v652_v30 = vpop.f32.mrb[6].mxu0 }
  0xf2   : > { %v375_v32 = vadd.f32 %v652_v30, %v599_v12  ;;  %v369_v33 = vpop.f32.mrb[7].mxu0 }
  0xf3   : > { %v370_v34 = vadd.f32 %v599_v12, %v369_v33  ;;  %663 = vmatprep.mubr.msk.f32.mxu1 %vm395_vm2, %v382_v29 }
  0xf4   : > { %664 = vmatmul.mubr.msk.f32.gmra.mrb[4].mxu1 %vm395_vm2, %v383_v31  ;;  %v385_v36 = vmax.f32 %v375_v32, 0.0 }
  0xf5   : > { %v384_v35 = vmax.f32 %v370_v34, 0.0 }
  0xf7   : > { %666 = vmatprep.mubr.msk.f32.mxu1 %vm395_vm2, %v384_v35 }
  0xf8   : > { %667 = vmatmul.mubr.msk.f32.gmra.mrb[6].mxu1 %vm395_vm2, %v385_v36 }
 0x1bf   : > { %v659_v38 = vpop.f32.mrb[0].mxu1 }
 0x1c0   : > { %v492_v39 = vadd.f32 %v659_v38, %v609_v37  ;;  %v486_v40 = vpop.f32.mrb[1].mxu1 }
 0x1c1   : > { %v487_v41 = vadd.f32 %v609_v37, %v486_v40 }
 0x1c2   : > { %527 = vst.msk [vmem:[%s226_s12 + $0x8] sm:$0xff] %vm525_vm3, %v492_v39 }
 0x1c3   : > { %526 = vst.msk [vmem:[%s226_s12] sm:$0xff] %vm525_vm3, %v487_v41  ;;  %v662_v42 = vpop.f32.mrb[2].mxu1 }
 0x1c4   : > { %v502_v43 = vadd.f32 %v662_v42, %v609_v37  ;;  %v496_v44 = vpop.f32.mrb[3].mxu1 }
 0x1c5   : > { %v497_v45 = vadd.f32 %v609_v37, %v496_v44 }
 0x1c6   : > { %529 = vst.msk [vmem:[%s226_s12 + $0x18] sm:$0xff] %vm525_vm3, %v502_v43 }
 0x1c7   : > { %528 = vst.msk [vmem:[%s226_s12 + $0x10] sm:$0xff] %vm525_vm3, %v497_v45  ;;  %v665_v46 = vpop.f32.mrb[4].mxu1 }
 0x1c8   : > { %v512_v47 = vadd.f32 %v665_v46, %v609_v37  ;;  %v506_v48 = vpop.f32.mrb[5].mxu1 }
 0x1c9   : > { %v507_v49 = vadd.f32 %v609_v37, %v506_v48 }
 0x1ca   : > { %531 = vst.msk [vmem:[%s226_s12 + $0x28] sm:$0xff] %vm525_vm3, %v512_v47 }
 0x1cb   : > { %530 = vst.msk [vmem:[%s226_s12 + $0x20] sm:$0xff] %vm525_vm3, %v507_v49  ;;  %v668_v50 = vpop.f32.mrb[6].mxu1 }
 0x1cc   : > { %v522_v51 = vadd.f32 %v668_v50, %v609_v37  ;;  %v516_v52 = vpop.f32.mrb[7].mxu1 }
 0x1cd   : > { %v517_v53 = vadd.f32 %v609_v37, %v516_v52 }
 0x1ce   : > { %533 = vst.msk [vmem:[%s226_s12 + $0x38] sm:$0xff] %vm525_vm3, %v522_v51 }
 0x1cf   : > { %532 = vst.msk [vmem:[%s226_s12 + $0x30] sm:$0xff] %vm525_vm3, %v517_v53 }
 0x1d0 PF: > { %s15_s18 = sadd.s32 1, %s687_s18  }
 0x1d1   : > { %p12_p4 = scmp.ge.s32.totalorder %s15_s18, 4  }
 0x1d3   :  { %14 = sbr.rel (!%p12_p4) target bundleno = 1 (0x1), region = 70 }

// kernel: detr_forward.13
= control target key start
LH: loop header
LB: loop body
LE: loop exit
PB: predicated region body
PF: predicated region fallthrough
CT: control target
= control target key end

     0   :  { %s1986_s30 = smov 0   ;;  %s2173_s0 = inlined_call_operand.vmem [shape: f32[2,8,32], index: 0, kind: input, shape index: {}, may-alias: {0,2}]   ;;  %s2174_s1 = inlined_call_operand.vmem [shape: f32[1,8,32], index: 1, kind: input, shape index: {}, may-alias: {1,3}]   ;;  %s2175_s2 = inlined_call_operand.vmem [shape: f32[2,8,32], index: 2, kind: input, shape index: {}, may-alias: {0,2}]   ;;  %s2176_s3 = inlined_call_operand.vmem [shape: f32[1,8,32], index: 3, kind: input, shape index: {}, may-alias: {1,3}]   ;;  %s2177_s4 = inlined_call_operand.vmem [shape: f32[32,96], index: 4, kind: input, shape index: {}]   ;;  %s2178_s5 = inlined_call_operand.vmem [shape: f32[1,96], index: 5, kind: input, shape index: {}]   ;;  %s2179_s6 = inlined_call_operand.vmem [shape: f32[32,32], index: 6, kind: input, shape index: {}]   ;;  %s2180_s7 = inlined_call_operand.vmem [shape: f32[1,32], index: 7, kind: input, shape index: {}]   ;;  %s2181_s8 = inlined_call_operand.vmem [shape: f32[2,32], index: 8, kind: input, shape index: {}]   ;;  %s2182_s9 = inlined_call_operand.vmem [shape: f32[2,8,32], index: 9, kind: output, shape index: {}]  }
   0x1 LB: > { %s1677_s10 = sadd.s32 4294967295, %s1926_s30   ;;  %p1681_p0 = scmp.ge.s32.totalorder %s1926_s30, 1  ;;  %s1926_s30 = sphi %s1986_s30, %s19_s30  }
   0x2   : > { %p295_p1 = scmp.lt.s32.totalorder %s1926_s30, 3 }
   0x4   : > { %p296_p2 = pnand %p1681_p0, %p295_p1 }
   0x5   : > { %v351_v0 = vld [vmem:[%s2177_s4] sm:$0xff] (!%p296_p2)  ;;  %v352_v1 = vld [vmem:[%s2177_s4 + $0x8] sm:$0xff] (!%p296_p2)  ;;  %v353_v2 = vld [vmem:[%s2177_s4 + $0x10] sm:$0xff] (!%p296_p2)  ;;  %v1928_v5 = vmov (!%p296_p2), 0.0|0.0   ;;  %p333_p3 = scmp.lt.s32.totalorder (!%p296_p2), %s1677_s10, 1  ;;  %vm1929_vm0 = vmmov (!%p296_p2), 0  }
   0x6   : > { %299 = sbr.rel (%p296_p2) target bundleno = 2899 (0xb53), region = 56  ;;  %v1882_v3 = vpack.i.bf16 (!%p296_p2), %v352_v1, %v351_v0  ;;  %v354_v4 = vld [vmem:[%s2177_s4 + $0x18] sm:$0xff] (!%p296_p2)  ;;  %1848 = vmatprep.subr.bf16.mxu1 (!%p296_p2), %v1928_v5  ;;  %1842 = vmatprep.subr.bf16.mxu0 (!%p296_p2), %v1928_v5  ;;  %v1843_v6 = vpack.c.bf16 (!%p296_p2), %v352_v1, %v351_v0  ;;  %v1930_v7 = vmov (!%p296_p2), 0.0   ;;  %v2015_v8 = vld [vmem:[%s2178_s5] ss:$0 sm:$0xff] (!%p296_p2)  ;;  %s1931_s21 = smov (!%p296_p2), 96  }
   0x7   : > { %1768 = vmatprep.mubr.msk.f32.mxu1 (!%p296_p2), %vm1929_vm0, %v1930_v7  ;;  %1757 = vmatprep.mubr.msk.f32.mxu0 (!%p296_p2), %vm1929_vm0, %v1930_v7  ;;  %v1887_v9 = vpack.i.bf16 (!%p296_p2), %v354_v4, %v353_v2  ;;  %v1846_v10 = vpack.c.bf16 (!%p296_p2), %v354_v4, %v353_v2  ;;  %v347_v11 = vld [vmem:[%s2174_s1] sm:$0xff] (!%p296_p2)  ;;  %vm362_vm1 = vcmask (!%p296_p2), 261120   ;;  %s1932_s13 = smov (!%p296_p2), 64   ;;  %vm628_vm2 = vcmask (!%p296_p2), 64512   ;;  %s1933_s14 = smov (!%p296_p2), 120  }
   0x8   : > { %1883 = vrot.lane.b32.xlu0 (!%p296_p2), %v1882_v3, %s1931_s21  ;;  %1844 = vmatpush3.bf16.msra.mxu0 (!%p296_p2), %v1843_v6  ;;  %v349_v22 = vld [vmem:[%s2176_s3] sm:$0xff] (!%p296_p2)  ;;  %s1934_s15 = smov (!%p296_p2), 112   ;;  %s1935_s18 = smov (!%p296_p2), 104  }
   0x9   : > { %1845 = vmatprep.subr.bf16.mxu0 (!%p296_p2), %v1928_v5  ;;  %452 = vrot.lane.b32.xlu1 (!%p296_p2), %v2015_v8, %s1931_s21  ;;  %v616_v56 = vld [vmem:[%s2179_s6] sm:$0xff] (!%p296_p2) }
   0xc   : > { %1888 = vrot.lane.b32.xlu0 (!%p296_p2), %v1887_v9, %s1931_s21  ;;  %1847 = vmatpush3.bf16.msra.mxu0 (!%p296_p2), %v1846_v10 }
   0xd   : > { %s2184_s10 = smov (!%p333_p3, %s1677_s10), 1  ;;  %1854 = vmatprep.subr.bf16.mxu0 %v1928_v5  ;;  %1893 = vrot.lane.b32.xlu1 %v1882_v3, %s1932_s13 }
   0xe   : > { %s2019_s22 = sshll.u32 %s2184_s10, 3 }
   0xf   : > { %s336_s27 = scalar_lea.vmem %s2173_s0, %s2019_s22  ;;  %s340_s10 = scalar_lea.vmem %s2175_s2, %s2019_s22 }
  0x10   : > { %v2028_v12 = vld [vmem:[%s336_s27] sm:$0xff]  ;;  %1898 = vrot.lane.b32.xlu0 %v1887_v9, %s1932_s13 }
  0x11   : > { %v348_v13 = vadd.f32 %v347_v11, %v2028_v12  ;;  %v346_v21 = vld [vmem:[%s340_s10] sm:$0xff] }
  0x12   : > { %v350_v24 = vadd.f32 %v349_v22, %v346_v21 }
  0x13   : > { %1758 = vmatmul.mubr.msk.f32.vlgmr.msra.gmra.mrb[0].mxu0 %vm362_vm1, %v348_v13 }
  0x14   : > { %1779 = vmatprep.mubr.msk.f32.mxu0 %vm1929_vm0, %v1930_v7 }
  0x7a   : > { %v1884_v14 = vpop.permute.xlu0 %1883 }
  0x7b   : > { %v1886_v15 = vunpack.i.h.bf16 %v1884_v14  ;;  %v1885_v16 = vunpack.i.l.bf16 %v1884_v14  ;;  %v453_v27 = vpop.permute.xlu1 %452 }
  0x7d   : > { %v1849_v17 = vpack.c.bf16 %v1886_v15, %v1885_v16 }
  0x7e   : > { %v1889_v18 = vpop.permute.xlu0 %1888 }
  0x7f   : > { %v1891_v19 = vunpack.i.h.bf16 %v1889_v18  ;;  %v1890_v20 = vunpack.i.l.bf16 %v1889_v18  ;;  %1850 = vmatpush3.bf16.msra.mxu1 %v1849_v17  ;;  %v1894_v32 = vpop.permute.xlu1 %1893 }
  0x80   : > { %1851 = vmatprep.subr.bf16.mxu1 %v1928_v5  ;;  %v1896_v34 = vunpack.i.h.bf16 %v1894_v32  ;;  %v1895_v35 = vunpack.i.l.bf16 %v1894_v32 }
  0x81   : > { %v1852_v23 = vpack.c.bf16 %v1891_v19, %v1890_v20 }
  0x82   : > { %v1899_v33 = vpop.permute.xlu0 %1898  ;;  %v1855_v38 = vpack.c.bf16 %v1896_v34, %v1895_v35 }
  0x83   : > { %1853 = vmatpush3.bf16.msra.mxu1 %v1852_v23  ;;  %v1901_v36 = vunpack.i.h.bf16 %v1899_v33  ;;  %v1900_v37 = vunpack.i.l.bf16 %v1899_v33 }
  0x84   : > { %1782 = vmatprep.subr.mxu1 %v1930_v7  ;;  %1856 = vmatpush3.bf16.msra.mxu0 %v1855_v38 }
  0x85   : > { %v1858_v39 = vpack.c.bf16 %v1901_v36, %v1900_v37  ;;  %1857 = vmatprep.subr.bf16.mxu0 %v1928_v5  ;;  %v617_v37 = vld [vmem:[%s2179_s6 + $0x8] sm:$0xff] }
  0x86   : > { %1769 = vmatmul.mubr.msk.f32.vlgmr.msra.gmra.mrb[0].mxu1 %vm362_vm1, %v350_v24 }
  0x87   : > { %1784 = vmatprep.mubr.msk.f32.mxu1 %vm1929_vm0, %v1930_v7 }
  0x88   : > { %1859 = vmatpush3.bf16.msra.mxu0 %v1858_v39 }
  0x89   : > { %1802 = vmatprep.subr.mxu0 %v1930_v7 }
  0x8b   : > { %1780 = vmatmul.mubr.msk.f32.vlgmr.msra.gmra.mrb[2].mxu0 %vm362_vm1, %v346_v21 }
  0x8c   : > { %1804 = vmatprep.mubr.msk.f32.mxu0 %vm1929_vm0, %v1930_v7 }
  0xe6   : > { %v432_v25 = vpop.f32.mrb[0].mxu0 }
  0xe7   : > { %v1759_v26 = vpop.f32.mrb[1].mxu0  ;;  %v2052_v31 = vadd.f32 %v2015_v8, %v432_v25 }
 0x159   : > { %v524_v28 = vpop.f32.mrb[0].mxu1 }
 0x15a   : > { %v2049_v29 = vadd.f32 %v524_v28, %v453_v27  ;;  %v1770_v30 = vpop.f32.mrb[1].mxu1 }
 0x15c   : > { %1783 = vmatpush3.xpose.msk.msra.mxu1 %vm628_vm2, %v2049_v29 }
 0x15d   : > { %1787 = vmatprep.subr.mxu1 %v1930_v7 }
 0x15e   : > { %v612_v49 = vpop.f32.mrb[2].mxu0 }
 0x15f   : > { %1785 = vmatmul.mubr.msk.f32.vlgmr.msra.gmra.mrb[2].mxu1 %vm628_vm2, %v2052_v31  ;;  %v1781_v50 = vpop.f32.mrb[3].mxu0 }
 0x160   : > { %1789 = vmatprep.mubr.msk.f32.mxu1 %vm1929_vm0, %v1930_v7  ;;  %v619_v50 = vld [vmem:[%s2179_s6 + $0x18] sm:$0xff] }
 0x232   : > { %v701_v40 = vpop.f32.mrb[2].mxu1 }
 0x233   : > { %v705_v41 = vmul.f32 0.35355338, %v701_v40  ;;  %v1786_v42 = vpop.f32.mrb[3].mxu1 }
 0x235   : > { %v706_v43 = vsel %vm628_vm2, %v705_v41, -inf }
 0x236   : > { %707 = vmax.xlane.f32.xlu1 %v706_v43  ;;  %v618_v43 = vld [vmem:[%s2179_s6 + $0x10] sm:$0xff] }
 0x247   : > { %866 = vrot.lane.b32.xlu1 %v2049_v29, %s1933_s14 }
 0x24b   : > { %864 = vrot.lane.b32.xlu1 %v2052_v31, %s1933_s14 }
 0x24f   : > { %1105 = vrot.lane.b32.xlu1 %v2052_v31, %s1934_s15 }
 0x2c3   : > { %v708_v44 = vpop.xlane.xlu1 %707 }
 0x2c4   : > { %v709_v45 = vsub.f32 %v705_v41, %v708_v44 }
 0x2c6   : > { %v710_v46 = vmul.f32 1.442695, %v709_v45 }
 0x2c7   : > { %v867_v57 = vpop.permute.xlu1 %866 }
 0x2c8   : > { %1902 = vpow2.f32 %v710_v46 }
 0x2cb   : > { %v865_v60 = vpop.permute.xlu1 %864 }
 0x2cf   : > { %v1106_v62 = vpop.permute.xlu1 %1105 }
 0x2d2   : > { %v1903_v47 = vpop.eup %1902 }
 0x2d3   : > { %v712_v48 = vsel %vm628_vm2, %v1903_v47, 0.0 }
 0x2d4   : > { %713 = vadd.xlane.f32.xlu0 %v712_v48 }
 0x2ea   : > { %540 = vrot.lane.b32.xlu0 %v2015_v8, %s1932_s13 }
 0x2ee   : > { %1107 = vrot.lane.b32.xlu0 %v2049_v29, %s1934_s15 }
 0x361   : > { %v714_v51 = vpop.xlane.xlu0 %713 }
 0x362   : > { %1904 = vrcp.f32 %v714_v51 }
 0x365   : > { %v541_v52 = vpop.permute.xlu0 %540 }
 0x366   : > { %v2078_v53 = vadd.f32 %v612_v49, %v541_v52 }
 0x368   : > { %1788 = vmatpush3.msra.mxu1 %v2078_v53 }
 0x369   : > { %1792 = vmatprep.subr.mxu1 %v1930_v7  ;;  %v1108_v61 = vpop.permute.xlu0 %1107 }
 0x36c   : > { %v1905_v54 = vpop.eup %1904 }
 0x36d   : > { %v716_v55 = vmul.f32 %v1905_v54, %v1903_v47 }
 0x36f   : > { %1790 = vmatmul.mubr.msk.f32.vlgmr.msra.gmra.mrb[4].mxu1 %vm628_vm2, %v716_v55 }
 0x370   : > { %1793 = vmatpush3.msra.mxu1 %v616_v56  ;;  %1794 = vmatprep.mubr.msk.f32.mxu1 %vm1929_vm0, %v1930_v7 }
 0x371   : > { %1797 = vmatprep.subr.mxu1 %v1930_v7 }
 0x442   : > { %v786_v58 = vpop.f32.mrb[4].mxu1 }
 0x443   : > { %v1791_v59 = vpop.f32.mrb[5].mxu1  ;;  %1795 = vmatmul.mubr.msk.f32.vlgmr.msra.gmra.mrb[6].mxu1 %vm628_vm2, %v786_v58 }
 0x444   : > { %1798 = vmatpush3.xpose.msk.msra.mxu1 %vm628_vm2, %v867_v57  ;;  %1799 = vmatprep.mubr.msk.f32.mxu1 %vm1929_vm0, %v1930_v7 }
 0x445   : > { %1812 = vmatprep.subr.mxu1 %v1930_v7 }
 0x447   : > { %1800 = vmatmul.mubr.msk.f32.vlgmr.msra.gmra.mrb[8].mxu1 %vm628_vm2, %v865_v60 }
 0x448   : > { %1813 = vmatpush3.xpose.msk.msra.mxu1 %vm628_vm2, %v1108_v61  ;;  %1814 = vmatprep.mubr.msk.f32.mxu1 %vm1929_vm0, %v1930_v7 }
 0x449   : > { %1817 = vmatprep.subr.mxu1 %v1930_v7 }
 0x44b   : > { %1815 = vmatmul.mubr.msk.f32.vlgmr.msra.gmra.mrb[10].mxu1 %vm628_vm2, %v1106_v62 }
 0x44c   : > { %1819 = vmatprep.mubr.msk.f32.mxu1 %vm1929_vm0, %v1930_v7 }
 0x516   : > { %v2102_v63 = vpop.f32.mrb[6].mxu1 }
 0x517   : > { %v1796_v0 = vpop.f32.mrb[7].mxu1 }
 0x51a   : > { %v938_v1 = vpop.f32.mrb[8].mxu1 }
 0x51b   : > { %v1801_v2 = vpop.f32.mrb[9].mxu1  ;;  %v942_v15 = vmul.f32 0.35355338, %v938_v1 }
 0x51d   : > { %v943_v16 = vsel %vm628_vm2, %v942_v15, -inf }
 0x51e   : > { %v1179_v3 = vpop.f32.mrb[10].mxu1 }
 0x51f   : > { %v1183_v4 = vmul.f32 0.35355338, %v1179_v3  ;;  %v1816_v5 = vpop.f32.mrb[11].mxu1 }
 0x520   : > { %v1707_v5 = vld [vmem:[%s2181_s8 + $0x1] ss:$0 sm:$0xff] }
 0x521   : > { %v1184_v6 = vsel %vm628_vm2, %v1183_v4, -inf }
 0x522   : > { %1185 = vmax.xlane.f32.xlu0 %v1184_v6 }
 0x538   : > { %1195 = vrot.lane.b32.xlu0 %v2078_v53, %s1934_s15 }
 0x53c   : > { %1345 = vrot.lane.b32.xlu0 %v2052_v31, %s1935_s18 }
 0x5af   : > { %v1186_v8 = vpop.xlane.xlu0 %1185 }
 0x5b0   : > { %v1187_v9 = vsub.f32 %v1183_v4, %v1186_v8 }
 0x5b2   : > { %v1188_v10 = vmul.f32 1.442695, %v1187_v9 }
 0x5b3   : > { %v1196_v11 = vpop.permute.xlu0 %1195 }
 0x5b4   : > { %1906 = vpow2.f32 %v1188_v10  ;;  %1818 = vmatpush3.msra.mxu1 %v1196_v11 }
 0x5b5   : > { %1827 = vmatprep.subr.mxu1 %v1930_v7 }
 0x5b7   : > { %v1346_v21 = vpop.permute.xlu0 %1345 }
 0x5be   : > { %v1907_v13 = vpop.eup %1906 }
 0x5bf   : > { %v1190_v14 = vsel %vm628_vm2, %v1907_v13, 0.0 }
 0x5c0   : > { %1191 = vadd.xlane.f32.xlu1 %v1190_v14 }
 0x5d1   : > { %1347 = vrot.lane.b32.xlu1 %v2049_v29, %s1935_s18 }
 0x5f5   : > { %944 = vmax.xlane.f32.xlu1 %v943_v16 }
 0x64d   : > { %v1192_v17 = vpop.xlane.xlu1 %1191 }
 0x64e   : > { %1908 = vrcp.f32 %v1192_v17 }
 0x651   : > { %v1348_v20 = vpop.permute.xlu1 %1347 }
 0x658   : > { %v1909_v18 = vpop.eup %1908 }
 0x659   : > { %v1194_v19 = vmul.f32 %v1909_v18, %v1907_v13 }
 0x65b   : > { %1820 = vmatmul.mubr.msk.f32.vlgmr.msra.gmra.mrb[12].mxu1 %vm628_vm2, %v1194_v19 }
 0x65c   : > { %1828 = vmatpush3.xpose.msk.msra.mxu1 %vm628_vm2, %v1348_v20  ;;  %1829 = vmatprep.mubr.msk.f32.mxu1 %vm1929_vm0, %v1930_v7 }
 0x65f   : > { %1830 = vmatmul.mubr.msk.f32.vlgmr.msra.gmra.mrb[14].mxu1 %vm628_vm2, %v1346_v21 }
 0x682   : > { %v945_v22 = vpop.xlane.xlu1 %944 }
 0x683   : > { %v946_v23 = vsub.f32 %v942_v15, %v945_v22 }
 0x685   : > { %v947_v24 = vmul.f32 1.442695, %v946_v23 }
 0x687   : > { %1910 = vpow2.f32 %v947_v24 }
 0x691   : > { %v1911_v25 = vpop.eup %1910 }
 0x692   : > { %v949_v26 = vsel %vm628_vm2, %v1911_v25, 0.0 }
 0x693   : > { %950 = vadd.xlane.f32.xlu0 %v949_v26 }
 0x6a9   : > { %955 = vrot.lane.b32.xlu0 %v2078_v53, %s1933_s14  ;;  %s344_s14 = scalar_lea.vmem %s2182_s9, %s2019_s22 }
 0x720   : > { %v951_v27 = vpop.xlane.xlu0 %950 }
 0x721   : > { %1912 = vrcp.f32 %v951_v27 }
 0x724   : > { %v956_v28 = vpop.permute.xlu0 %955 }
 0x725   : > { %1803 = vmatpush3.msra.mxu0 %v956_v28 }
 0x726   : > { %1807 = vmatprep.subr.mxu0 %v1930_v7 }
 0x72b   : > { %v1913_v29 = vpop.eup %1912 }
 0x72c   : > { %v953_v30 = vmul.f32 %v1913_v29, %v1911_v25 }
 0x72e   : > { %1805 = vmatmul.mubr.msk.f32.vlgmr.msra.gmra.mrb[4].mxu0 %vm628_vm2, %v953_v30  ;;  %v1267_v31 = vpop.f32.mrb[12].mxu1 }
 0x72f   : > { %v1821_v32 = vpop.f32.mrb[13].mxu1  ;;  %1809 = vmatprep.mubr.msk.f32.mxu0 %vm1929_vm0, %v1930_v7  ;;  %1808 = vmatpush3.msra.mxu0 %v617_v37 }
 0x730   : > { %1822 = vmatprep.subr.mxu0 %v1930_v7 }
 0x732   : > { %v1419_v33 = vpop.f32.mrb[14].mxu1 }
 0x733   : > { %v1423_v34 = vmul.f32 0.35355338, %v1419_v33  ;;  %v1831_v35 = vpop.f32.mrb[15].mxu1 }
 0x735   : > { %v1424_v36 = vsel %vm628_vm2, %v1423_v34, -inf }
 0x736   : > { %1425 = vmax.xlane.f32.xlu1 %v1424_v36 }
 0x7c3   : > { %v1426_v38 = vpop.xlane.xlu1 %1425 }
 0x7c4   : > { %v1427_v39 = vsub.f32 %v1423_v34, %v1426_v38 }
 0x7c6   : > { %v1428_v40 = vmul.f32 1.442695, %v1427_v39 }
 0x7c8   : > { %1914 = vpow2.f32 %v1428_v40 }
 0x7d2   : > { %v1915_v41 = vpop.eup %1914 }
 0x7d3   : > { %v1430_v42 = vsel %vm628_vm2, %v1915_v41, 0.0 }
 0x7d4   : > { %1431 = vadd.xlane.f32.xlu1 %v1430_v42 }
 0x7e5   : > { %1435 = vrot.lane.b32.xlu1 %v2078_v53, %s1935_s18  ;;  %v1689_v53 = vld [vmem:[%s2180_s7] ss:$0 sm:$0xff] }
 0x7e6   : > { %v627_v54 = vadd.f32 %v1689_v53, %v2028_v12 }
 0x7e8   : > { %v863_v55 = vadd.f32 %v2102_v63, %v627_v54  ;;  %v1706_v63 = vld [vmem:[%s2181_s8] ss:$0 sm:$0xff] }
 0x801   : > { %v1027_v44 = vpop.f32.mrb[4].mxu0 }
 0x802   : > { %v1806_v45 = vpop.f32.mrb[5].mxu0  ;;  %1810 = vmatmul.mubr.msk.f32.vlgmr.msra.gmra.mrb[6].mxu0 %vm628_vm2, %v1027_v44 }
 0x803   : > { %1823 = vmatpush3.msra.mxu0 %v618_v43  ;;  %1824 = vmatprep.mubr.msk.f32.mxu0 %vm1929_vm0, %v1930_v7 }
 0x804   : > { %1832 = vmatprep.subr.mxu0 %v1930_v7 }
 0x80a   : > { %1825 = vmatmul.mubr.msk.f32.vlgmr.msra.gmra.mrb[6].mxu0 %vm628_vm2, %v1267_v31 }
 0x80b   : > { %1834 = vmatprep.mubr.msk.f32.mxu0 %vm1929_vm0, %v1930_v7 }
 0x861   : > { %v1432_v46 = vpop.xlane.xlu1 %1431 }
 0x862   : > { %1916 = vrcp.f32 %v1432_v46 }
 0x865   : > { %v1436_v47 = vpop.permute.xlu1 %1435 }
 0x866   : > { %1833 = vmatpush3.msra.mxu0 %v1436_v47 }
 0x867   : > { %1837 = vmatprep.subr.mxu0 %v1930_v7 }
 0x86c   : > { %v1917_v48 = vpop.eup %1916 }
 0x86d   : > { %v1434_v49 = vmul.f32 %v1917_v48, %v1915_v41 }
 0x86f   : > { %1835 = vmatmul.mubr.msk.f32.vlgmr.msra.gmra.mrb[8].mxu0 %vm628_vm2, %v1434_v49 }
 0x870   : > { %1838 = vmatpush3.msra.mxu0 %v619_v50  ;;  %1839 = vmatprep.mubr.msk.f32.mxu0 %vm1929_vm0, %v1930_v7 }
 0x942   : > { %v1507_v51 = vpop.f32.mrb[8].mxu0 }
 0x943   : > { %v1836_v52 = vpop.f32.mrb[9].mxu0  ;;  %1840 = vmatmul.mubr.msk.f32.vlgmr.msra.gmra.mrb[6].mxu0 %vm628_vm2, %v1507_v51 }
 0xa16   : > { %v1580_v56 = vpop.f32.mrb[6].mxu0 }
 0xa17   : > { %v1861_v57 = vadd.f32 %v1580_v56, %v863_v55  ;;  %v1841_v58 = vpop.f32.mrb[7].mxu0 }
 0xa19   : > { %v1585_v59 = vsel %vm362_vm1, %v1861_v57, 0.0 }
 0xa1a   : > { %1586 = vadd.xlane.f32.xlu0 %v1585_v59 }
 0xaa7   : > { %v1587_v7 = vpop.xlane.xlu0 %1586 }
 0xaa8   : > { %v1589_v60 = vmul.f32 0.03125, %v1587_v7 }
 0xaaa   : > { %v1590_v61 = vsub.f32 %v1861_v57, %v1589_v60 }
 0xaac   : > { %v1591_v62 = vmul.f32 %v1590_v61, %v1590_v61 }
 0xaae   : > { %v1592_v0 = vsel %vm362_vm1, %v1591_v62, 0.0 }
 0xaaf   : > { %1593 = vadd.xlane.f32.xlu1 %v1592_v0 }
 0xb3c   : > { %v1594_v1 = vpop.xlane.xlu1 %1593 }
 0xb3d   : > { %v1595_v2 = vmul.f32 0.03125, %v1594_v1 }
 0xb3f   : > { %v1596_v3 = vadd.f32 1e-05, %v1595_v2 }
 0xb41   : > { %1918 = vrsqrt.f32 %v1596_v3 }
 0xb4b   : > { %v1919_v12 = vpop.eup %1918 }
 0xb4c   : > { %v1598_v4 = vmul.f32 %v1919_v12, %v1590_v61 }
 0xb4e   : > { %v1604_v6 = vmul.f32 %v1706_v63, %v1598_v4 }
 0xb50   : > { %v1610_v8 = vadd.f32 %v1707_v5, %v1604_v6 }
 0xb52   : > { %1611 = vst.msk [vmem:[%s344_s14] sm:$0xff] %vm362_vm1, %v1610_v8 }
 0xb53 PF: > { %s19_s30 = sadd.s32 1, %s1926_s30  }
 0xb54   : > { %p16_p4 = scmp.ge.s32.totalorder %s19_s30, 4  }
 0xb56   :  { %18 = sbr.rel (!%p16_p4) target bundleno = 1 (0x1), region = 89 }

// kernel: detr_forward.15
= control target key start
LH: loop header
LB: loop body
LE: loop exit
PB: predicated region body
PF: predicated region fallthrough
CT: control target
= control target key end

     0   :  { %s641_s21 = smov 0   ;;  %s717_s0 = inlined_call_operand.vmem [shape: f32[16,32], index: 0, kind: input, shape index: {}]   ;;  %s718_s1 = inlined_call_operand.vmem [shape: f32[32,64], index: 1, kind: input, shape index: {}]   ;;  %s719_s2 = inlined_call_operand.vmem [shape: f32[1,64], index: 2, kind: input, shape index: {}]   ;;  %s720_s3 = inlined_call_operand.vmem [shape: f32[64,32], index: 3, kind: input, shape index: {}]   ;;  %s721_s4 = inlined_call_operand.vmem [shape: f32[1,32], index: 4, kind: input, shape index: {}]   ;;  %s722_s5 = inlined_call_operand.vmem [shape: f32[2,32], index: 5, kind: input, shape index: {}]   ;;  %s723_s6 = inlined_call_operand.vmem [shape: f32[16,32], index: 6, kind: output, shape index: {}]  }
   0x1 LB: > { %s505_s22 = sadd.s32 4294967295, %s601_s21   ;;  %p509_p0 = scmp.ge.s32.totalorder %s601_s21, 1  ;;  %s601_s21 = sphi %s641_s21, %s16_s21  }
   0x2   : > { %p211_p1 = scmp.lt.s32.totalorder %s601_s21, 3 }
   0x4   : > { %p212_p2 = pnand %p509_p0, %p211_p1 }
   0x5   : > { %v248_v0 = vld [vmem:[%s718_s1] sm:$0xff] (!%p212_p2)  ;;  %v249_v1 = vld [vmem:[%s718_s1 + $0x8] sm:$0xff] (!%p212_p2)  ;;  %v250_v2 = vld [vmem:[%s718_s1 + $0x10] sm:$0xff] (!%p212_p2)  ;;  %v603_v3 = vmov (!%p212_p2), 0.0|0.0   ;;  %vm604_vm0 = vmmov (!%p212_p2), 0   ;;  %v605_v6 = vmov (!%p212_p2), 0.0  }
   0x6   : > { %215 = sbr.rel (%p212_p2) target bundleno = 763 (0x2fb), region = 44  ;;  %564 = vmatprep.subr.bf16.mxu0 (!%p212_p2), %v603_v3  ;;  %v565_v4 = vpack.c.bf16 (!%p212_p2), %v249_v1, %v248_v0  ;;  %v251_v5 = vld [vmem:[%s718_s1 + $0x18] sm:$0xff] (!%p212_p2)  ;;  %542 = vmatprep.mubr.msk.f32.mxu0 (!%p212_p2), %vm604_vm0, %v605_v6  ;;  %p239_p3 = scmp.lt.s32.totalorder (!%p212_p2), %s505_s22, 1  ;;  %v334_v7 = vld [vmem:[%s720_s3] sm:$0xff] (!%p212_p2)  ;;  %v335_v8 = vld [vmem:[%s720_s3 + $0x8] sm:$0xff] (!%p212_p2)  ;;  %vm259_vm1 = vcmask (!%p212_p2), 261120  }
   0x7   : > { %570 = vmatprep.subr.bf16.mxu1 (!%p212_p2), %v603_v3  ;;  %v571_v9 = vpack.c.bf16 (!%p212_p2), %v335_v8, %v334_v7  ;;  %v336_v10 = vld [vmem:[%s720_s3 + $0x10] sm:$0xff] (!%p212_p2)  ;;  %v337_v11 = vld [vmem:[%s720_s3 + $0x18] sm:$0xff] (!%p212_p2)  ;;  %561 = vmatprep.mubr.msk.f32.mxu1 (!%p212_p2), %vm604_vm0, %v605_v6  ;;  %v568_v12 = vpack.c.bf16 (!%p212_p2), %v251_v5, %v250_v2  ;;  %v338_v14 = vld [vmem:[%s720_s3 + $0x20] sm:$0xff] (!%p212_p2)  ;;  %vm342_vm2 = vcmask (!%p212_p2), 523264  }
   0x8   : > { %566 = vmatpush3.bf16.msra.mxu0 (!%p212_p2), %v565_v4  ;;  %v574_v13 = vpack.c.bf16 (!%p212_p2), %v337_v11, %v336_v10  ;;  %v339_v15 = vld [vmem:[%s720_s3 + $0x28] sm:$0xff] (!%p212_p2)  ;;  %v340_v18 = vld [vmem:[%s720_s3 + $0x30] sm:$0xff] (!%p212_p2)  ;;  %v341_v19 = vld [vmem:[%s720_s3 + $0x38] sm:$0xff] (!%p212_p2) }
   0x9   : > { %567 = vmatprep.subr.bf16.mxu0 (!%p212_p2), %v603_v3  ;;  %572 = vmatpush3.bf16.msra.mxu1 (!%p212_p2), %v571_v9  ;;  %v577_v17 = vpack.c.bf16 (!%p212_p2), %v339_v15, %v338_v14  ;;  %v580_v20 = vpack.c.bf16 (!%p212_p2), %v341_v19, %v340_v18  ;;  %v512_v21 = vld [vmem:[%s719_s2] ss:$0 sm:$0xff] (!%p212_p2)  ;;  %v517_v43 = vld [vmem:[%s722_s5 + $0x1] ss:$0 sm:$0xff] (!%p212_p2) }
   0xa   : > { %573 = vmatprep.subr.bf16.mxu1 (!%p212_p2), %v603_v3  ;;  %v515_v27 = vld [vmem:[%s721_s4] ss:$0 sm:$0xff] (!%p212_p2) }
   0xb   : > { %v516_v41 = vld [vmem:[%s722_s5] ss:$0 sm:$0xff] (!%p212_p2) }
   0xc   : > { %569 = vmatpush3.bf16.msra.mxu0 (!%p212_p2), %v568_v12 }
   0xd   : > { %s725_s22 = smov (!%p239_p3, %s505_s22), 1  ;;  %575 = vmatpush3.bf16.msra.mxu1 %v574_v13 }
   0xe   : > { %s510_s15 = sshll.u32 %s725_s22, 3  ;;  %576 = vmatprep.subr.bf16.mxu1 %v603_v3 }
   0xf   : > { %s242_s24 = scalar_lea.vmem %s717_s0, %s510_s15  ;;  %s246_s16 = scalar_lea.vmem %s723_s6, %s510_s15 }
  0x10   : > { %v247_v16 = vld [vmem:[%s242_s24] sm:$0xff] }
  0x11   : > { %543 = vmatmul.mubr.msk.f32.vlgmr.msra.gmra.mrb[0].mxu0 %vm259_vm1, %v247_v16  ;;  %578 = vmatpush3.bf16.msra.mxu1 %v577_v17 }
  0x12   : > { %579 = vmatprep.subr.bf16.mxu1 %v603_v3 }
  0x15   : > { %581 = vmatpush3.bf16.msra.mxu1 %v580_v20 }
  0xe4   : > { %v329_v22 = vpop.f32.mrb[0].mxu0 }
  0xe5   : > { %v330_v23 = vadd.f32 %v512_v21, %v329_v22  ;;  %v544_v24 = vpop.f32.mrb[1].mxu0 }
  0xe7   : > { %v333_v25 = vmax.f32 %v330_v23, 0.0 }
  0xe9   : > { %562 = vmatmul.mubr.msk.f32.vlgmr.msra.gmra.mrb[0].mxu1 %vm342_vm2, %v333_v25 }
 0x1bc   : > { %v412_v26 = vpop.f32.mrb[0].mxu1 }
 0x1bd   : > { %v416_v28 = vadd.f32 %v412_v26, %v247_v16  ;;  %v563_v29 = vpop.f32.mrb[1].mxu1 }
 0x1bf   : > { %v424_v30 = vadd.f32 %v515_v27, %v416_v28 }
 0x1c1   : > { %v425_v31 = vsel %vm259_vm1, %v424_v30, 0.0 }
 0x1c2   : > { %426 = vadd.xlane.f32.xlu0 %v425_v31 }
 0x24f   : > { %v427_v32 = vpop.xlane.xlu0 %426 }
 0x250   : > { %v429_v33 = vmul.f32 0.03125, %v427_v32 }
 0x252   : > { %v430_v34 = vsub.f32 %v424_v30, %v429_v33 }
 0x254   : > { %v431_v35 = vmul.f32 %v430_v34, %v430_v34 }
 0x256   : > { %v432_v36 = vsel %vm259_vm1, %v431_v35, 0.0 }
 0x257   : > { %433 = vadd.xlane.f32.xlu0 %v432_v36 }
 0x2e4   : > { %v434_v37 = vpop.xlane.xlu0 %433 }
 0x2e5   : > { %v435_v38 = vmul.f32 0.03125, %v434_v37 }
 0x2e7   : > { %v436_v39 = vadd.f32 1e-05, %v435_v38 }
 0x2e9   : > { %593 = vrsqrt.f32 %v436_v39 }
 0x2f3   : > { %v594_v40 = vpop.eup %593 }
 0x2f4   : > { %v438_v42 = vmul.f32 %v594_v40, %v430_v34 }
 0x2f6   : > { %v444_v44 = vmul.f32 %v516_v41, %v438_v42 }
 0x2f8   : > { %v450_v45 = vadd.f32 %v517_v43, %v444_v44 }
 0x2fa   : > { %451 = vst.msk [vmem:[%s246_s16] sm:$0xff] %vm259_vm1, %v450_v45 }
 0x2fb PF: > { %s16_s21 = sadd.s32 1, %s601_s21  }
 0x2fc   : > { %p13_p4 = scmp.ge.s32.totalorder %s16_s21, 4  }
 0x2fe   :  { %15 = sbr.rel (!%p13_p4) target bundleno = 1 (0x1), region = 74 }

// kernel: detr_forward.11
= control target key start
LH: loop header
LB: loop body
LE: loop exit
PB: predicated region body
PF: predicated region fallthrough
CT: control target
= control target key end

     0   :  { %s4549_s30 = smov 0   ;;  %s5452_s0 = inlined_call_operand.vmem [shape: f32[2,64,32], index: 0, kind: input, shape index: {}, may-alias: {0,2}]   ;;  %s5453_s1 = inlined_call_operand.vmem [shape: f32[1,64,32], index: 1, kind: input, shape index: {}, may-alias: {1,3}]   ;;  %s5454_s2 = inlined_call_operand.vmem [shape: f32[2,64,32], index: 2, kind: input, shape index: {}, may-alias: {0,2}]   ;;  %s5455_s3 = inlined_call_operand.vmem [shape: f32[1,64,32], index: 3, kind: input, shape index: {}, may-alias: {1,3}]   ;;  %s5456_s4 = inlined_call_operand.vmem [shape: f32[32,96], index: 4, kind: input, shape index: {}]   ;;  %s5457_s5 = inlined_call_operand.vmem [shape: f32[1,96], index: 5, kind: input, shape index: {}]   ;;  %s5458_s6 = inlined_call_operand.vmem [shape: f32[32,32], index: 6, kind: input, shape index: {}]   ;;  %s5459_s7 = inlined_call_operand.vmem [shape: f32[1,32], index: 7, kind: input, shape index: {}]   ;;  %s5460_s8 = inlined_call_operand.vmem [shape: f32[2,32], index: 8, kind: input, shape index: {}]   ;;  %s5461_s9 = inlined_call_operand.vmem [shape: f32[2,64,32], index: 9, kind: output, shape index: {}]  }
   0x1 LB: > { %s3249_s10 = sadd.s32 4294967295, %s4492_s30   ;;  %p3253_p0 = scmp.ge.s32.totalorder %s4492_s30, 1  ;;  %s4492_s30 = sphi %s4549_s30, %s19_s30  }
   0x2   : > { %p297_p1 = scmp.lt.s32.totalorder %s4492_s30, 3 }
   0x4   : > { %p298_p2 = pnand %p3253_p0, %p297_p1 }
   0x5   : > { %v401_v0 = vld [vmem:[%s5456_s4] sm:$0xff] (!%p298_p2)  ;;  %v402_v1 = vld [vmem:[%s5456_s4 + $0x8] sm:$0xff] (!%p298_p2)  ;;  %v403_v2 = vld [vmem:[%s5456_s4 + $0x10] sm:$0xff] (!%p298_p2)  ;;  %p338_p3 = scmp.lt.s32.totalorder (!%p298_p2), %s3249_s10, 1  ;;  %s4494_s19 = smov (!%p298_p2), 96   ;;  %vm412_vm0 = vcmask (!%p298_p2), 261120  }
   0x6   : > { %301 = sbr.rel (%p298_p2) target bundleno = 2506 (0x9ca), region = 56  ;;  %v4566_v3 = vpack.i.bf16 (!%p298_p2), %v402_v1, %v401_v0  ;;  %v3961_v4 = vpack.c.bf16 (!%p298_p2), %v402_v1, %v401_v0  ;;  %v404_v5 = vld [vmem:[%s5456_s4 + $0x18] sm:$0xff] (!%p298_p2)  ;;  %v373_v8 = vld [vmem:[%s5453_s1 + $0x20] sm:$0xff] (!%p298_p2)  ;;  %v374_v9 = vld [vmem:[%s5453_s1 + $0x28] sm:$0xff] (!%p298_p2)  ;;  %s4495_s26 = smov (!%p298_p2), 64   ;;  %vm853_vm1 = vcmask (!%p298_p2), 64512  }
   0x7   : > { %v3965_v6 = vpack.c.bf16 (!%p298_p2), %v404_v5, %v403_v2  ;;  %v4573_v7 = vpack.i.bf16 (!%p298_p2), %v404_v5, %v403_v2  ;;  %v375_v10 = vld [vmem:[%s5453_s1 + $0x30] sm:$0xff] (!%p298_p2)  ;;  %v376_v18 = vld [vmem:[%s5453_s1 + $0x38] sm:$0xff] (!%p298_p2)  ;;  %v385_v20 = vld [vmem:[%s5455_s3] sm:$0xff] (!%p298_p2)  ;;  %vm1015_vm3 = vcmask (!%p298_p2), 523264   ;;  %s4497_s28 = smov (!%p298_p2), 112   ;;  %s4498_s11 = smov (!%p298_p2), 104  }
   0x8   : > { %4195 = vrot.lane.b32.xlu0 (!%p298_p2), %v4566_v3, %s4494_s19  ;;  %4145 = vmatprep.subr.bf16.mxu1 (!%p298_p2), %v3961_v4  ;;  %v369_v24 = vld [vmem:[%s5453_s1] sm:$0xff] (!%p298_p2)  ;;  %v370_v27 = vld [vmem:[%s5453_s1 + $0x8] sm:$0xff] (!%p298_p2)  ;;  %v371_v30 = vld [vmem:[%s5453_s1 + $0x10] sm:$0xff] (!%p298_p2) }
   0x9   : > { %4147 = vmatpush3.bf16.msra.mxu1 (!%p298_p2), %v3961_v4  ;;  %3962 = vmatprep.subr.bf16.mxu0 (!%p298_p2), %v3961_v4  ;;  %v372_v33 = vld [vmem:[%s5453_s1 + $0x18] sm:$0xff] (!%p298_p2)  ;;  %v4635_v34 = vld [vmem:[%s5457_s5] ss:$0 sm:$0xff] (!%p298_p2)  ;;  %v386_v44 = vld [vmem:[%s5455_s3 + $0x8] sm:$0xff] (!%p298_p2) }
   0xa   : > { %4146 = vmatprep.subr.bf16.mxu1 (!%p298_p2), %v3965_v6  ;;  %3964 = vmatpush3.bf16.msra.mxu0 (!%p298_p2), %v3961_v4  ;;  %v387_v47 = vld [vmem:[%s5455_s3 + $0x10] sm:$0xff] (!%p298_p2)  ;;  %v388_v51 = vld [vmem:[%s5455_s3 + $0x18] sm:$0xff] (!%p298_p2)  ;;  %v389_v53 = vld [vmem:[%s5455_s3 + $0x20] sm:$0xff] (!%p298_p2) }
   0xb   : > { %3966 = vmatprep.subr.bf16.mxu0 (!%p298_p2), %v3965_v6  ;;  %558 = vrot.lane.b32.xlu1 (!%p298_p2), %v4635_v34, %s4494_s19  ;;  %v390_v57 = vld [vmem:[%s5455_s3 + $0x28] sm:$0xff] (!%p298_p2)  ;;  %v391_v59 = vld [vmem:[%s5455_s3 + $0x30] sm:$0xff] (!%p298_p2)  ;;  %v392_v63 = vld [vmem:[%s5455_s3 + $0x38] sm:$0xff] (!%p298_p2) }
   0xc   : > { %4200 = vrot.lane.b32.xlu0 (!%p298_p2), %v4573_v7, %s4494_s19  ;;  %vm4711_vm2 = vmpackc.low (!%p298_p2), %vm853_vm1, %vm853_vm1 }
   0xd   : > { %s5465_s10 = smov (!%p338_p3, %s3249_s10), 1  ;;  %4148 = vmatpush3.bf16.msra.mxu1 %v3965_v6 }
   0xe   : > { %s4575_s20 = sshll.u32 %s5465_s10, 6  ;;  %3968 = vmatpush3.bf16.msra.mxu0 %v3965_v6 }
   0xf   : > { %s4587_s27 = scalar_lea.vmem %s5452_s0, %s4575_s20  ;;  %s4596_s12 = scalar_lea.vmem %s5454_s2, %s4575_s20  ;;  %4205 = vrot.lane.b32.xlu1 %v4566_v3, %s4495_s26 }
  0x10   : > { %v357_v11 = vld [vmem:[%s4587_s27 + $0x20] sm:$0xff]  ;;  %v358_v12 = vld [vmem:[%s4587_s27 + $0x28] sm:$0xff]  ;;  %v359_v13 = vld [vmem:[%s4587_s27 + $0x30] sm:$0xff]  ;;  %4210 = vrot.lane.b32.xlu0 %v4573_v7, %s4495_s26 }
  0x11   : > { %v381_v14 = vadd.f32 %v373_v8, %v357_v11  ;;  %v382_v15 = vadd.f32 %v374_v9, %v358_v12  ;;  %v383_v16 = vadd.f32 %v375_v10, %v359_v13  ;;  %v360_v17 = vld [vmem:[%s4587_s27 + $0x38] sm:$0xff]  ;;  %v361_v19 = vld [vmem:[%s4596_s12] sm:$0xff]  ;;  %v354_v26 = vld [vmem:[%s4587_s27 + $0x8] sm:$0xff] }
  0x12   : > { %v384_v21 = vadd.f32 %v376_v18, %v360_v17  ;;  %v393_v22 = vadd.f32 %v385_v20, %v361_v19  ;;  %v353_v23 = vld [vmem:[%s4587_s27] sm:$0xff]  ;;  %v378_v28 = vadd.f32 %v370_v27, %v354_v26  ;;  %v355_v29 = vld [vmem:[%s4587_s27 + $0x10] sm:$0xff]  ;;  %v356_v31 = vld [vmem:[%s4587_s27 + $0x18] sm:$0xff] }
  0x13   : > { %3635 = vmatprep.mubr.msk.f32.mxu1 %vm412_vm0, %v381_v14  ;;  %v377_v25 = vadd.f32 %v369_v24, %v353_v23  ;;  %v379_v32 = vadd.f32 %v371_v30, %v355_v29  ;;  %v380_v35 = vadd.f32 %v372_v33, %v356_v31  ;;  %v4645_v43 = vld [vmem:[%s4596_s12 + $0x8] sm:$0xff]  ;;  %v4651_v46 = vld [vmem:[%s4596_s12 + $0x10] sm:$0xff]  ;;  %v4659_v50 = vld [vmem:[%s4596_s12 + $0x18] sm:$0xff] }
  0x14   : > { %3636 = vmatmul.mubr.msk.f32.vlgmr.msra.gmra.mrb[0].mxu1 %vm412_vm0, %v382_v15  ;;  %v394_v48 = vadd.f32 %v386_v44, %v4645_v43  ;;  %v395_v49 = vadd.f32 %v387_v47, %v4651_v46  ;;  %v4665_v52 = vld [vmem:[%s4596_s12 + $0x20] sm:$0xff]  ;;  %v396_v54 = vadd.f32 %v388_v51, %v4659_v50  ;;  %v4675_v56 = vld [vmem:[%s4596_s12 + $0x28] sm:$0xff]  ;;  %v4681_v58 = vld [vmem:[%s4596_s12 + $0x30] sm:$0xff] }
  0x15   : > { %3638 = vmatprep.mubr.msk.f32.mxu1 %vm412_vm0, %v383_v16  ;;  %3629 = vmatprep.mubr.msk.f32.mxu0 %vm412_vm0, %v377_v25  ;;  %v397_v55 = vadd.f32 %v389_v53, %v4665_v52  ;;  %v398_v60 = vadd.f32 %v390_v57, %v4675_v56  ;;  %v399_v61 = vadd.f32 %v391_v59, %v4681_v58  ;;  %v4691_v62 = vld [vmem:[%s4596_s12 + $0x38] sm:$0xff]  ;;  %s4496_s12 = smov 120  }
  0x16   : > { %3630 = vmatmul.mubr.msk.f32.vlgmr.msra.gmra.mrb[0].mxu0 %vm412_vm0, %v378_v28  ;;  %v400_v0 = vadd.f32 %v392_v63, %v4691_v62 }
  0x17   : > { %3632 = vmatprep.mubr.msk.f32.mxu0 %vm412_vm0, %v379_v32 }
  0x18   : > { %3639 = vmatmul.mubr.msk.f32.gmra.mrb[2].mxu1 %vm412_vm0, %v384_v21 }
  0x19   : > { %3649 = vmatprep.mubr.msk.f32.mxu1 %vm412_vm0, %v393_v22 }
  0x1a   : > { %3633 = vmatmul.mubr.msk.f32.gmra.mrb[2].mxu0 %vm412_vm0, %v380_v35 }
  0x1b   : > { %3669 = vmatprep.mubr.msk.f32.mxu0 %vm412_vm0, %v361_v19 }
  0x7a   : > { %v4196_v36 = vpop.permute.xlu0 %4195 }
  0x7b   : > { %v4198_v37 = vunpack.i.h.bf16 %v4196_v36  ;;  %v4197_v38 = vunpack.i.l.bf16 %v4196_v36 }
  0x7d   : > { %v3969_v39 = vpack.c.bf16 %v4198_v37, %v4197_v38  ;;  %v559_v12 = vpop.permute.xlu1 %558 }
  0x7e   : > { %v4201_v40 = vpop.permute.xlu0 %4200 }
  0x7f   : > { %v4203_v41 = vunpack.i.h.bf16 %v4201_v40  ;;  %v4202_v42 = vunpack.i.l.bf16 %v4201_v40  ;;  %3970 = vmatprep.subr.bf16.mxu1 %v3969_v39 }
  0x80   : > { %3972 = vmatpush3.bf16.msra.mxu1 %v3969_v39 }
  0x81   : > { %v3973_v45 = vpack.c.bf16 %v4203_v41, %v4202_v42 }
  0x82   : > { %v4211_v51 = vpop.permute.xlu0 %4210 }
  0x83   : > { %3974 = vmatprep.subr.bf16.mxu1 %v3973_v45  ;;  %v4213_v53 = vunpack.i.h.bf16 %v4211_v51 }
  0x84   : > { %3976 = vmatpush3.bf16.msra.mxu1 %v3973_v45  ;;  %v4206_v45 = vpop.permute.xlu1 %4205 }
  0x85   : > { %v4208_v47 = vunpack.i.h.bf16 %v4206_v45 }
  0x87   : > { %3650 = vmatmul.mubr.msk.f32.vlgmr.msra.gmra.mrb[4].mxu1 %vm412_vm0, %v394_v48  ;;  %v4207_v48 = vunpack.i.l.bf16 %v4206_v45 }
  0x88   : > { %3652 = vmatprep.mubr.msk.f32.mxu1 %vm412_vm0, %v395_v49 }
  0x89   : > { %v3977_v49 = vpack.c.bf16 %v4208_v47, %v4207_v48 }
  0x8b   : > { %3653 = vmatmul.mubr.msk.f32.gmra.mrb[6].mxu1 %vm412_vm0, %v396_v54  ;;  %3978 = vmatprep.subr.bf16.mxu0 %v3977_v49  ;;  %v4212_v54 = vunpack.i.l.bf16 %v4211_v51 }
  0x8c   : > { %3655 = vmatprep.mubr.msk.f32.mxu1 %vm412_vm0, %v397_v55  ;;  %3980 = vmatpush3.bf16.msra.mxu0 %v3977_v49 }
  0x8f   : > { %3656 = vmatmul.mubr.msk.f32.gmra.mrb[8].mxu1 %vm412_vm0, %v398_v60  ;;  %v3981_v60 = vpack.c.bf16 %v4213_v53, %v4212_v54 }
  0x90   : > { %3658 = vmatprep.mubr.msk.f32.mxu1 %vm412_vm0, %v399_v61 }
  0x91   : > { %3982 = vmatprep.subr.bf16.mxu0 %v3981_v60 }
  0x92   : > { %3984 = vmatpush3.bf16.msra.mxu0 %v3981_v60 }
  0x93   : > { %3659 = vmatmul.mubr.msk.f32.gmra.mrb[10].mxu1 %vm412_vm0, %v400_v0 }
  0x95   : > { %3670 = vmatmul.mubr.msk.f32.vlgmr.msra.gmra.mrb[4].mxu0 %vm412_vm0, %v4645_v43 }
  0x96   : > { %3672 = vmatprep.mubr.msk.f32.mxu0 %vm412_vm0, %v4651_v46 }
  0x99   : > { %3673 = vmatmul.mubr.msk.f32.gmra.mrb[6].mxu0 %vm412_vm0, %v4659_v50 }
  0x9a   : > { %3675 = vmatprep.mubr.msk.f32.mxu0 %vm412_vm0, %v4665_v52 }
  0x9d   : > { %3676 = vmatmul.mubr.msk.f32.gmra.mrb[8].mxu0 %vm412_vm0, %v4675_v56 }
  0x9e   : > { %3678 = vmatprep.mubr.msk.f32.mxu0 %vm412_vm0, %v4681_v58 }
  0xa1   : > { %3679 = vmatmul.mubr.msk.f32.gmra.mrb[10].mxu0 %vm412_vm0, %v4691_v62 }
  0xe7   : > { %v3637_v1 = vpop.f32.mrb[0].mxu1 }
  0xe8   : > { %v523_v2 = vpop.f32.mrb[1].mxu1  ;;  %v4768_v41 = vadd.f32 %v3637_v1, %v4635_v34 }
  0xe9   : > { %v3631_v6 = vpop.f32.mrb[0].mxu0  ;;  %v4759_v40 = vadd.f32 %v4635_v34, %v523_v2 }
  0xea   : > { %v503_v8 = vpop.f32.mrb[1].mxu0  ;;  %v4740_v37 = vadd.f32 %v3631_v6, %v4635_v34 }
  0xeb   : > { %v3640_v4 = vpop.f32.mrb[2].mxu1  ;;  %v4705_v9 = vadd.f32 %v4635_v34, %v503_v8 }
  0xec   : > { %v533_v5 = vpop.f32.mrb[3].mxu1  ;;  %v4780_v44 = vadd.f32 %v3640_v4, %v4635_v34 }
  0xed   : > { %v3634_v10 = vpop.f32.mrb[2].mxu0  ;;  %3697 = vmatprep.mubr.msk.f32.mxu1 %vm853_vm1, %v4705_v9  ;;  %v4771_v42 = vadd.f32 %v4635_v34, %v533_v5 }
  0xee   : > { %v513_v11 = vpop.f32.mrb[3].mxu0  ;;  %v4750_v39 = vadd.f32 %v3634_v10, %v4635_v34 }
  0xef   : > { %v4747_v38 = vadd.f32 %v4635_v34, %v513_v11 }
 0x15a   : > { %v3651_v3 = vpop.f32.mrb[4].mxu1 }
 0x15b   : > { %v657_v13 = vadd.f32 %v3651_v3, %v559_v12  ;;  %v651_v14 = vpop.f32.mrb[5].mxu1 }
 0x15c   : > { %v652_v7 = vadd.f32 %v651_v14, %v559_v12 }
 0x15e   : > { %v3654_v16 = vpop.f32.mrb[6].mxu1  ;;  %v4715_v17 = vpack.i.bf16 %v657_v13, %v652_v7  ;;  %v3985_v18 = vpack.c.bf16 %v657_v13, %v652_v7 }
 0x15f   : > { %v667_v19 = vadd.f32 %v3654_v16, %v559_v12  ;;  %v661_v20 = vpop.f32.mrb[7].mxu1 }
 0x160   : > { %v662_v21 = vadd.f32 %v661_v20, %v559_v12  ;;  %4215 = vrot.lane.b32.xlu1 %v4715_v17, %s4496_s12  ;;  %3987 = vmatprep.subr.msk.bf16.mxu1 %vm4711_vm2, %v3985_v18 }
 0x161   : > { %3990 = vmatpush3.bf16.xpose.msk.msra.mxu1 %vm4711_vm2, %v3985_v18 }
 0x162   : > { %v3657_v22 = vpop.f32.mrb[8].mxu1  ;;  %v4723_v23 = vpack.i.bf16 %v667_v19, %v662_v21  ;;  %v3991_v24 = vpack.c.bf16 %v667_v19, %v662_v21 }
 0x163   : > { %v677_v25 = vadd.f32 %v3657_v22, %v559_v12  ;;  %v671_v26 = vpop.f32.mrb[9].mxu1 }
 0x164   : > { %v672_v27 = vadd.f32 %v671_v26, %v559_v12  ;;  %4220 = vrot.lane.b32.xlu0 %v4723_v23, %s4496_s12  ;;  %3993 = vmatprep.subr.msk.bf16.mxu1 %vm4711_vm2, %v3991_v24 }
 0x166   : > { %v3660_v28 = vpop.f32.mrb[10].mxu1  ;;  %v4729_v29 = vpack.i.bf16 %v677_v25, %v672_v27  ;;  %v3997_v30 = vpack.c.bf16 %v677_v25, %v672_v27 }
 0x167   : > { %v687_v31 = vadd.f32 %v3660_v28, %v559_v12  ;;  %v681_v32 = vpop.f32.mrb[11].mxu1 }
 0x168   : > { %v682_v33 = vadd.f32 %v681_v32, %v559_v12  ;;  %4225 = vrot.lane.b32.xlu1 %v4729_v29, %s4496_s12 }
 0x169   : > { %3996 = vmatpush3.bf16.xpose.msk.msra.mxu1 %vm4711_vm2, %v3991_v24 }
 0x16a   : > { %3999 = vmatprep.subr.msk.bf16.mxu1 %vm4711_vm2, %v3997_v30  ;;  %v4737_v35 = vpack.i.bf16 %v687_v31, %v682_v33  ;;  %v4003_v36 = vpack.c.bf16 %v687_v31, %v682_v33 }
 0x16c   : > { %4230 = vrot.lane.b32.xlu0 %v4737_v35, %s4496_s12  ;;  %1370 = vrot.lane.b32.xlu1 %v4705_v9, %s4496_s12 }
 0x170   : > { %1372 = vrot.lane.b32.xlu0 %v4740_v37, %s4496_s12  ;;  %1374 = vrot.lane.b32.xlu1 %v4747_v38, %s4496_s12 }
 0x171   : > { %4002 = vmatpush3.bf16.xpose.msk.msra.mxu1 %vm4711_vm2, %v3997_v30 }
 0x172   : > { %4005 = vmatprep.subr.msk.bf16.mxu1 %vm4711_vm2, %v4003_v36 }
 0x174   : > { %1376 = vrot.lane.b32.xlu0 %v4750_v39, %s4496_s12  ;;  %1378 = vrot.lane.b32.xlu1 %v4759_v40, %s4496_s12 }
 0x178   : > { %1380 = vrot.lane.b32.xlu0 %v4768_v41, %s4496_s12  ;;  %1382 = vrot.lane.b32.xlu1 %v4771_v42, %s4496_s12 }
 0x179   : > { %4008 = vmatpush3.bf16.xpose.msk.msra.mxu1 %vm4711_vm2, %v4003_v36 }
 0x17c   : > { %1384 = vrot.lane.b32.xlu0 %v4780_v44, %s4496_s12 }
 0x180   : > { %3698 = vmatmul.mubr.msk.f32.vlgmr.msra.gmra.mrb[12].mxu1 %vm853_vm1, %v4740_v37 }
 0x181   : > { %3700 = vmatprep.mubr.msk.f32.mxu1 %vm853_vm1, %v4747_v38 }
 0x184   : > { %3701 = vmatmul.mubr.msk.f32.gmra.mrb[14].mxu1 %vm853_vm1, %v4750_v39 }
 0x185   : > { %3703 = vmatprep.mubr.msk.f32.mxu1 %vm853_vm1, %v4759_v40 }
 0x188   : > { %3704 = vmatmul.mubr.msk.f32.gmra.mrb[16].mxu1 %vm853_vm1, %v4768_v41 }
 0x189   : > { %3706 = vmatprep.mubr.msk.f32.mxu1 %vm853_vm1, %v4771_v42 }
 0x18c   : > { %3707 = vmatmul.mubr.msk.f32.gmra.mrb[18].mxu1 %vm853_vm1, %v4780_v44 }
 0x1d2   : > { %v4216_v55 = vpop.permute.xlu1 %4215 }
 0x1d3   : > { %v4218_v57 = vunpack.i.h.bf16 %v4216_v55  ;;  %v4217_v59 = vunpack.i.l.bf16 %v4216_v55 }
 0x1d5   : > { %v4025_v61 = vpack.c.bf16 %v4218_v57, %v4217_v59 }
 0x1d6   : > { %v4221_v63 = vpop.permute.xlu0 %4220 }
 0x1d7   : > { %v4223_v0 = vunpack.i.h.bf16 %v4221_v63  ;;  %v4222_v1 = vunpack.i.l.bf16 %v4221_v63  ;;  %4027 = vmatprep.subr.msk.bf16.mxu1 %vm4711_vm2, %v4025_v61 }
 0x1d8   : > { %4030 = vmatpush3.bf16.xpose.msk.msra.mxu1 %vm4711_vm2, %v4025_v61 }
 0x1d9   : > { %v4031_v2 = vpack.c.bf16 %v4223_v0, %v4222_v1 }
 0x1da   : > { %v4226_v4 = vpop.permute.xlu1 %4225 }
 0x1db   : > { %v4228_v5 = vunpack.i.h.bf16 %v4226_v4  ;;  %v4227_v6 = vunpack.i.l.bf16 %v4226_v4  ;;  %4033 = vmatprep.subr.msk.bf16.mxu1 %vm4711_vm2, %v4031_v2 }
 0x1dd   : > { %v4037_v10 = vpack.c.bf16 %v4228_v5, %v4227_v6 }
 0x1de   : > { %v1371_v8 = vpop.permute.xlu1 %1370  ;;  %v4231_v11 = vpop.permute.xlu0 %4230 }
 0x1df   : > { %3767 = vmatprep.mubr.msk.f32.mxu1 %vm853_vm1, %v1371_v8  ;;  %v4233_v43 = vunpack.i.h.bf16 %v4231_v11  ;;  %v4232_v46 = vunpack.i.l.bf16 %v4231_v11 }
 0x1e0   : > { %4036 = vmatpush3.bf16.xpose.msk.msra.mxu1 %vm4711_vm2, %v4031_v2 }
 0x1e1   : > { %4039 = vmatprep.subr.msk.bf16.mxu1 %vm4711_vm2, %v4037_v10  ;;  %v4043_v50 = vpack.c.bf16 %v4233_v43, %v4232_v46 }
 0x1e2   : > { %v1373_v52 = vpop.permute.xlu0 %1372  ;;  %v1375_v56 = vpop.permute.xlu1 %1374 }
 0x1e6   : > { %v1377_v12 = vpop.permute.xlu0 %1376  ;;  %v1379_v58 = vpop.permute.xlu1 %1378 }
 0x1e8   : > { %4042 = vmatpush3.bf16.xpose.msk.msra.mxu1 %vm4711_vm2, %v4037_v10 }
 0x1e9   : > { %4045 = vmatprep.subr.msk.bf16.mxu1 %vm4711_vm2, %v4043_v50 }
 0x1ea   : > { %v1381_v62 = vpop.permute.xlu0 %1380  ;;  %v1383_v3 = vpop.permute.xlu1 %1382 }
 0x1ee   : > { %v1385_v13 = vpop.permute.xlu0 %1384 }
 0x1f0   : > { %4048 = vmatpush3.bf16.xpose.msk.msra.mxu1 %vm4711_vm2, %v4043_v50 }
 0x1f7   : > { %3768 = vmatmul.mubr.msk.f32.vlgmr.msra.gmra.mrb[20].mxu1 %vm853_vm1, %v1373_v52 }
 0x1f8   : > { %3770 = vmatprep.mubr.msk.f32.mxu1 %vm853_vm1, %v1375_v56 }
 0x1fb   : > { %3771 = vmatmul.mubr.msk.f32.gmra.mrb[22].mxu1 %vm853_vm1, %v1377_v12 }
 0x1fc   : > { %3773 = vmatprep.mubr.msk.f32.mxu1 %vm853_vm1, %v1379_v58 }
 0x1ff   : > { %3774 = vmatmul.mubr.msk.f32.gmra.mrb[24].mxu1 %vm853_vm1, %v1381_v62 }
 0x200   : > { %3776 = vmatprep.mubr.msk.f32.mxu1 %vm853_vm1, %v1383_v3 }
 0x203   : > { %3777 = vmatmul.mubr.msk.f32.gmra.mrb[26].mxu1 %vm853_vm1, %v1385_v13 }
 0x253   : > { %v3699_v14 = vpop.f32.mrb[12].mxu1 }
 0x254   : > { %v1008_v7 = vmul.f32 0.35355338, %v3699_v14  ;;  %v968_v16 = vpop.f32.mrb[13].mxu1 }
 0x255   : > { %v1007_v18 = vmul.f32 0.35355338, %v968_v16 }
 0x256   : > { %v1019_v19 = vsel %vm1015_vm3, %v1008_v7, -inf }
 0x257   : > { %1020 = vmax.xlane.f32.xlu0 %v1019_v19  ;;  %v3702_v20 = vpop.f32.mrb[14].mxu1  ;;  %v1016_v21 = vsel %vm1015_vm3, %v1007_v18, -inf }
 0x258   : > { %v1010_v22 = vmul.f32 0.35355338, %v3702_v20  ;;  %1017 = vmax.xlane.f32.xlu1 %v1016_v21  ;;  %v978_v24 = vpop.f32.mrb[15].mxu1 }
 0x259   : > { %v1009_v25 = vmul.f32 0.35355338, %v978_v24 }
 0x25a   : > { %v1025_v26 = vsel %vm1015_vm3, %v1010_v22, -inf }
 0x25b   : > { %v3705_v27 = vpop.f32.mrb[16].mxu1  ;;  %v1022_v28 = vsel %vm1015_vm3, %v1009_v25, -inf }
 0x25c   : > { %v1012_v30 = vmul.f32 0.35355338, %v3705_v27  ;;  %1026 = vmax.xlane.f32.xlu1 %v1025_v26  ;;  %1023 = vmax.xlane.f32.xlu0 %v1022_v28  ;;  %v988_v31 = vpop.f32.mrb[17].mxu1 }
 0x25d   : > { %v1011_v32 = vmul.f32 0.35355338, %v988_v31 }
 0x25e   : > { %v1031_v33 = vsel %vm1015_vm3, %v1012_v30, -inf }
 0x25f   : > { %v3708_v36 = vpop.f32.mrb[18].mxu1  ;;  %v1028_v45 = vsel %vm1015_vm3, %v1011_v32, -inf }
 0x260   : > { %v1014_v47 = vmul.f32 0.35355338, %v3708_v36  ;;  %1032 = vmax.xlane.f32.xlu1 %v1031_v33  ;;  %1029 = vmax.xlane.f32.xlu0 %v1028_v45  ;;  %v998_v48 = vpop.f32.mrb[19].mxu1 }
 0x261   : > { %v1013_v49 = vmul.f32 0.35355338, %v998_v48  ;;  %v3671_v48 = vpop.f32.mrb[4].mxu0 }
 0x262   : > { %v1037_v51 = vsel %vm1015_vm3, %v1014_v47, -inf }
 0x263   : > { %v1034_v53 = vsel %vm1015_vm3, %v1013_v49, -inf }
 0x264   : > { %1038 = vmax.xlane.f32.xlu1 %v1037_v51  ;;  %1035 = vmax.xlane.f32.xlu0 %v1034_v53  ;;  %v795_v51 = vpop.f32.mrb[5].mxu0 }
 0x265   : > { %v3674_v53 = vpop.f32.mrb[6].mxu0 }
 0x2ca   : > { %v4844_v54 = vpop.f32.mrb[20].mxu1 }
 0x2cb   : > { %v4846_v55 = vpop.f32.mrb[21].mxu1 }
 0x2ce   : > { %v4848_v57 = vpop.f32.mrb[22].mxu1 }
 0x2cf   : > { %v4850_v59 = vpop.f32.mrb[23].mxu1 }
 0x2d2   : > { %v4852_v60 = vpop.f32.mrb[24].mxu1 }
 0x2d3   : > { %v4854_v61 = vpop.f32.mrb[25].mxu1 }
 0x2d6   : > { %v4856_v63 = vpop.f32.mrb[26].mxu1 }
 0x2d7   : > { %v4858_v0 = vpop.f32.mrb[27].mxu1 }
 0x2e4   : > { %v1021_v1 = vpop.xlane.xlu0 %1020 }
 0x2e5   : > { %v1041_v2 = vsub.f32 %v1008_v7, %v1021_v1  ;;  %v1018_v4 = vpop.xlane.xlu1 %1017  ;;  %v805_v1 = vpop.f32.mrb[7].mxu0 }
 0x2e6   : > { %v1040_v5 = vsub.f32 %v1007_v18, %v1018_v4  ;;  %v3677_v4 = vpop.f32.mrb[8].mxu0 }
 0x2e7   : > { %v1050_v6 = vmul.f32 1.442695, %v1041_v2 }
 0x2e8   : > { %v1048_v8 = vmul.f32 1.442695, %v1040_v5  ;;  %v815_v5 = vpop.f32.mrb[9].mxu0 }
 0x2e9   : > { %4334 = vpow2.f32 %v1050_v6  ;;  %v1027_v10 = vpop.xlane.xlu1 %1026  ;;  %v1024_v11 = vpop.xlane.xlu0 %1023 }
 0x2ea   : > { %4336 = vpow2.f32 %v1048_v8  ;;  %v1043_v43 = vsub.f32 %v1010_v22, %v1027_v10  ;;  %v1042_v46 = vsub.f32 %v1009_v25, %v1024_v11  ;;  %v3680_v6 = vpop.f32.mrb[10].mxu0  ;;  %v4922_v10 = vmul.f32 0.35355338, %v4844_v54 }
 0x2eb   : > { %v825_v8 = vpop.f32.mrb[11].mxu0  ;;  %v4925_v11 = vmul.f32 0.35355338, %v4850_v59 }
 0x2ec   : > { %v1054_v50 = vmul.f32 1.442695, %v1043_v43  ;;  %v1052_v52 = vmul.f32 1.442695, %v1042_v46  ;;  %v4930_v46 = vmul.f32 0.35355338, %v4854_v61 }
 0x2ed   : > { %v1033_v56 = vpop.xlane.xlu1 %1032  ;;  %v1030_v12 = vpop.xlane.xlu0 %1029  ;;  %v1553_v54 = vsel %vm1015_vm3, %v4925_v11, -inf  ;;  %v4945_v61 = vmul.f32 0.35355338, %v4852_v60 }
 0x2ee   : > { %4338 = vpow2.f32 %v1054_v50  ;;  %v1045_v58 = vsub.f32 %v1012_v30, %v1033_v56  ;;  %v1044_v62 = vsub.f32 %v1011_v32, %v1030_v12  ;;  %v1550_v50 = vsel %vm1015_vm3, %v4922_v10, -inf }
 0x2ef   : > { %4340 = vpow2.f32 %v1052_v52  ;;  %v4935_v52 = vmul.f32 0.35355338, %v4848_v57  ;;  %v1559_v59 = vsel %vm1015_vm3, %v4930_v46, -inf  ;;  %v4952_v12 = vmul.f32 0.35355338, %v4856_v63 }
 0x2f0   : > { %v1058_v3 = vmul.f32 1.442695, %v1045_v58  ;;  %v1056_v13 = vmul.f32 1.442695, %v1044_v62 }
 0x2f1   : > { %v1039_v14 = vpop.xlane.xlu1 %1038  ;;  %v1036_v7 = vpop.xlane.xlu0 %1035  ;;  %v1556_v56 = vsel %vm1015_vm3, %v4935_v52, -inf  ;;  %v1568_v60 = vsel %vm1015_vm3, %v4952_v12, -inf }
 0x2f2   : > { %4342 = vpow2.f32 %v1058_v3  ;;  %v1046_v16 = vsub.f32 %v1013_v49, %v1036_v7  ;;  %v1047_v20 = vsub.f32 %v1014_v47, %v1039_v14 }
 0x2f3   : > { %v4860_v18 = vpop.eup %4334  ;;  %4344 = vpow2.f32 %v1056_v13 }
 0x2f4   : > { %v4862_v19 = vpop.eup %4336  ;;  %v1060_v21 = vmul.f32 1.442695, %v1046_v16  ;;  %v1067_v22 = vsel %vm1015_vm3, %v4860_v18, 0.0  ;;  %v1062_v26 = vmul.f32 1.442695, %v1047_v20 }
 0x2f5   : > { %1068 = vadd.xlane.f32.xlu1 %v1067_v22  ;;  %v1064_v24 = vsel %vm1015_vm3, %v4862_v19, 0.0 }
 0x2f6   : > { %1065 = vadd.xlane.f32.xlu0 %v1064_v24  ;;  %4346 = vpow2.f32 %v1060_v21 }
 0x2f7   : > { %4348 = vpow2.f32 %v1062_v26 }
 0x2f8   : > { %v4868_v25 = vpop.eup %4338 }
 0x2f9   : > { %v4870_v27 = vpop.eup %4340  ;;  %v1073_v28 = vsel %vm1015_vm3, %v4868_v25, 0.0 }
 0x2fa   : > { %1074 = vadd.xlane.f32.xlu1 %v1073_v28  ;;  %v1070_v30 = vsel %vm1015_vm3, %v4870_v27, 0.0 }
 0x2fb   : > { %1071 = vadd.xlane.f32.xlu0 %v1070_v30 }
 0x2fc   : > { %v4876_v31 = vpop.eup %4342 }
 0x2fd   : > { %v1079_v32 = vsel %vm1015_vm3, %v4876_v31, 0.0  ;;  %v4880_v33 = vpop.eup %4344 }
 0x2fe   : > { %1080 = vadd.xlane.f32.xlu1 %v1079_v32  ;;  %v1076_v36 = vsel %vm1015_vm3, %v4880_v33, 0.0 }
 0x300   : > { %v4884_v45 = vpop.eup %4346 }
 0x301   : > { %v1082_v47 = vsel %vm1015_vm3, %v4884_v45, 0.0  ;;  %v4888_v49 = vpop.eup %4348 }
 0x302   : > { %1077 = vadd.xlane.f32.xlu1 %v1076_v36  ;;  %v1085_v2 = vsel %vm1015_vm3, %v4888_v49, 0.0 }
 0x306   : > { %1083 = vadd.xlane.f32.xlu1 %v1082_v47 }
 0x30a   : > { %1086 = vadd.xlane.f32.xlu1 %v1085_v2 }
 0x311   : > { %702 = vrot.lane.b32.xlu0 %v4635_v34, %s4495_s26  ;;  %v4919_v34 = vmul.f32 0.35355338, %v4846_v55  ;;  %v4940_v55 = vmul.f32 0.35355338, %v4858_v0  ;;  %v1562_v0 = vsel %vm1015_vm3, %v4945_v61, -inf }
 0x313   : > { %v1547_v43 = vsel %vm1015_vm3, %v4919_v34, -inf  ;;  %v1565_v57 = vsel %vm1015_vm3, %v4940_v55, -inf }
 0x315   : > { %4240 = vrot.lane.b32.xlu0 %v4723_v23, %s4497_s28 }
 0x319   : > { %4245 = vrot.lane.b32.xlu0 %v4729_v29, %s4497_s28 }
 0x31b   : > { %4235 = vrot.lane.b32.xlu1 %v4715_v17, %s4497_s28 }
 0x31d   : > { %4250 = vrot.lane.b32.xlu0 %v4737_v35, %s4497_s28 }
 0x31f   : > { %1935 = vrot.lane.b32.xlu1 %v4740_v37, %s4497_s28 }
 0x321   : > { %1933 = vrot.lane.b32.xlu0 %v4705_v9, %s4497_s28 }
 0x323   : > { %1939 = vrot.lane.b32.xlu1 %v4750_v39, %s4497_s28 }
 0x325   : > { %1937 = vrot.lane.b32.xlu0 %v4747_v38, %s4497_s28 }
 0x327   : > { %1943 = vrot.lane.b32.xlu1 %v4768_v41, %s4497_s28 }
 0x329   : > { %1941 = vrot.lane.b32.xlu0 %v4759_v40, %s4497_s28 }
 0x32b   : > { %1947 = vrot.lane.b32.xlu1 %v4780_v44, %s4497_s28 }
 0x32d   : > { %1945 = vrot.lane.b32.xlu0 %v4771_v42, %s4497_s28 }
 0x34c   : > { %1548 = vmax.xlane.f32.xlu0 %v1547_v43 }
 0x34f   : > { %1551 = vmax.xlane.f32.xlu1 %v1550_v50 }
 0x350   : > { %1554 = vmax.xlane.f32.xlu0 %v1553_v54 }
 0x353   : > { %1560 = vmax.xlane.f32.xlu1 %v1559_v59 }
 0x354   : > { %1557 = vmax.xlane.f32.xlu0 %v1556_v56 }
 0x357   : > { %1566 = vmax.xlane.f32.xlu1 %v1565_v57 }
 0x358   : > { %1563 = vmax.xlane.f32.xlu0 %v1562_v0 }
 0x35c   : > { %1569 = vmax.xlane.f32.xlu0 %v1568_v60 }
 0x382   : > { %v1069_v58 = vpop.xlane.xlu1 %1068 }
 0x383   : > { %v1066_v62 = vpop.xlane.xlu0 %1065 }
 0x384   : > { %4350 = vrcp.f32 %v1066_v62  ;;  %v834_v62 = vld [vmem:[%s5458_s6] sm:$0xff] }
 0x385   : > { %4352 = vrcp.f32 %v1069_v58 }
 0x387   : > { %v1075_v3 = vpop.xlane.xlu1 %1074 }
 0x388   : > { %v1072_v13 = vpop.xlane.xlu0 %1071 }
 0x389   : > { %4354 = vrcp.f32 %v1072_v13 }
 0x38a   : > { %4356 = vrcp.f32 %v1075_v3 }
 0x38b   : > { %v1081_v14 = vpop.xlane.xlu1 %1080 }
 0x38c   : > { %v703_v7 = vpop.permute.xlu0 %702 }
 0x38d   : > { %v796_v16 = vadd.f32 %v795_v51, %v703_v7  ;;  %v801_v20 = vadd.f32 %v3671_v48, %v703_v7  ;;  %v806_v63 = vadd.f32 %v805_v1, %v703_v7  ;;  %v811_v21 = vadd.f32 %v3674_v53, %v703_v7 }
 0x38e   : > { %v4351_v22 = vpop.eup %4350  ;;  %v816_v24 = vadd.f32 %v815_v5, %v703_v7  ;;  %v821_v26 = vadd.f32 %v3677_v4, %v703_v7  ;;  %v826_v28 = vadd.f32 %v825_v8, %v703_v7  ;;  %v831_v54 = vadd.f32 %v3680_v6, %v703_v7 }
 0x38f   : > { %v1078_v30 = vpop.xlane.xlu1 %1077  ;;  %v4958_v32 = vpack.i.bf16 %v801_v20, %v796_v16  ;;  %v4009_v36 = vpack.c.bf16 %v801_v20, %v796_v16  ;;  %v1096_v47 = vmul.f32 %v4351_v22, %v4862_v19  ;;  %v4013_v2 = vpack.c.bf16 %v811_v21, %v806_v63  ;;  %v4353_v8 = vpop.eup %4352 }
 0x390   : > { %v4241_v43 = vpop.permute.xlu0 %4240  ;;  %v4017_v50 = vpack.c.bf16 %v821_v26, %v816_v24  ;;  %v4961_v59 = vpack.i.bf16 %v821_v26, %v816_v24  ;;  %v4965_v48 = vpack.i.bf16 %v811_v21, %v806_v63  ;;  %v4021_v51 = vpack.c.bf16 %v831_v54, %v826_v28 }
 0x391   : > { %4255 = vrot.lane.b32.xlu1 %v4958_v32, %s4496_s12  ;;  %4010 = vmatprep.subr.bf16.mxu0 %v4009_v36  ;;  %v4968_v53 = vpack.i.bf16 %v831_v54, %v826_v28  ;;  %4358 = vrcp.f32 %v1078_v30  ;;  %v4243_v56 = vunpack.i.h.bf16 %v4241_v43  ;;  %v4242_v57 = vunpack.i.l.bf16 %v4241_v43 }
 0x392   : > { %4012 = vmatpush3.bf16.msra.mxu0 %v4009_v36  ;;  %3725 = vmatprep.mubr.msk.f32.mxu0 %vm1015_vm3, %v1096_v47  ;;  %4360 = vrcp.f32 %v1081_v14  ;;  %v1097_v14 = vmul.f32 %v4353_v8, %v4860_v18 }
 0x393   : > { %4014 = vmatprep.subr.bf16.mxu0 %v4013_v2  ;;  %v1084_v19 = vpop.xlane.xlu1 %1083  ;;  %v4355_v3 = vpop.eup %4354  ;;  %v4071_v16 = vpack.c.bf16 %v4243_v56, %v4242_v57 }
 0x394   : > { %v4246_v1 = vpop.permute.xlu0 %4245  ;;  %4362 = vrcp.f32 %v1084_v19  ;;  %v4357_v7 = vpop.eup %4356  ;;  %v1098_v20 = vmul.f32 %v4355_v3, %v4870_v27 }
 0x395   : > { %v1099_v18 = vmul.f32 %v4357_v7, %v4868_v25  ;;  %v4248_v22 = vunpack.i.h.bf16 %v4246_v1  ;;  %v4247_v24 = vunpack.i.l.bf16 %v4246_v1 }
 0x396   : > { %4016 = vmatpush3.bf16.msra.mxu0 %v4013_v2 }
 0x397   : > { %4018 = vmatprep.subr.bf16.mxu0 %v4017_v50  ;;  %v1087_v4 = vpop.xlane.xlu1 %1086  ;;  %v4077_v36 = vpack.c.bf16 %v4248_v22, %v4247_v24 }
 0x398   : > { %v4251_v5 = vpop.permute.xlu0 %4250  ;;  %4364 = vrcp.f32 %v1087_v4 }
 0x399   : > { %v4252_v2 = vunpack.i.l.bf16 %v4251_v5 }
 0x39a   : > { %4020 = vmatpush3.bf16.msra.mxu0 %v4017_v50 }
 0x39b   : > { %4022 = vmatprep.subr.bf16.mxu0 %v4021_v51  ;;  %v4236_v6 = vpop.permute.xlu1 %4235  ;;  %v4359_v63 = vpop.eup %4358 }
 0x39c   : > { %v4238_v0 = vunpack.i.h.bf16 %v4236_v6  ;;  %v4237_v60 = vunpack.i.l.bf16 %v4236_v6  ;;  %v1934_v58 = vpop.permute.xlu0 %1933  ;;  %v4361_v21 = vpop.eup %4360  ;;  %v1100_v26 = vmul.f32 %v4359_v63, %v4880_v33  ;;  %v4253_v33 = vunpack.i.h.bf16 %v4251_v5 }
 0x39d   : > { %3837 = vmatprep.mubr.msk.f32.mxu1 %vm853_vm1, %v1934_v58  ;;  %v1101_v28 = vmul.f32 %v4361_v21, %v4876_v31 }
 0x39e   : > { %v4065_v13 = vpack.c.bf16 %v4238_v0, %v4237_v60  ;;  %4024 = vmatpush3.bf16.msra.mxu0 %v4021_v51  ;;  %v4363_v27 = vpop.eup %4362  ;;  %v4083_v31 = vpack.c.bf16 %v4253_v33, %v4252_v2 }
 0x39f   : > { %3737 = vmatprep.subr.mxu0 %v834_v62  ;;  %v1102_v47 = vmul.f32 %v4363_v27, %v4884_v45  ;;  %v1936_v45 = vpop.permute.xlu1 %1935 }
 0x3a0   : > { %4067 = vmatprep.subr.msk.bf16.mxu1 %vm4711_vm2, %v4065_v13  ;;  %v1938_v43 = vpop.permute.xlu0 %1937 }
 0x3a1   : > { %3726 = vmatmul.mubr.msk.f32.vlgmr.msra.gmra.mrb[12].mxu0 %vm1015_vm3, %v1097_v14  ;;  %4070 = vmatpush3.bf16.xpose.msk.msra.mxu1 %vm4711_vm2, %v4065_v13 }
 0x3a2   : > { %3728 = vmatprep.mubr.msk.f32.mxu0 %vm1015_vm3, %v1098_v20  ;;  %4073 = vmatprep.subr.msk.bf16.mxu1 %vm4711_vm2, %v4071_v16  ;;  %v4365_v30 = vpop.eup %4364 }
 0x3a3   : > { %3738 = vmatpush3.msra.mxu0 %v834_v62  ;;  %v1103_v25 = vmul.f32 %v4365_v30, %v4888_v49  ;;  %v1940_v50 = vpop.permute.xlu1 %1939 }
 0x3a4   : > { %v1942_v49 = vpop.permute.xlu0 %1941 }
 0x3a5   : > { %3729 = vmatmul.mubr.msk.f32.gmra.mrb[14].mxu0 %vm1015_vm3, %v1099_v18 }
 0x3a6   : > { %3731 = vmatprep.mubr.msk.f32.mxu0 %vm1015_vm3, %v1100_v26 }
 0x3a7   : > { %v1944_v54 = vpop.permute.xlu1 %1943 }
 0x3a8   : > { %v1946_v51 = vpop.permute.xlu0 %1945 }
 0x3a9   : > { %3732 = vmatmul.mubr.msk.f32.gmra.mrb[16].mxu0 %vm1015_vm3, %v1101_v28  ;;  %4076 = vmatpush3.bf16.xpose.msk.msra.mxu1 %vm4711_vm2, %v4071_v16 }
 0x3aa   : > { %3734 = vmatprep.mubr.msk.f32.mxu0 %vm1015_vm3, %v1102_v47  ;;  %4079 = vmatprep.subr.msk.bf16.mxu1 %vm4711_vm2, %v4077_v36 }
 0x3ab   : > { %v1948_v19 = vpop.permute.xlu1 %1947 }
 0x3ad   : > { %3735 = vmatmul.mubr.msk.f32.gmra.mrb[18].mxu0 %vm1015_vm3, %v1103_v25 }
 0x3b1   : > { %4082 = vmatpush3.bf16.xpose.msk.msra.mxu1 %vm4711_vm2, %v4077_v36 }
 0x3b2   : > { %4085 = vmatprep.subr.msk.bf16.mxu1 %vm4711_vm2, %v4083_v31 }
 0x3b9   : > { %4088 = vmatpush3.bf16.xpose.msk.msra.mxu1 %vm4711_vm2, %v4083_v31 }
 0x3c0   : > { %3838 = vmatmul.mubr.msk.f32.vlgmr.msra.gmra.mrb[28].mxu1 %vm853_vm1, %v1936_v45 }
 0x3c1   : > { %3840 = vmatprep.mubr.msk.f32.mxu1 %vm853_vm1, %v1938_v43 }
 0x3c4   : > { %3841 = vmatmul.mubr.msk.f32.gmra.mrb[30].mxu1 %vm853_vm1, %v1940_v50 }
 0x3c5   : > { %3843 = vmatprep.mubr.msk.f32.mxu1 %vm853_vm1, %v1942_v49 }
 0x3c8   : > { %3844 = vmatmul.mubr.msk.f32.gmra.mrb[32].mxu1 %vm853_vm1, %v1944_v54 }
 0x3c9   : > { %3846 = vmatprep.mubr.msk.f32.mxu1 %vm853_vm1, %v1946_v51 }
 0x3cc   : > { %3847 = vmatmul.mubr.msk.f32.gmra.mrb[34].mxu1 %vm853_vm1, %v1948_v19 }
 0x3d9   : > { %v1549_v1 = vpop.xlane.xlu0 %1548 }
 0x3da   : > { %v1571_v4 = vsub.f32 %v4919_v34, %v1549_v1 }
 0x3dc   : > { %v1579_v5 = vmul.f32 1.442695, %v1571_v4  ;;  %v1552_v6 = vpop.xlane.xlu1 %1551 }
 0x3dd   : > { %v1572_v8 = vsub.f32 %v4922_v10, %v1552_v6  ;;  %v1555_v56 = vpop.xlane.xlu0 %1554 }
 0x3de   : > { %4366 = vpow2.f32 %v1579_v5  ;;  %v1573_v57 = vsub.f32 %v4925_v11, %v1555_v56 }
 0x3df   : > { %v1581_v0 = vmul.f32 1.442695, %v1572_v8 }
 0x3e0   : > { %v1583_v60 = vmul.f32 1.442695, %v1573_v57  ;;  %v1561_v58 = vpop.xlane.xlu1 %1560 }
 0x3e1   : > { %4368 = vpow2.f32 %v1581_v0  ;;  %v1575_v62 = vsub.f32 %v4930_v46, %v1561_v58  ;;  %v1558_v3 = vpop.xlane.xlu0 %1557 }
 0x3e2   : > { %4370 = vpow2.f32 %v1583_v60  ;;  %v1574_v13 = vsub.f32 %v4935_v52, %v1558_v3 }
 0x3e3   : > { %v1587_v14 = vmul.f32 1.442695, %v1575_v62 }
 0x3e4   : > { %v1585_v34 = vmul.f32 1.442695, %v1574_v13  ;;  %v1567_v7 = vpop.xlane.xlu1 %1566 }
 0x3e5   : > { %4372 = vpow2.f32 %v1587_v14  ;;  %v1564_v16 = vpop.xlane.xlu0 %1563  ;;  %v1577_v11 = vsub.f32 %v4940_v55, %v1567_v7 }
 0x3e6   : > { %4374 = vpow2.f32 %v1585_v34  ;;  %v1576_v10 = vsub.f32 %v4945_v61, %v1564_v16 }
 0x3e7   : > { %v1591_v24 = vmul.f32 1.442695, %v1577_v11 }
 0x3e8   : > { %v5017_v20 = vpop.eup %4366  ;;  %v1589_v63 = vmul.f32 1.442695, %v1576_v10 }
 0x3e9   : > { %v1570_v18 = vpop.xlane.xlu0 %1569  ;;  %v1595_v46 = vsel %vm1015_vm3, %v5017_v20, 0.0 }
 0x3ea   : > { %4376 = vpow2.f32 %v1589_v63  ;;  %v1578_v52 = vsub.f32 %v4952_v12, %v1570_v18  ;;  %1596 = vadd.xlane.f32.xlu1 %v1595_v46 }
 0x3eb   : > { %v5023_v21 = vpop.eup %4368 }
 0x3ec   : > { %v5025_v22 = vpop.eup %4370  ;;  %v1593_v26 = vmul.f32 1.442695, %v1578_v52  ;;  %v1598_v61 = vsel %vm1015_vm3, %v5023_v21, 0.0 }
 0x3ed   : > { %1599 = vadd.xlane.f32.xlu0 %v1598_v61  ;;  %v1601_v55 = vsel %vm1015_vm3, %v5025_v22, 0.0 }
 0x3ee   : > { %4378 = vpow2.f32 %v1593_v26  ;;  %1602 = vadd.xlane.f32.xlu1 %v1601_v55 }
 0x3ef   : > { %v5031_v27 = vpop.eup %4372  ;;  %4380 = vpow2.f32 %v1591_v24 }
 0x3f0   : > { %v5033_v28 = vpop.eup %4374  ;;  %v1607_v12 = vsel %vm1015_vm3, %v5031_v27, 0.0 }
 0x3f1   : > { %v1604_v30 = vsel %vm1015_vm3, %v5033_v28, 0.0 }
 0x3f2   : > { %1608 = vadd.xlane.f32.xlu1 %v1607_v12  ;;  %1605 = vadd.xlane.f32.xlu0 %v1604_v30 }
 0x3f4   : > { %v5039_v36 = vpop.eup %4376 }
 0x3f5   : > { %v1610_v47 = vsel %vm1015_vm3, %v5039_v36, 0.0 }
 0x3f6   : > { %1611 = vadd.xlane.f32.xlu0 %v1610_v47 }
 0x3f8   : > { %v5043_v25 = vpop.eup %4378 }
 0x3f9   : > { %v1616_v33 = vsel %vm1015_vm3, %v5043_v25, 0.0  ;;  %v5047_v2 = vpop.eup %4380 }
 0x3fa   : > { %1617 = vadd.xlane.f32.xlu0 %v1616_v33  ;;  %v1613_v31 = vsel %vm1015_vm3, %v5047_v2, 0.0 }
 0x3fe   : > { %1614 = vadd.xlane.f32.xlu0 %v1613_v31 }
 0x403   : > { %v4256_v45 = vpop.permute.xlu1 %4255  ;;  %4265 = vrot.lane.b32.xlu1 %v4961_v59, %s4496_s12 }
 0x404   : > { %v4258_v43 = vunpack.i.h.bf16 %v4256_v45  ;;  %v4257_v50 = vunpack.i.l.bf16 %v4256_v45 }
 0x406   : > { %v4049_v49 = vpack.c.bf16 %v4258_v43, %v4257_v50 }
 0x407   : > { %4270 = vrot.lane.b32.xlu1 %v4968_v53, %s4496_s12 }
 0x408   : > { %4050 = vmatprep.subr.bf16.mxu0 %v4049_v49 }
 0x40b   : > { %4275 = vrot.lane.b32.xlu1 %v4715_v17, %s4498_s11 }
 0x40f   : > { %4280 = vrot.lane.b32.xlu1 %v4723_v23, %s4498_s11 }
 0x413   : > { %4290 = vrot.lane.b32.xlu1 %v4737_v35, %s4498_s11 }
 0x414   : > { %4260 = vrot.lane.b32.xlu0 %v4965_v48, %s4496_s12  ;;  %s5425_s12 = scalar_lea.vmem %s5461_s9, %s4575_s20 }
 0x417   : > { %2490 = vrot.lane.b32.xlu1 %v4740_v37, %s4498_s11 }
 0x418   : > { %4285 = vrot.lane.b32.xlu0 %v4729_v29, %s4498_s11 }
 0x41b   : > { %2494 = vrot.lane.b32.xlu1 %v4750_v39, %s4498_s11 }
 0x41c   : > { %2488 = vrot.lane.b32.xlu0 %v4705_v9, %s4498_s11 }
 0x41f   : > { %2498 = vrot.lane.b32.xlu1 %v4768_v41, %s4498_s11 }
 0x420   : > { %2492 = vrot.lane.b32.xlu0 %v4747_v38, %s4498_s11 }
 0x423   : > { %2502 = vrot.lane.b32.xlu1 %v4780_v44, %s4498_s11 }
 0x424   : > { %2496 = vrot.lane.b32.xlu0 %v4759_v40, %s4498_s11 }
 0x428   : > { %2500 = vrot.lane.b32.xlu0 %v4771_v42, %s4498_s11 }
 0x474   : > { %v3727_v17 = vpop.f32.mrb[12].mxu0 }
 0x475   : > { %v1194_v23 = vpop.f32.mrb[13].mxu0 }
 0x476   : > { %3739 = vmatprep.mubr.msk.f32.mxu0 %vm853_vm1, %v1194_v23 }
 0x477   : > { %3740 = vmatmul.mubr.msk.f32.vlgmr.msra.gmra.mrb[20].mxu0 %vm853_vm1, %v3727_v17  ;;  %v1597_v9 = vpop.xlane.xlu1 %1596 }
 0x478   : > { %4052 = vmatpush3.bf16.msra.mxu0 %v4049_v49  ;;  %4382 = vrcp.f32 %v1597_v9  ;;  %v3730_v29 = vpop.f32.mrb[14].mxu0 }
 0x479   : > { %v1204_v35 = vpop.f32.mrb[15].mxu0 }
 0x47a   : > { %3742 = vmatprep.mubr.msk.f32.mxu0 %vm853_vm1, %v1204_v35  ;;  %v1600_v37 = vpop.xlane.xlu0 %1599 }
 0x47b   : > { %3743 = vmatmul.mubr.msk.f32.gmra.mrb[22].mxu0 %vm853_vm1, %v3730_v29  ;;  %v1603_v38 = vpop.xlane.xlu1 %1602  ;;  %4384 = vrcp.f32 %v1600_v37 }
 0x47c   : > { %v3733_v39 = vpop.f32.mrb[16].mxu0  ;;  %4386 = vrcp.f32 %v1603_v38 }
 0x47d   : > { %v1214_v40 = vpop.f32.mrb[17].mxu0 }
 0x47e   : > { %3745 = vmatprep.mubr.msk.f32.mxu0 %vm853_vm1, %v1214_v40 }
 0x47f   : > { %3746 = vmatmul.mubr.msk.f32.gmra.mrb[24].mxu0 %vm853_vm1, %v3733_v39  ;;  %v1609_v41 = vpop.xlane.xlu1 %1608  ;;  %v1606_v42 = vpop.xlane.xlu0 %1605 }
 0x480   : > { %v3736_v44 = vpop.f32.mrb[18].mxu0  ;;  %4388 = vrcp.f32 %v1606_v42 }
 0x481   : > { %v1224_v54 = vpop.f32.mrb[19].mxu0  ;;  %4390 = vrcp.f32 %v1609_v41 }
 0x482   : > { %v4383_v51 = vpop.eup %4382  ;;  %3748 = vmatprep.mubr.msk.f32.mxu0 %vm853_vm1, %v1224_v54 }
 0x483   : > { %3749 = vmatmul.mubr.msk.f32.gmra.mrb[26].mxu0 %vm853_vm1, %v3736_v44  ;;  %v4266_v19 = vpop.permute.xlu1 %4265  ;;  %v1612_v1 = vpop.xlane.xlu0 %1611  ;;  %v1627_v4 = vmul.f32 %v4383_v51, %v5017_v20 }
 0x484   : > { %v4268_v58 = vunpack.i.h.bf16 %v4266_v19  ;;  %v4267_v62 = vunpack.i.l.bf16 %v4266_v19  ;;  %4392 = vrcp.f32 %v1612_v1 }
 0x485   : > { %3795 = vmatprep.mubr.msk.f32.mxu0 %vm1015_vm3, %v1627_v4  ;;  %v4385_v23 = vpop.eup %4384 }
 0x486   : > { %v4057_v63 = vpack.c.bf16 %v4268_v58, %v4267_v62  ;;  %v4387_v9 = vpop.eup %4386  ;;  %v1628_v41 = vmul.f32 %v4385_v23, %v5023_v21 }
 0x487   : > { %v4271_v5 = vpop.permute.xlu1 %4270  ;;  %v1618_v6 = vpop.xlane.xlu0 %1617  ;;  %v1629_v54 = vmul.f32 %v4387_v9, %v5025_v22 }
 0x488   : > { %v4273_v18 = vunpack.i.h.bf16 %v4271_v5  ;;  %v4272_v46 = vunpack.i.l.bf16 %v4271_v5 }
 0x48a   : > { %v4061_v33 = vpack.c.bf16 %v4273_v18, %v4272_v46  ;;  %v4389_v44 = vpop.eup %4388 }
 0x48b   : > { %v4276_v8 = vpop.permute.xlu1 %4275  ;;  %v1615_v56 = vpop.xlane.xlu0 %1614 }
 0x48c   : > { %v4278_v57 = vunpack.i.h.bf16 %v4276_v8  ;;  %v4277_v0 = vunpack.i.l.bf16 %v4276_v8  ;;  %4394 = vrcp.f32 %v1615_v56  ;;  %v4391_v51 = vpop.eup %4390  ;;  %v1630_v8 = vmul.f32 %v4389_v44, %v5033_v28 }
 0x48d   : > { %4396 = vrcp.f32 %v1618_v6 }
 0x48e   : > { %v4105_v60 = vpack.c.bf16 %v4278_v57, %v4277_v0  ;;  %v4393_v56 = vpop.eup %4392  ;;  %v1631_v57 = vmul.f32 %v4391_v51, %v5031_v27 }
 0x48f   : > { %v4281_v3 = vpop.permute.xlu1 %4280  ;;  %v4261_v13 = vpop.permute.xlu0 %4260  ;;  %v1632_v28 = vmul.f32 %v4393_v56, %v5039_v36 }
 0x490   : > { %v4283_v14 = vunpack.i.h.bf16 %v4281_v3  ;;  %v4282_v34 = vunpack.i.l.bf16 %v4281_v3  ;;  %v4263_v7 = vunpack.i.h.bf16 %v4261_v13  ;;  %v4262_v16 = vunpack.i.l.bf16 %v4261_v13  ;;  %4107 = vmatprep.subr.msk.bf16.mxu1 %vm4711_vm2, %v4105_v60 }
 0x491   : > { %4110 = vmatpush3.bf16.xpose.msk.msra.mxu1 %vm4711_vm2, %v4105_v60 }
 0x492   : > { %v4111_v10 = vpack.c.bf16 %v4283_v14, %v4282_v34  ;;  %v4053_v20 = vpack.c.bf16 %v4263_v7, %v4262_v16 }
 0x493   : > { %v4286_v11 = vpop.permute.xlu0 %4285  ;;  %v3839_v52 = vpop.f32.mrb[28].mxu1 }
 0x494   : > { %4054 = vmatprep.subr.bf16.mxu0 %v4053_v20  ;;  %4113 = vmatprep.subr.msk.bf16.mxu1 %vm4711_vm2, %v4111_v10  ;;  %v4288_v24 = vunpack.i.h.bf16 %v4286_v11  ;;  %v4287_v26 = vunpack.i.l.bf16 %v4286_v11  ;;  %v5097_v61 = vmul.f32 0.35355338, %v3839_v52  ;;  %v2063_v55 = vpop.f32.mrb[29].mxu1  ;;  %v4291_v49 = vpop.permute.xlu1 %4290 }
 0x495   : > { %4056 = vmatpush3.bf16.msra.mxu0 %v4053_v20  ;;  %v5099_v12 = vmul.f32 0.35355338, %v2063_v55  ;;  %v4293_v37 = vunpack.i.h.bf16 %v4291_v49  ;;  %v4292_v38 = vunpack.i.l.bf16 %v4291_v49 }
 0x496   : > { %4058 = vmatprep.subr.bf16.mxu0 %v4057_v63  ;;  %v2113_v47 = vsel %vm1015_vm3, %v5097_v61, -inf  ;;  %v4117_v43 = vpack.c.bf16 %v4288_v24, %v4287_v26  ;;  %v4395_v0 = vpop.eup %4394 }
 0x497   : > { %v2489_v30 = vpop.permute.xlu0 %2488  ;;  %2114 = vmax.xlane.f32.xlu1 %v2113_v47  ;;  %v3842_v31 = vpop.f32.mrb[30].mxu1  ;;  %v2110_v45 = vsel %vm1015_vm3, %v5099_v12, -inf  ;;  %v4123_v4 = vpack.c.bf16 %v4293_v37, %v4292_v38  ;;  %v1633_v27 = vmul.f32 %v4395_v0, %v5047_v2 }
 0x498   : > { %3907 = vmatprep.mubr.msk.f32.mxu1 %vm853_vm1, %v2489_v30  ;;  %v2073_v50 = vpop.f32.mrb[31].mxu1  ;;  %2111 = vmax.xlane.f32.xlu0 %v2110_v45  ;;  %v5114_v39 = vmul.f32 0.35355338, %v3842_v31  ;;  %v4397_v3 = vpop.eup %4396 }
 0x499   : > { %4060 = vmatpush3.bf16.msra.mxu0 %v4057_v63  ;;  %4116 = vmatpush3.bf16.xpose.msk.msra.mxu1 %vm4711_vm2, %v4111_v10  ;;  %v5108_v17 = vmul.f32 0.35355338, %v2073_v50  ;;  %v2491_v13 = vpop.permute.xlu1 %2490  ;;  %v1634_v34 = vmul.f32 %v4397_v3, %v5043_v25  ;;  %v835_v10 = vld [vmem:[%s5458_s6 + $0x8] sm:$0xff] }
 0x49a   : > { %4062 = vmatprep.subr.bf16.mxu0 %v4061_v33  ;;  %4119 = vmatprep.subr.msk.bf16.mxu1 %vm4711_vm2, %v4117_v43  ;;  %v2119_v21 = vsel %vm1015_vm3, %v5114_v39, -inf }
 0x49b   : > { %v3845_v29 = vpop.f32.mrb[32].mxu1  ;;  %v2116_v35 = vsel %vm1015_vm3, %v5108_v17, -inf  ;;  %v2493_v7 = vpop.permute.xlu0 %2492 }
 0x49c   : > { %v2083_v40 = vpop.f32.mrb[33].mxu1  ;;  %2117 = vmax.xlane.f32.xlu0 %v2116_v35  ;;  %v5123_v5 = vmul.f32 0.35355338, %v3845_v29 }
 0x49d   : > { %4064 = vmatpush3.bf16.msra.mxu0 %v4061_v33  ;;  %v5117_v42 = vmul.f32 0.35355338, %v2083_v40  ;;  %v2495_v36 = vpop.permute.xlu1 %2494 }
 0x49e   : > { %v2125_v62 = vsel %vm1015_vm3, %v5123_v5, -inf  ;;  %3807 = vmatprep.subr.mxu0 %v835_v10 }
 0x49f   : > { %v3848_v19 = vpop.f32.mrb[34].mxu1  ;;  %v2122_v1 = vsel %vm1015_vm3, %v5117_v42, -inf  ;;  %v2497_v2 = vpop.permute.xlu0 %2496 }
 0x4a0   : > { %3796 = vmatmul.mubr.msk.f32.vlgmr.msra.gmra.mrb[28].mxu0 %vm1015_vm3, %v1628_v41  ;;  %v2093_v6 = vpop.f32.mrb[35].mxu1  ;;  %2120 = vmax.xlane.f32.xlu0 %v2119_v21  ;;  %v5139_v58 = vmul.f32 0.35355338, %v3848_v19 }
 0x4a1   : > { %3798 = vmatprep.mubr.msk.f32.mxu0 %vm1015_vm3, %v1629_v54  ;;  %4122 = vmatpush3.bf16.xpose.msk.msra.mxu1 %vm4711_vm2, %v4117_v43  ;;  %v5130_v22 = vmul.f32 0.35355338, %v2093_v6  ;;  %v2499_v16 = vpop.permute.xlu1 %2498 }
 0x4a2   : > { %2123 = vmax.xlane.f32.xlu1 %v2122_v1  ;;  %4125 = vmatprep.subr.msk.bf16.mxu1 %vm4711_vm2, %v4123_v4  ;;  %v2131_v14 = vsel %vm1015_vm3, %v5139_v58, -inf }
 0x4a3   : > { %v2128_v60 = vsel %vm1015_vm3, %v5130_v22, -inf  ;;  %v2501_v15 = vpop.permute.xlu0 %2500  ;;  %3808 = vmatpush3.msra.mxu0 %v835_v10 }
 0x4a4   : > { %3799 = vmatmul.mubr.msk.f32.gmra.mrb[30].mxu0 %vm1015_vm3, %v1630_v8  ;;  %2126 = vmax.xlane.f32.xlu0 %v2125_v62 }
 0x4a5   : > { %3801 = vmatprep.mubr.msk.f32.mxu0 %vm1015_vm3, %v1631_v57  ;;  %v2503_v25 = vpop.permute.xlu1 %2502 }
 0x4a6   : > { %2129 = vmax.xlane.f32.xlu1 %v2128_v60 }
 0x4a8   : > { %3802 = vmatmul.mubr.msk.f32.gmra.mrb[32].mxu0 %vm1015_vm3, %v1632_v28  ;;  %2132 = vmax.xlane.f32.xlu0 %v2131_v14 }
 0x4a9   : > { %3804 = vmatprep.mubr.msk.f32.mxu0 %vm1015_vm3, %v1633_v27  ;;  %4128 = vmatpush3.bf16.xpose.msk.msra.mxu1 %vm4711_vm2, %v4123_v4 }
 0x4ac   : > { %3805 = vmatmul.mubr.msk.f32.gmra.mrb[34].mxu0 %vm1015_vm3, %v1634_v34 }
 0x4b0   : > { %3908 = vmatmul.mubr.msk.f32.vlgmr.msra.gmra.mrb[36].mxu1 %vm853_vm1, %v2491_v13 }
 0x4b1   : > { %3910 = vmatprep.mubr.msk.f32.mxu1 %vm853_vm1, %v2493_v7 }
 0x4b4   : > { %3911 = vmatmul.mubr.msk.f32.gmra.mrb[38].mxu1 %vm853_vm1, %v2495_v36 }
 0x4b5   : > { %3913 = vmatprep.mubr.msk.f32.mxu1 %vm853_vm1, %v2497_v2 }
 0x4b7   : > { %4295 = vrot.lane.b32.xlu1 %v4958_v32, %s4497_s28 }
 0x4b8   : > { %3914 = vmatmul.mubr.msk.f32.gmra.mrb[40].mxu1 %vm853_vm1, %v2499_v16 }
 0x4b9   : > { %3916 = vmatprep.mubr.msk.f32.mxu1 %vm853_vm1, %v2501_v15 }
 0x4bc   : > { %3917 = vmatmul.mubr.msk.f32.gmra.mrb[42].mxu1 %vm853_vm1, %v2503_v25 }
 0x524   : > { %v2115_v20 = vpop.xlane.xlu1 %2114 }
 0x525   : > { %v2135_v11 = vsub.f32 %v5097_v61, %v2115_v20  ;;  %v2112_v63 = vpop.xlane.xlu0 %2111 }
 0x526   : > { %v2134_v46 = vsub.f32 %v5099_v12, %v2112_v63 }
 0x527   : > { %v2144_v18 = vmul.f32 1.442695, %v2135_v11 }
 0x528   : > { %v2142_v52 = vmul.f32 1.442695, %v2134_v46 }
 0x529   : > { %4398 = vpow2.f32 %v2144_v18  ;;  %v2118_v24 = vpop.xlane.xlu0 %2117 }
 0x52a   : > { %4400 = vpow2.f32 %v2142_v52  ;;  %v2136_v26 = vsub.f32 %v5108_v17, %v2118_v24 }
 0x52c   : > { %v2146_v55 = vmul.f32 1.442695, %v2136_v26 }
 0x52d   : > { %v2121_v30 = vpop.xlane.xlu0 %2120 }
 0x52e   : > { %4402 = vpow2.f32 %v2146_v55  ;;  %v2137_v33 = vsub.f32 %v5114_v39, %v2121_v30 }
 0x52f   : > { %v2124_v47 = vpop.xlane.xlu1 %2123 }
 0x530   : > { %v2138_v31 = vsub.f32 %v5117_v42, %v2124_v47  ;;  %v2148_v45 = vmul.f32 1.442695, %v2137_v33 }
 0x531   : > { %v2127_v43 = vpop.xlane.xlu0 %2126 }
 0x532   : > { %v2150_v61 = vmul.f32 1.442695, %v2138_v31  ;;  %4404 = vpow2.f32 %v2148_v45  ;;  %v2139_v12 = vsub.f32 %v5123_v5, %v2127_v43 }
 0x533   : > { %v2130_v50 = vpop.xlane.xlu1 %2129  ;;  %v5171_v49 = vpop.eup %4398 }
 0x534   : > { %4406 = vpow2.f32 %v2150_v61  ;;  %v2161_v17 = vsel %vm1015_vm3, %v5171_v49, 0.0  ;;  %v5176_v23 = vpop.eup %4400  ;;  %v2152_v9 = vmul.f32 1.442695, %v2139_v12  ;;  %v2140_v29 = vsub.f32 %v5130_v22, %v2130_v50 }
 0x535   : > { %2162 = vadd.xlane.f32.xlu0 %v2161_v17  ;;  %v2133_v35 = vpop.xlane.xlu0 %2132  ;;  %v2158_v38 = vsel %vm1015_vm3, %v5176_v23, 0.0 }
 0x536   : > { %4408 = vpow2.f32 %v2152_v9  ;;  %v2141_v39 = vsub.f32 %v5139_v58, %v2133_v35  ;;  %2159 = vadd.xlane.f32.xlu1 %v2158_v38  ;;  %v2154_v44 = vmul.f32 1.442695, %v2140_v29 }
 0x537   : > { %v4296_v37 = vpop.permute.xlu1 %4295 }
 0x538   : > { %v4298_v40 = vunpack.i.h.bf16 %v4296_v37  ;;  %v4297_v41 = vunpack.i.l.bf16 %v4296_v37  ;;  %v5182_v42 = vpop.eup %4402  ;;  %v2156_v54 = vmul.f32 1.442695, %v2141_v39 }
 0x539   : > { %v2164_v19 = vsel %vm1015_vm3, %v5182_v42, 0.0 }
 0x53a   : > { %v4089_v51 = vpack.c.bf16 %v4298_v40, %v4297_v41  ;;  %4410 = vpow2.f32 %v2156_v54  ;;  %2165 = vadd.xlane.f32.xlu1 %v2164_v19 }
 0x53b   : > { %4412 = vpow2.f32 %v2154_v44 }
 0x53c   : > { %4090 = vmatprep.subr.bf16.mxu0 %v4089_v51  ;;  %v5186_v1 = vpop.eup %4404 }
 0x53d   : > { %v2167_v5 = vsel %vm1015_vm3, %v5186_v1, 0.0 }
 0x53e   : > { %v5188_v4 = vpop.eup %4406  ;;  %2168 = vadd.xlane.f32.xlu0 %v2167_v5 }
 0x53f   : > { %v2170_v21 = vsel %vm1015_vm3, %v5188_v4, 0.0 }
 0x540   : > { %2171 = vadd.xlane.f32.xlu1 %v2170_v21  ;;  %v5194_v6 = vpop.eup %4408 }
 0x541   : > { %v2173_v22 = vsel %vm1015_vm3, %v5194_v6, 0.0 }
 0x542   : > { %2174 = vadd.xlane.f32.xlu0 %v2173_v22 }
 0x544   : > { %v5198_v8 = vpop.eup %4410 }
 0x545   : > { %v2179_v56 = vsel %vm1015_vm3, %v5198_v8, 0.0  ;;  %v5202_v57 = vpop.eup %4412 }
 0x546   : > { %2180 = vadd.xlane.f32.xlu0 %v2179_v56  ;;  %v2176_v0 = vsel %vm1015_vm3, %v5202_v57, 0.0 }
 0x54a   : > { %2177 = vadd.xlane.f32.xlu0 %v2176_v0 }
 0x551   : > { %4305 = vrot.lane.b32.xlu1 %v4961_v59, %s4497_s28 }
 0x555   : > { %4310 = vrot.lane.b32.xlu1 %v4968_v53, %s4497_s28 }
 0x560   : > { %4300 = vrot.lane.b32.xlu0 %v4965_v48, %s4497_s28 }
 0x573   : > { %v3797_v60 = vpop.f32.mrb[28].mxu0 }
 0x574   : > { %v1757_v58 = vpop.f32.mrb[29].mxu0 }
 0x575   : > { %3809 = vmatprep.mubr.msk.f32.mxu0 %vm853_vm1, %v1757_v58  ;;  %v836_v58 = vld [vmem:[%s5458_s6 + $0x10] sm:$0xff] }
 0x576   : > { %3810 = vmatmul.mubr.msk.f32.vlgmr.msra.gmra.mrb[20].mxu0 %vm853_vm1, %v3797_v60 }
 0x577   : > { %4092 = vmatpush3.bf16.msra.mxu0 %v4089_v51  ;;  %v3800_v62 = vpop.f32.mrb[30].mxu0 }
 0x578   : > { %v1767_v28 = vpop.f32.mrb[31].mxu0 }
 0x579   : > { %3812 = vmatprep.mubr.msk.f32.mxu0 %vm853_vm1, %v1767_v28 }
 0x57a   : > { %3813 = vmatmul.mubr.msk.f32.gmra.mrb[22].mxu0 %vm853_vm1, %v3800_v62 }
 0x57b   : > { %v3803_v3 = vpop.f32.mrb[32].mxu0 }
 0x57c   : > { %v1777_v27 = vpop.f32.mrb[33].mxu0 }
 0x57d   : > { %3815 = vmatprep.mubr.msk.f32.mxu0 %vm853_vm1, %v1777_v27 }
 0x57e   : > { %3816 = vmatmul.mubr.msk.f32.gmra.mrb[24].mxu0 %vm853_vm1, %v3803_v3 }
 0x57f   : > { %v3806_v13 = vpop.f32.mrb[34].mxu0 }
 0x580   : > { %v1787_v14 = vpop.f32.mrb[35].mxu0 }
 0x581   : > { %3818 = vmatprep.mubr.msk.f32.mxu0 %vm853_vm1, %v1787_v14 }
 0x582   : > { %3819 = vmatmul.mubr.msk.f32.gmra.mrb[26].mxu0 %vm853_vm1, %v3806_v13 }
 0x583   : > { %v3909_v34 = vpop.f32.mrb[36].mxu1 }
 0x584   : > { %v5220_v7 = vmul.f32 0.35355338, %v3909_v34  ;;  %v2618_v36 = vpop.f32.mrb[37].mxu1 }
 0x585   : > { %v5222_v2 = vmul.f32 0.35355338, %v2618_v36 }
 0x586   : > { %v2668_v16 = vsel %vm1015_vm3, %v5220_v7, -inf }
 0x587   : > { %v3912_v15 = vpop.f32.mrb[38].mxu1  ;;  %2669 = vmax.xlane.f32.xlu0 %v2668_v16  ;;  %v2665_v25 = vsel %vm1015_vm3, %v5222_v2, -inf }
 0x588   : > { %v5228_v10 = vmul.f32 0.35355338, %v3912_v15  ;;  %v2628_v20 = vpop.f32.mrb[39].mxu1  ;;  %2666 = vmax.xlane.f32.xlu1 %v2665_v25 }
 0x589   : > { %v5230_v11 = vmul.f32 0.35355338, %v2628_v20 }
 0x58a   : > { %v2674_v63 = vsel %vm1015_vm3, %v5228_v10, -inf }
 0x58b   : > { %v3915_v18 = vpop.f32.mrb[40].mxu1  ;;  %2675 = vmax.xlane.f32.xlu0 %v2674_v63  ;;  %v2671_v46 = vsel %vm1015_vm3, %v5230_v11, -inf }
 0x58c   : > { %v5236_v52 = vmul.f32 0.35355338, %v3915_v18  ;;  %v2638_v24 = vpop.f32.mrb[41].mxu1  ;;  %2672 = vmax.xlane.f32.xlu1 %v2671_v46 }
 0x58d   : > { %v5238_v26 = vmul.f32 0.35355338, %v2638_v24 }
 0x58e   : > { %v2680_v55 = vsel %vm1015_vm3, %v5236_v52, -inf }
 0x58f   : > { %v3918_v30 = vpop.f32.mrb[42].mxu1  ;;  %2681 = vmax.xlane.f32.xlu0 %v2680_v55  ;;  %v2677_v47 = vsel %vm1015_vm3, %v5238_v26, -inf }
 0x590   : > { %v5244_v33 = vmul.f32 0.35355338, %v3918_v30  ;;  %v2648_v31 = vpop.f32.mrb[43].mxu1  ;;  %2678 = vmax.xlane.f32.xlu1 %v2677_v47 }
 0x591   : > { %v5246_v45 = vmul.f32 0.35355338, %v2648_v31 }
 0x592   : > { %v2686_v61 = vsel %vm1015_vm3, %v5244_v33, -inf }
 0x593   : > { %2687 = vmax.xlane.f32.xlu0 %v2686_v61  ;;  %v2683_v43 = vsel %vm1015_vm3, %v5246_v45, -inf }
 0x594   : > { %2684 = vmax.xlane.f32.xlu1 %v2683_v43 }
 0x5a5   : > { %4315 = vrot.lane.b32.xlu1 %v4958_v32, %s4498_s11 }
 0x5c2   : > { %v2163_v12 = vpop.xlane.xlu0 %2162 }
 0x5c3   : > { %v2160_v50 = vpop.xlane.xlu1 %2159 }
 0x5c4   : > { %4414 = vrcp.f32 %v2160_v50 }
 0x5c5   : > { %4416 = vrcp.f32 %v2163_v12 }
 0x5c7   : > { %v2166_v17 = vpop.xlane.xlu1 %2165 }
 0x5c8   : > { %4418 = vrcp.f32 %v2166_v17 }
 0x5cb   : > { %v2169_v9 = vpop.xlane.xlu0 %2168 }
 0x5cc   : > { %4420 = vrcp.f32 %v2169_v9 }
 0x5cd   : > { %v2172_v38 = vpop.xlane.xlu1 %2171 }
 0x5ce   : > { %v4415_v29 = vpop.eup %4414  ;;  %4422 = vrcp.f32 %v2172_v38 }
 0x5cf   : > { %v2175_v35 = vpop.xlane.xlu0 %2174  ;;  %v2190_v37 = vmul.f32 %v4415_v29, %v5176_v23  ;;  %v4417_v60 = vpop.eup %4416 }
 0x5d0   : > { %4424 = vrcp.f32 %v2175_v35  ;;  %v2191_v28 = vmul.f32 %v4417_v60, %v5171_v49 }
 0x5d1   : > { %3865 = vmatprep.mubr.msk.f32.mxu0 %vm1015_vm3, %v2190_v37  ;;  %v4306_v40 = vpop.permute.xlu1 %4305 }
 0x5d2   : > { %v4308_v54 = vunpack.i.h.bf16 %v4306_v40  ;;  %v4307_v51 = vunpack.i.l.bf16 %v4306_v40  ;;  %v4419_v62 = vpop.eup %4418 }
 0x5d3   : > { %v2181_v39 = vpop.xlane.xlu0 %2180  ;;  %v2192_v27 = vmul.f32 %v4419_v62, %v5182_v42 }
 0x5d4   : > { %v4097_v22 = vpack.c.bf16 %v4308_v54, %v4307_v51 }
 0x5d5   : > { %v4311_v5 = vpop.permute.xlu1 %4310 }
 0x5d6   : > { %v4313_v56 = vunpack.i.h.bf16 %v4311_v5  ;;  %v4312_v0 = vunpack.i.l.bf16 %v4311_v5  ;;  %v4421_v3 = vpop.eup %4420 }
 0x5d7   : > { %v2178_v41 = vpop.xlane.xlu0 %2177  ;;  %v2193_v14 = vmul.f32 %v4421_v3, %v5186_v1 }
 0x5d8   : > { %v4101_v23 = vpack.c.bf16 %v4313_v56, %v4312_v0  ;;  %4426 = vrcp.f32 %v2178_v41  ;;  %v4423_v13 = vpop.eup %4422 }
 0x5d9   : > { %4428 = vrcp.f32 %v2181_v39  ;;  %v2194_v36 = vmul.f32 %v4423_v13, %v5188_v4 }
 0x5da   : > { %v4425_v34 = vpop.eup %4424 }
 0x5db   : > { %v4301_v44 = vpop.permute.xlu0 %4300  ;;  %v2195_v49 = vmul.f32 %v4425_v34, %v5194_v6 }
 0x5dc   : > { %v4303_v19 = vunpack.i.h.bf16 %v4301_v44  ;;  %v4302_v32 = vunpack.i.l.bf16 %v4301_v44 }
 0x5de   : > { %v4093_v21 = vpack.c.bf16 %v4303_v19, %v4302_v32 }
 0x5e0   : > { %4094 = vmatprep.subr.bf16.mxu0 %v4093_v21 }
 0x5e1   : > { %4096 = vmatpush3.bf16.msra.mxu0 %v4093_v21 }
 0x5e2   : > { %4098 = vmatprep.subr.bf16.mxu0 %v4097_v22  ;;  %v4427_v16 = vpop.eup %4426 }
 0x5e3   : > { %v4429_v15 = vpop.eup %4428  ;;  %v2196_v42 = vmul.f32 %v4427_v16, %v5202_v57 }
 0x5e4   : > { %v2197_v25 = vmul.f32 %v4429_v15, %v5198_v8 }
 0x5e5   : > { %4100 = vmatpush3.bf16.msra.mxu0 %v4097_v22 }
 0x5e6   : > { %4102 = vmatprep.subr.bf16.mxu0 %v4101_v23 }
 0x5e9   : > { %4104 = vmatpush3.bf16.msra.mxu0 %v4101_v23 }
 0x5ea   : > { %3877 = vmatprep.subr.mxu0 %v836_v58 }
 0x5ec   : > { %3866 = vmatmul.mubr.msk.f32.vlgmr.msra.gmra.mrb[36].mxu0 %vm1015_vm3, %v2191_v28 }
 0x5ed   : > { %3868 = vmatprep.mubr.msk.f32.mxu0 %vm1015_vm3, %v2192_v27  ;;  %3878 = vmatpush3.msra.mxu0 %v836_v58 }
 0x5f0   : > { %3869 = vmatmul.mubr.msk.f32.gmra.mrb[38].mxu0 %vm1015_vm3, %v2193_v14 }
 0x5f1   : > { %3871 = vmatprep.mubr.msk.f32.mxu0 %vm1015_vm3, %v2194_v36 }
 0x5f4   : > { %3872 = vmatmul.mubr.msk.f32.gmra.mrb[40].mxu0 %vm1015_vm3, %v2195_v49 }
 0x5f5   : > { %3874 = vmatprep.mubr.msk.f32.mxu0 %vm1015_vm3, %v2196_v42 }
 0x5f8   : > { %3875 = vmatmul.mubr.msk.f32.gmra.mrb[42].mxu0 %vm1015_vm3, %v2197_v25 }
 0x614   : > { %v2670_v1 = vpop.xlane.xlu0 %2669 }
 0x615   : > { %v2690_v4 = vsub.f32 %v5220_v7, %v2670_v1  ;;  %v2667_v20 = vpop.xlane.xlu1 %2666 }
 0x616   : > { %v2689_v63 = vsub.f32 %v5222_v2, %v2667_v20 }
 0x617   : > { %v2699_v18 = vmul.f32 1.442695, %v2690_v4 }
 0x618   : > { %v2697_v46 = vmul.f32 1.442695, %v2689_v63  ;;  %v2676_v6 = vpop.xlane.xlu0 %2675 }
 0x619   : > { %4430 = vpow2.f32 %v2699_v18  ;;  %v2692_v57 = vsub.f32 %v5228_v10, %v2676_v6  ;;  %v2673_v24 = vpop.xlane.xlu1 %2672 }
 0x61a   : > { %4432 = vpow2.f32 %v2697_v46  ;;  %v2691_v55 = vsub.f32 %v5230_v11, %v2673_v24 }
 0x61b   : > { %v2703_v30 = vmul.f32 1.442695, %v2692_v57 }
 0x61c   : > { %v2701_v8 = vmul.f32 1.442695, %v2691_v55  ;;  %v2682_v47 = vpop.xlane.xlu0 %2681 }
 0x61d   : > { %4434 = vpow2.f32 %v2703_v30  ;;  %v2694_v31 = vsub.f32 %v5236_v52, %v2682_v47  ;;  %v2679_v7 = vpop.xlane.xlu1 %2678 }
 0x61e   : > { %4436 = vpow2.f32 %v2701_v8  ;;  %v2693_v2 = vsub.f32 %v5238_v26, %v2679_v7  ;;  %v837_v8 = vld [vmem:[%s5458_s6 + $0x18] sm:$0xff] }
 0x61f   : > { %v2707_v61 = vmul.f32 1.442695, %v2694_v31 }
 0x620   : > { %v2705_v43 = vmul.f32 1.442695, %v2693_v2  ;;  %v2688_v50 = vpop.xlane.xlu0 %2687 }
 0x621   : > { %4438 = vpow2.f32 %v2707_v61  ;;  %v2696_v10 = vsub.f32 %v5244_v33, %v2688_v50  ;;  %v2685_v12 = vpop.xlane.xlu1 %2684 }
 0x622   : > { %4440 = vpow2.f32 %v2705_v43  ;;  %v2695_v11 = vsub.f32 %v5246_v45, %v2685_v12 }
 0x623   : > { %v5281_v17 = vpop.eup %4430  ;;  %v2711_v9 = vmul.f32 1.442695, %v2696_v10 }
 0x624   : > { %v5283_v29 = vpop.eup %4432  ;;  %v2709_v52 = vmul.f32 1.442695, %v2695_v11  ;;  %v2716_v35 = vsel %vm1015_vm3, %v5281_v17, 0.0 }
 0x625   : > { %4442 = vpow2.f32 %v2711_v9  ;;  %2717 = vadd.xlane.f32.xlu0 %v2716_v35  ;;  %v4316_v26 = vpop.permute.xlu1 %4315  ;;  %v2713_v37 = vsel %vm1015_vm3, %v5283_v29, 0.0 }
 0x626   : > { %v4318_v33 = vunpack.i.h.bf16 %v4316_v26  ;;  %v4317_v38 = vunpack.i.l.bf16 %v4316_v26  ;;  %2714 = vadd.xlane.f32.xlu1 %v2713_v37  ;;  %4444 = vpow2.f32 %v2709_v52 }
 0x627   : > { %v5289_v39 = vpop.eup %4434 }
 0x628   : > { %v5291_v45 = vpop.eup %4436  ;;  %v4129_v40 = vpack.c.bf16 %v4318_v33, %v4317_v38  ;;  %v2722_v41 = vsel %vm1015_vm3, %v5289_v39, 0.0 }
 0x629   : > { %2723 = vadd.xlane.f32.xlu0 %v2722_v41  ;;  %v2719_v44 = vsel %vm1015_vm3, %v5291_v45, 0.0  ;;  %v4478_v41 = vld [vmem:[%s4587_s27 + $0x8] sm:$0xff] }
 0x62a   : > { %2720 = vadd.xlane.f32.xlu1 %v2719_v44  ;;  %4130 = vmatprep.subr.bf16.mxu0 %v4129_v40 }
 0x62b   : > { %v5297_v54 = vpop.eup %4438 }
 0x62c   : > { %v5299_v51 = vpop.eup %4440  ;;  %v2728_v19 = vsel %vm1015_vm3, %v5297_v54, 0.0 }
 0x62d   : > { %2729 = vadd.xlane.f32.xlu0 %v2728_v19  ;;  %v2725_v32 = vsel %vm1015_vm3, %v5299_v51, 0.0 }
 0x62e   : > { %2726 = vadd.xlane.f32.xlu1 %v2725_v32 }
 0x62f   : > { %v5305_v5 = vpop.eup %4442 }
 0x630   : > { %v2734_v21 = vsel %vm1015_vm3, %v5305_v5, 0.0  ;;  %v5309_v22 = vpop.eup %4444 }
 0x631   : > { %2735 = vadd.xlane.f32.xlu0 %v2734_v21  ;;  %v2731_v56 = vsel %vm1015_vm3, %v5309_v22, 0.0  ;;  %v4480_v21 = vld [vmem:[%s4587_s27 + $0x18] sm:$0xff] }
 0x635   : > { %2732 = vadd.xlane.f32.xlu0 %v2731_v56 }
 0x63f   : > { %4325 = vrot.lane.b32.xlu1 %v4961_v59, %s4498_s11 }
 0x643   : > { %4330 = vrot.lane.b32.xlu1 %v4968_v53, %s4498_s11 }
 0x64b   : > { %4320 = vrot.lane.b32.xlu0 %v4965_v48, %s4498_s11 }
 0x6b2   : > { %v2718_v0 = vpop.xlane.xlu0 %2717 }
 0x6b3   : > { %v2715_v23 = vpop.xlane.xlu1 %2714 }
 0x6b4   : > { %4446 = vrcp.f32 %v2715_v23 }
 0x6b5   : > { %4448 = vrcp.f32 %v2718_v0  ;;  %v4481_v0 = vld [vmem:[%s4587_s27 + $0x10] sm:$0xff] }
 0x6b6   : > { %v2724_v60 = vpop.xlane.xlu0 %2723 }
 0x6b7   : > { %v2721_v58 = vpop.xlane.xlu1 %2720 }
 0x6b8   : > { %4450 = vrcp.f32 %v2721_v58 }
 0x6b9   : > { %4452 = vrcp.f32 %v2724_v60 }
 0x6ba   : > { %v2730_v62 = vpop.xlane.xlu0 %2729 }
 0x6bb   : > { %v2727_v28 = vpop.xlane.xlu1 %2726 }
 0x6bc   : > { %4454 = vrcp.f32 %v2727_v28 }
 0x6bd   : > { %4456 = vrcp.f32 %v2730_v62 }
 0x6be   : > { %v2736_v3 = vpop.xlane.xlu0 %2735  ;;  %v4447_v20 = vpop.eup %4446 }
 0x6bf   : > { %v3867_v27 = vpop.f32.mrb[36].mxu0  ;;  %v4326_v34 = vpop.permute.xlu1 %4325  ;;  %v2745_v24 = vmul.f32 %v4447_v20, %v5283_v29 }
 0x6c0   : > { %v2312_v13 = vpop.f32.mrb[37].mxu0  ;;  %v4328_v49 = vunpack.i.h.bf16 %v4326_v34  ;;  %v4327_v15 = vunpack.i.l.bf16 %v4326_v34  ;;  %v4449_v30 = vpop.eup %4448  ;;  %v4483_v34 = vld [vmem:[%s4587_s27 + $0x20] sm:$0xff] }
 0x6c1   : > { %3879 = vmatprep.mubr.msk.f32.mxu0 %vm853_vm1, %v2312_v13  ;;  %v2746_v31 = vmul.f32 %v4449_v30, %v5281_v17 }
 0x6c2   : > { %v2733_v14 = vpop.xlane.xlu0 %2732  ;;  %3880 = vmatmul.mubr.msk.f32.vlgmr.msra.gmra.mrb[20].mxu0 %vm853_vm1, %v3867_v27  ;;  %v4137_v63 = vpack.c.bf16 %v4328_v49, %v4327_v15  ;;  %v4451_v47 = vpop.eup %4450  ;;  %v4482_v27 = vld [vmem:[%s4587_s27 + $0x28] sm:$0xff]  ;;  %v4484_v15 = vld [vmem:[%s4587_s27 + $0x38] sm:$0xff] }
 0x6c3   : > { %4132 = vmatpush3.bf16.msra.mxu0 %v4129_v40  ;;  %v3870_v59 = vpop.f32.mrb[38].mxu0  ;;  %v4331_v42 = vpop.permute.xlu1 %4330  ;;  %4458 = vrcp.f32 %v2733_v14  ;;  %v2747_v2 = vmul.f32 %v4451_v47, %v5291_v45  ;;  %v3285_v40 = vld [vmem:[%s5459_s7] ss:$0 sm:$0xff] }
 0x6c4   : > { %v2322_v53 = vpop.f32.mrb[39].mxu0  ;;  %v4333_v18 = vunpack.i.h.bf16 %v4331_v42  ;;  %v4332_v46 = vunpack.i.l.bf16 %v4331_v42  ;;  %4460 = vrcp.f32 %v2736_v3  ;;  %v4453_v7 = vpop.eup %4452  ;;  %v846_v44 = vadd.f32 %v4478_v41, %v3285_v40 }
 0x6c5   : > { %3882 = vmatprep.mubr.msk.f32.mxu0 %vm853_vm1, %v2322_v53  ;;  %v2748_v43 = vmul.f32 %v4453_v7, %v5289_v39  ;;  %v847_v23 = vadd.f32 %v4481_v0, %v3285_v40  ;;  %v850_v13 = vadd.f32 %v4482_v27, %v3285_v40  ;;  %v852_v42 = vadd.f32 %v4484_v15, %v3285_v40 }
 0x6c6   : > { %v4321_v48 = vpop.permute.xlu0 %4320  ;;  %3883 = vmatmul.mubr.msk.f32.gmra.mrb[22].mxu0 %vm853_vm1, %v3870_v59  ;;  %v4141_v55 = vpack.c.bf16 %v4333_v18, %v4332_v46  ;;  %v4455_v61 = vpop.eup %4454  ;;  %v849_v59 = vadd.f32 %v4483_v34, %v3285_v40 }
 0x6c7   : > { %v4323_v36 = vunpack.i.h.bf16 %v4321_v48  ;;  %v4322_v16 = vunpack.i.l.bf16 %v4321_v48  ;;  %v3873_v1 = vpop.f32.mrb[40].mxu0  ;;  %v4457_v50 = vpop.eup %4456  ;;  %v2749_v10 = vmul.f32 %v4455_v61, %v5299_v51 }
 0x6c8   : > { %v2332_v4 = vpop.f32.mrb[41].mxu0  ;;  %v2750_v11 = vmul.f32 %v4457_v50, %v5297_v54  ;;  %v4479_v54 = vld [vmem:[%s4587_s27] sm:$0xff] }
 0x6c9   : > { %v4133_v25 = vpack.c.bf16 %v4323_v36, %v4322_v16  ;;  %3885 = vmatprep.mubr.msk.f32.mxu0 %vm853_vm1, %v2332_v4  ;;  %v845_v51 = vadd.f32 %v4479_v54, %v3285_v40 }
 0x6ca   : > { %3886 = vmatmul.mubr.msk.f32.gmra.mrb[24].mxu0 %vm853_vm1, %v3873_v1  ;;  %v4485_v1 = vld [vmem:[%s4587_s27 + $0x30] sm:$0xff] }
 0x6cb   : > { %4134 = vmatprep.subr.bf16.mxu0 %v4133_v25  ;;  %v3876_v6 = vpop.f32.mrb[42].mxu0  ;;  %v851_v4 = vadd.f32 %v4485_v1, %v3285_v40 }
 0x6cc   : > { %4136 = vmatpush3.bf16.msra.mxu0 %v4133_v25  ;;  %v2342_v57 = vpop.f32.mrb[43].mxu0 }
 0x6cd   : > { %4138 = vmatprep.subr.bf16.mxu0 %v4137_v63  ;;  %3888 = vmatprep.mubr.msk.f32.mxu0 %vm853_vm1, %v2342_v57  ;;  %v4459_v12 = vpop.eup %4458 }
 0x6ce   : > { %3889 = vmatmul.mubr.msk.f32.gmra.mrb[26].mxu0 %vm853_vm1, %v3876_v6  ;;  %v4461_v17 = vpop.eup %4460  ;;  %v2751_v9 = vmul.f32 %v4459_v12, %v5309_v22  ;;  %v848_v22 = vadd.f32 %v4480_v21, %v3285_v40 }
 0x6cf   : > { %3935 = vmatprep.mubr.msk.f32.mxu0 %vm1015_vm3, %v2745_v24  ;;  %v2752_v29 = vmul.f32 %v4461_v17, %v5305_v5 }
 0x6d0   : > { %4140 = vmatpush3.bf16.msra.mxu0 %v4137_v63 }
 0x6d1   : > { %4142 = vmatprep.subr.bf16.mxu0 %v4141_v55 }
 0x6d4   : > { %4144 = vmatpush3.bf16.msra.mxu0 %v4141_v55 }
 0x6d5   : > { %3947 = vmatprep.subr.mxu0 %v837_v8 }
 0x6d7   : > { %3936 = vmatmul.mubr.msk.f32.vlgmr.msra.gmra.mrb[44].mxu0 %vm1015_vm3, %v2746_v31 }
 0x6d8   : > { %3938 = vmatprep.mubr.msk.f32.mxu0 %vm1015_vm3, %v2747_v2  ;;  %3948 = vmatpush3.msra.mxu0 %v837_v8 }
 0x6db   : > { %3939 = vmatmul.mubr.msk.f32.gmra.mrb[46].mxu0 %vm1015_vm3, %v2748_v43 }
 0x6dc   : > { %3941 = vmatprep.mubr.msk.f32.mxu0 %vm1015_vm3, %v2749_v10 }
 0x6df   : > { %3942 = vmatmul.mubr.msk.f32.gmra.mrb[48].mxu0 %vm1015_vm3, %v2750_v11 }
 0x6e0   : > { %3944 = vmatprep.mubr.msk.f32.mxu0 %vm1015_vm3, %v2751_v9 }
 0x6e3   : > { %3945 = vmatmul.mubr.msk.f32.gmra.mrb[50].mxu0 %vm1015_vm3, %v2752_v29 }
 0x7aa   : > { %v3937_v52 = vpop.f32.mrb[44].mxu0 }
 0x7ab   : > { %v2867_v35 = vpop.f32.mrb[45].mxu0 }
 0x7ac   : > { %3949 = vmatprep.mubr.msk.f32.mxu0 %vm853_vm1, %v2867_v35 }
 0x7ad   : > { %3950 = vmatmul.mubr.msk.f32.vlgmr.msra.gmra.mrb[20].mxu0 %vm853_vm1, %v3937_v52 }
 0x7ae   : > { %v3940_v26 = vpop.f32.mrb[46].mxu0 }
 0x7af   : > { %v2877_v37 = vpop.f32.mrb[47].mxu0 }
 0x7b0   : > { %3952 = vmatprep.mubr.msk.f32.mxu0 %vm853_vm1, %v2877_v37 }
 0x7b1   : > { %3953 = vmatmul.mubr.msk.f32.gmra.mrb[22].mxu0 %vm853_vm1, %v3940_v26 }
 0x7b2   : > { %v3943_v33 = vpop.f32.mrb[48].mxu0 }
 0x7b3   : > { %v2887_v38 = vpop.f32.mrb[49].mxu0 }
 0x7b4   : > { %3955 = vmatprep.mubr.msk.f32.mxu0 %vm853_vm1, %v2887_v38 }
 0x7b5   : > { %3956 = vmatmul.mubr.msk.f32.gmra.mrb[24].mxu0 %vm853_vm1, %v3943_v33 }
 0x7b6   : > { %v3946_v39 = vpop.f32.mrb[50].mxu0 }
 0x7b7   : > { %v2897_v45 = vpop.f32.mrb[51].mxu0 }
 0x7b8   : > { %3958 = vmatprep.mubr.msk.f32.mxu0 %vm853_vm1, %v2897_v45 }
 0x7b9   : > { %3959 = vmatmul.mubr.msk.f32.gmra.mrb[26].mxu0 %vm853_vm1, %v3946_v39 }
 0x880   : > { %v3951_v19 = vpop.f32.mrb[20].mxu0 }
 0x881   : > { %v4149_v32 = vadd.f32 %v3951_v19, %v846_v44  ;;  %v2996_v5 = vpop.f32.mrb[21].mxu0 }
 0x882   : > { %v4150_v56 = vadd.f32 %v2996_v5, %v845_v51 }
 0x883   : > { %v3046_v60 = vsel %vm412_vm0, %v4149_v32, 0.0 }
 0x884   : > { %3047 = vadd.xlane.f32.xlu0 %v3046_v60  ;;  %v3954_v58 = vpop.f32.mrb[22].mxu0  ;;  %v3043_v62 = vsel %vm412_vm0, %v4150_v56, 0.0 }
 0x885   : > { %v4151_v28 = vadd.f32 %v3954_v58, %v848_v22  ;;  %3044 = vadd.xlane.f32.xlu1 %v3043_v62  ;;  %v3006_v3 = vpop.f32.mrb[23].mxu0 }
 0x886   : > { %v4152_v14 = vadd.f32 %v3006_v3, %v847_v23 }
 0x887   : > { %v3052_v53 = vsel %vm412_vm0, %v4151_v28, 0.0 }
 0x888   : > { %3053 = vadd.xlane.f32.xlu0 %v3052_v53  ;;  %v3957_v48 = vpop.f32.mrb[24].mxu0  ;;  %v3049_v36 = vsel %vm412_vm0, %v4152_v14, 0.0 }
 0x889   : > { %v4153_v16 = vadd.f32 %v3957_v48, %v850_v13  ;;  %3050 = vadd.xlane.f32.xlu1 %v3049_v36  ;;  %v3016_v49 = vpop.f32.mrb[25].mxu0 }
 0x88a   : > { %v4154_v25 = vadd.f32 %v3016_v49, %v849_v59 }
 0x88b   : > { %v3058_v20 = vsel %vm412_vm0, %v4153_v16, 0.0 }
 0x88c   : > { %3059 = vadd.xlane.f32.xlu0 %v3058_v20  ;;  %v3960_v63 = vpop.f32.mrb[26].mxu0  ;;  %v3055_v18 = vsel %vm412_vm0, %v4154_v25, 0.0 }
 0x88d   : > { %v4155_v46 = vadd.f32 %v3960_v63, %v852_v42  ;;  %3056 = vadd.xlane.f32.xlu1 %v3055_v18  ;;  %v3026_v6 = vpop.f32.mrb[27].mxu0 }
 0x88e   : > { %v4156_v57 = vadd.f32 %v3026_v6, %v851_v4 }
 0x88f   : > { %v3064_v24 = vsel %vm412_vm0, %v4155_v46, 0.0 }
 0x890   : > { %3065 = vadd.xlane.f32.xlu0 %v3064_v24  ;;  %v3061_v55 = vsel %vm412_vm0, %v4156_v57, 0.0 }
 0x891   : > { %3062 = vadd.xlane.f32.xlu1 %v3061_v55  ;;  %v3414_v55 = vld [vmem:[%s5460_s8] ss:$0 sm:$0xff] }
 0x911   : > { %v3048_v30 = vpop.xlane.xlu0 %3047 }
 0x912   : > { %v3069_v8 = vmul.f32 0.03125, %v3048_v30  ;;  %v3045_v47 = vpop.xlane.xlu1 %3044 }
 0x913   : > { %v3068_v31 = vmul.f32 0.03125, %v3045_v47 }
 0x914   : > { %v5373_v7 = vsub.f32 %v4149_v32, %v3069_v8 }
 0x915   : > { %v5375_v2 = vsub.f32 %v4150_v56, %v3068_v31  ;;  %v3054_v61 = vpop.xlane.xlu0 %3053 }
 0x916   : > { %v3071_v43 = vmul.f32 0.03125, %v3054_v61  ;;  %v3051_v50 = vpop.xlane.xlu1 %3050  ;;  %v3085_v10 = vmul.f32 %v5373_v7, %v5373_v7  ;;  %v3415_v61 = vld [vmem:[%s5460_s8 + $0x1] ss:$0 sm:$0xff] }
 0x917   : > { %v3070_v12 = vmul.f32 0.03125, %v3051_v50  ;;  %v3084_v11 = vmul.f32 %v5375_v2, %v5375_v2 }
 0x918   : > { %v5381_v17 = vsub.f32 %v4151_v28, %v3071_v43  ;;  %v3095_v9 = vsel %vm412_vm0, %v3085_v10, 0.0 }
 0x919   : > { %v5384_v29 = vsub.f32 %v4152_v14, %v3070_v12  ;;  %v3060_v52 = vpop.xlane.xlu0 %3059  ;;  %3096 = vadd.xlane.f32.xlu0 %v3095_v9  ;;  %v3092_v35 = vsel %vm412_vm0, %v3084_v11, 0.0 }
 0x91a   : > { %v3073_v26 = vmul.f32 0.03125, %v3060_v52  ;;  %v3057_v37 = vpop.xlane.xlu1 %3056  ;;  %3093 = vadd.xlane.f32.xlu1 %v3092_v35  ;;  %v3087_v33 = vmul.f32 %v5381_v17, %v5381_v17 }
 0x91b   : > { %v3072_v38 = vmul.f32 0.03125, %v3057_v37  ;;  %v3086_v39 = vmul.f32 %v5384_v29, %v5384_v29 }
 0x91c   : > { %v5391_v45 = vsub.f32 %v4153_v16, %v3073_v26  ;;  %v3101_v40 = vsel %vm412_vm0, %v3087_v33, 0.0 }
 0x91d   : > { %v5394_v41 = vsub.f32 %v4154_v25, %v3072_v38  ;;  %3102 = vadd.xlane.f32.xlu0 %v3101_v40  ;;  %v3066_v44 = vpop.xlane.xlu0 %3065  ;;  %v3098_v54 = vsel %vm412_vm0, %v3086_v39, 0.0 }
 0x91e   : > { %v3075_v51 = vmul.f32 0.03125, %v3066_v44  ;;  %3099 = vadd.xlane.f32.xlu1 %v3098_v54  ;;  %v3063_v19 = vpop.xlane.xlu1 %3062  ;;  %v3089_v32 = vmul.f32 %v5391_v45, %v5391_v45 }
 0x91f   : > { %v3074_v5 = vmul.f32 0.03125, %v3063_v19  ;;  %v3088_v21 = vmul.f32 %v5394_v41, %v5394_v41 }
 0x920   : > { %v5401_v22 = vsub.f32 %v4155_v46, %v3075_v51  ;;  %v3107_v56 = vsel %vm412_vm0, %v3089_v32, 0.0 }
 0x921   : > { %v5404_v0 = vsub.f32 %v4156_v57, %v3074_v5  ;;  %3108 = vadd.xlane.f32.xlu0 %v3107_v56  ;;  %v3104_v23 = vsel %vm412_vm0, %v3088_v21, 0.0 }
 0x922   : > { %3105 = vadd.xlane.f32.xlu1 %v3104_v23  ;;  %v3091_v60 = vmul.f32 %v5401_v22, %v5401_v22 }
 0x923   : > { %v3090_v58 = vmul.f32 %v5404_v0, %v5404_v0 }
 0x924   : > { %v3113_v62 = vsel %vm412_vm0, %v3091_v60, 0.0 }
 0x925   : > { %3114 = vadd.xlane.f32.xlu0 %v3113_v62  ;;  %v3110_v28 = vsel %vm412_vm0, %v3090_v58, 0.0 }
 0x926   : > { %3111 = vadd.xlane.f32.xlu1 %v3110_v28 }
 0x9a6   : > { %v3097_v3 = vpop.xlane.xlu0 %3096 }
 0x9a7   : > { %v3117_v27 = vmul.f32 0.03125, %v3097_v3  ;;  %v3094_v13 = vpop.xlane.xlu1 %3093 }
 0x9a8   : > { %v3116_v14 = vmul.f32 0.03125, %v3094_v13 }
 0x9a9   : > { %v3125_v34 = vadd.f32 1e-05, %v3117_v27 }
 0x9aa   : > { %v3124_v59 = vadd.f32 1e-05, %v3116_v14  ;;  %v3103_v53 = vpop.xlane.xlu0 %3102 }
 0x9ab   : > { %4462 = vrsqrt.f32 %v3125_v34  ;;  %v3119_v48 = vmul.f32 0.03125, %v3103_v53  ;;  %v3100_v36 = vpop.xlane.xlu1 %3099 }
 0x9ac   : > { %4464 = vrsqrt.f32 %v3124_v59  ;;  %v3118_v16 = vmul.f32 0.03125, %v3100_v36 }
 0x9ad   : > { %v3127_v49 = vadd.f32 1e-05, %v3119_v48 }
 0x9ae   : > { %v3126_v15 = vadd.f32 1e-05, %v3118_v16  ;;  %v3109_v42 = vpop.xlane.xlu0 %3108 }
 0x9af   : > { %4466 = vrsqrt.f32 %v3127_v49  ;;  %v3121_v25 = vmul.f32 0.03125, %v3109_v42  ;;  %v3106_v1 = vpop.xlane.xlu1 %3105 }
 0x9b0   : > { %4468 = vrsqrt.f32 %v3126_v15  ;;  %v3120_v4 = vmul.f32 0.03125, %v3106_v1 }
 0x9b1   : > { %v3129_v20 = vadd.f32 1e-05, %v3121_v25 }
 0x9b2   : > { %v3128_v63 = vadd.f32 1e-05, %v3120_v4  ;;  %v3115_v18 = vpop.xlane.xlu0 %3114 }
 0x9b3   : > { %4470 = vrsqrt.f32 %v3129_v20  ;;  %v3123_v46 = vmul.f32 0.03125, %v3115_v18  ;;  %v3112_v6 = vpop.xlane.xlu1 %3111 }
 0x9b4   : > { %4472 = vrsqrt.f32 %v3128_v63  ;;  %v3122_v57 = vmul.f32 0.03125, %v3112_v6 }
 0x9b5   : > { %v4463_v24 = vpop.eup %4462  ;;  %v3131_v30 = vadd.f32 1e-05, %v3123_v46 }
 0x9b6   : > { %v4465_v8 = vpop.eup %4464  ;;  %v3141_v47 = vmul.f32 %v4463_v24, %v5373_v7  ;;  %v3130_v31 = vadd.f32 1e-05, %v3122_v57 }
 0x9b7   : > { %v3140_v43 = vmul.f32 %v4465_v8, %v5375_v2  ;;  %4474 = vrsqrt.f32 %v3131_v30 }
 0x9b8   : > { %v3154_v50 = vmul.f32 %v3414_v55, %v3141_v47  ;;  %4476 = vrsqrt.f32 %v3130_v31 }
 0x9b9   : > { %v4467_v10 = vpop.eup %4466  ;;  %v3153_v12 = vmul.f32 %v3414_v55, %v3140_v43 }
 0x9ba   : > { %v4469_v7 = vpop.eup %4468  ;;  %v3167_v11 = vadd.f32 %v3415_v61, %v3154_v50  ;;  %v3143_v9 = vmul.f32 %v4467_v10, %v5381_v17 }
 0x9bb   : > { %v3166_v52 = vadd.f32 %v3415_v61, %v3153_v12  ;;  %v3142_v2 = vmul.f32 %v4469_v7, %v5384_v29 }
 0x9bc   : > { %3175 = vst.msk [vmem:[%s5425_s12 + $0x8] sm:$0xff] %vm412_vm0, %v3167_v11  ;;  %v3156_v35 = vmul.f32 %v3414_v55, %v3143_v9 }
 0x9bd   : > { %v4471_v26 = vpop.eup %4470  ;;  %3174 = vst.msk [vmem:[%s5425_s12] sm:$0xff] %vm412_vm0, %v3166_v52  ;;  %v3155_v37 = vmul.f32 %v3414_v55, %v3142_v2 }
 0x9be   : > { %v4473_v33 = vpop.eup %4472  ;;  %v3169_v38 = vadd.f32 %v3415_v61, %v3156_v35  ;;  %v3145_v39 = vmul.f32 %v4471_v26, %v5391_v45 }
 0x9bf   : > { %v3168_v40 = vadd.f32 %v3415_v61, %v3155_v37  ;;  %v3144_v17 = vmul.f32 %v4473_v33, %v5394_v41 }
 0x9c0   : > { %3177 = vst.msk [vmem:[%s5425_s12 + $0x18] sm:$0xff] %vm412_vm0, %v3169_v38  ;;  %v3158_v29 = vmul.f32 %v3414_v55, %v3145_v39 }
 0x9c1   : > { %v4475_v44 = vpop.eup %4474  ;;  %3176 = vst.msk [vmem:[%s5425_s12 + $0x10] sm:$0xff] %vm412_vm0, %v3168_v40  ;;  %v3157_v54 = vmul.f32 %v3414_v55, %v3144_v17 }
 0x9c2   : > { %v4477_v51 = vpop.eup %4476  ;;  %v3171_v19 = vadd.f32 %v3415_v61, %v3158_v29  ;;  %v3147_v32 = vmul.f32 %v4475_v44, %v5401_v22 }
 0x9c3   : > { %v3170_v5 = vadd.f32 %v3415_v61, %v3157_v54  ;;  %v3146_v21 = vmul.f32 %v4477_v51, %v5404_v0 }
 0x9c4   : > { %3179 = vst.msk [vmem:[%s5425_s12 + $0x28] sm:$0xff] %vm412_vm0, %v3171_v19  ;;  %v3160_v45 = vmul.f32 %v3414_v55, %v3147_v32 }
 0x9c5   : > { %3178 = vst.msk [vmem:[%s5425_s12 + $0x20] sm:$0xff] %vm412_vm0, %v3170_v5  ;;  %v3159_v41 = vmul.f32 %v3414_v55, %v3146_v21 }
 0x9c6   : > { %v3173_v56 = vadd.f32 %v3415_v61, %v3160_v45 }
 0x9c7   : > { %v3172_v23 = vadd.f32 %v3415_v61, %v3159_v41 }
 0x9c8   : > { %3181 = vst.msk [vmem:[%s5425_s12 + $0x38] sm:$0xff] %vm412_vm0, %v3173_v56 }
 0x9c9   : > { %3180 = vst.msk [vmem:[%s5425_s12 + $0x30] sm:$0xff] %vm412_vm0, %v3172_v23 }
 0x9ca PF: > { %s19_s30 = sadd.s32 1, %s4492_s30  }
 0x9cb   : > { %p16_p4 = scmp.ge.s32.totalorder %s19_s30, 4  }
 0x9cd   :  { %18 = sbr.rel (!%p16_p4) target bundleno = 1 (0x1), region = 89 }

// kernel: detr_forward.19
= control target key start
LH: loop header
LB: loop body
LE: loop exit
PB: predicated region body
PF: predicated region fallthrough
CT: control target
= control target key end

     0   :  { %s976_s13 = smov 0   ;;  %s1073_s0 = inlined_call_operand.vmem [shape: f32[16,32], index: 0, kind: input, shape index: {}]   ;;  %s1074_s1 = inlined_call_operand.vmem [shape: f32[2,32], index: 1, kind: input, shape index: {}]   ;;  %s1075_s2 = inlined_call_operand.vmem [shape: f32[32,128], index: 2, kind: input, shape index: {}]   ;;  %s1076_s3 = inlined_call_operand.vmem [shape: f32[1,128], index: 3, kind: input, shape index: {}]   ;;  %s1077_s4 = inlined_call_operand.vmem [shape: f32[32,32], index: 4, kind: input, shape index: {}]   ;;  %s1078_s5 = inlined_call_operand.vmem [shape: f32[1,32], index: 5, kind: input, shape index: {}]   ;;  %s1079_s6 = inlined_call_operand.vmem [shape: f32[32,32], index: 6, kind: input, shape index: {}]   ;;  %s1080_s7 = inlined_call_operand.vmem [shape: f32[1,32], index: 7, kind: input, shape index: {}]   ;;  %s1081_s8 = inlined_call_operand.vmem [shape: f32[32,128], index: 8, kind: input, shape index: {}]   ;;  %s1082_s9 = inlined_call_operand.vmem [shape: f32[1,128], index: 9, kind: input, shape index: {}]   ;;  %s1083_s10 = inlined_call_operand.vmem [shape: f32[16,256], index: 10, kind: output, shape index: {}]  }
   0x1 LB: > { %s783_s14 = sadd.s32 4294967295, %s916_s13   ;;  %p787_p0 = scmp.ge.s32.totalorder %s916_s13, 1  ;;  %s916_s13 = sphi %s976_s13, %s20_s13  }
   0x2   : > { %p311_p1 = scmp.lt.s32.totalorder %s916_s13, 3 }
   0x4   : > { %p312_p2 = pnand %p787_p0, %p311_p1 }
   0x5   : > { %p348_p3 = scmp.lt.s32.totalorder (!%p312_p2), %s783_s14, 1  ;;  %vm358_vm0 = vcmask (!%p312_p2), 261120   ;;  %v385_v7 = vld [vmem:[%s1075_s2] sm:$0xff] (!%p312_p2)  ;;  %v386_v8 = vld [vmem:[%s1075_s2 + $0x8] sm:$0xff] (!%p312_p2)  ;;  %v918_v10 = vmov (!%p312_p2), 0.0|0.0   ;;  %v387_v13 = vld [vmem:[%s1075_s2 + $0x10] sm:$0xff] (!%p312_p2) }
   0x6   : > { %315 = sbr.rel (%p312_p2) target bundleno = 1003 (0x3eb), region = 60  ;;  %v469_v9 = vld [vmem:[%s1077_s4] sm:$0xff] (!%p312_p2)  ;;  %869 = vmatprep.subr.bf16.mxu0 (!%p312_p2), %v918_v10  ;;  %875 = vmatprep.subr.bf16.mxu1 (!%p312_p2), %v918_v10  ;;  %v870_v11 = vpack.c.bf16 (!%p312_p2), %v386_v8, %v385_v7  ;;  %v470_v12 = vld [vmem:[%s1077_s4 + $0x8] sm:$0xff] (!%p312_p2)  ;;  %v388_v14 = vld [vmem:[%s1075_s2 + $0x18] sm:$0xff] (!%p312_p2)  ;;  %vm919_vm1 = vmmov (!%p312_p2), 0   ;;  %v920_v18 = vmov (!%p312_p2), 0.0  }
   0x7   : > { %v876_v15 = vpack.c.bf16 (!%p312_p2), %v470_v12, %v469_v9  ;;  %v471_v16 = vld [vmem:[%s1077_s4 + $0x10] sm:$0xff] (!%p312_p2)  ;;  %v472_v17 = vld [vmem:[%s1077_s4 + $0x18] sm:$0xff] (!%p312_p2)  ;;  %833 = vmatprep.mubr.msk.f32.mxu0 (!%p312_p2), %vm919_vm1, %v920_v18  ;;  %844 = vmatprep.mubr.msk.f32.mxu1 (!%p312_p2), %vm919_vm1, %v920_v18  ;;  %v873_v19 = vpack.c.bf16 (!%p312_p2), %v388_v14, %v387_v13  ;;  %v791_v25 = vld [vmem:[%s1074_s1] ss:$0 sm:$0xff] (!%p312_p2) }
   0x8   : > { %871 = vmatpush3.bf16.msra.mxu0 (!%p312_p2), %v870_v11  ;;  %v879_v20 = vpack.c.bf16 (!%p312_p2), %v472_v17, %v471_v16  ;;  %v551_v27 = vld [vmem:[%s1079_s6] sm:$0xff] (!%p312_p2)  ;;  %v552_v28 = vld [vmem:[%s1079_s6 + $0x8] sm:$0xff] (!%p312_p2)  ;;  %v553_v33 = vld [vmem:[%s1079_s6 + $0x10] sm:$0xff] (!%p312_p2) }
   0x9   : > { %877 = vmatpush3.bf16.msra.mxu1 (!%p312_p2), %v876_v15  ;;  %872 = vmatprep.subr.bf16.mxu0 (!%p312_p2), %v918_v10  ;;  %v792_v29 = vld [vmem:[%s1074_s1 + $0x1] ss:$0 sm:$0xff] (!%p312_p2)  ;;  %v882_v31 = vpack.c.bf16 (!%p312_p2), %v552_v28, %v551_v27  ;;  %v554_v34 = vld [vmem:[%s1079_s6 + $0x18] sm:$0xff] (!%p312_p2)  ;;  %v637_v37 = vld [vmem:[%s1081_s8 + $0x8] sm:$0xff] (!%p312_p2) }
   0xa   : > { %878 = vmatprep.subr.bf16.mxu1 (!%p312_p2), %v918_v10  ;;  %v885_v35 = vpack.c.bf16 (!%p312_p2), %v554_v34, %v553_v33  ;;  %v636_v36 = vld [vmem:[%s1081_s8] sm:$0xff] (!%p312_p2)  ;;  %v638_v48 = vld [vmem:[%s1081_s8 + $0x10] sm:$0xff] (!%p312_p2)  ;;  %v639_v49 = vld [vmem:[%s1081_s8 + $0x18] sm:$0xff] (!%p312_p2) }
   0xb   : > { %v888_v38 = vpack.c.bf16 (!%p312_p2), %v637_v37, %v636_v36  ;;  %v793_v39 = vld [vmem:[%s1076_s3] ss:$0 sm:$0xff] (!%p312_p2)  ;;  %v891_v50 = vpack.c.bf16 (!%p312_p2), %v639_v49, %v638_v48 }
   0xc   : > { %874 = vmatpush3.bf16.msra.mxu0 (!%p312_p2), %v873_v19  ;;  %v795_v40 = vld [vmem:[%s1078_s5] ss:$0 sm:$0xff] (!%p312_p2) }
   0xd   : > { %s1085_s14 = smov (!%p348_p3, %s783_s14), 1  ;;  %880 = vmatpush3.bf16.msra.mxu1 %v879_v20  ;;  %881 = vmatprep.subr.bf16.mxu0 %v918_v10  ;;  %v797_v51 = vld [vmem:[%s1080_s7] ss:$0 sm:$0xff] }
   0xe   : > { %s788_s15 = sshll.u32 %s1085_s14, 3  ;;  %887 = vmatprep.subr.bf16.mxu1 %v918_v10  ;;  %v799_v56 = vld [vmem:[%s1082_s9] ss:$0 sm:$0xff] }
   0xf   : > { %s351_s18 = scalar_lea.vmem %s1073_s0, %s788_s15  ;;  %s804_s15 = sshll.u32 %s1085_s14, 4 }
  0x10   : > { %v357_v0 = vld [vmem:[%s351_s18] sm:$0xff]  ;;  %s356_s22 = scalar_lea.vmem %s1083_s10, %s804_s15 }
  0x11   : > { %v359_v1 = vsel %vm358_vm0, %v357_v0, 0.0 }
  0x12   : > { %360 = vadd.xlane.f32.xlu0 %v359_v1 }
  0x9f   : > { %v361_v2 = vpop.xlane.xlu0 %360 }
  0xa0   : > { %v363_v3 = vmul.f32 0.03125, %v361_v2 }
  0xa2   : > { %v364_v4 = vsub.f32 %v357_v0, %v363_v3 }
  0xa4   : > { %v365_v5 = vmul.f32 %v364_v4, %v364_v4 }
  0xa6   : > { %v366_v6 = vsel %vm358_vm0, %v365_v5, 0.0 }
  0xa7   : > { %367 = vadd.xlane.f32.xlu0 %v366_v6 }
 0x134   : > { %v368_v21 = vpop.xlane.xlu0 %367 }
 0x135   : > { %v369_v22 = vmul.f32 0.03125, %v368_v21 }
 0x137   : > { %v370_v23 = vadd.f32 1e-05, %v369_v22 }
 0x139   : > { %904 = vrsqrt.f32 %v370_v23 }
 0x143   : > { %v905_v24 = vpop.eup %904 }
 0x144   : > { %v372_v26 = vmul.f32 %v905_v24, %v364_v4 }
 0x146   : > { %v378_v30 = vmul.f32 %v791_v25, %v372_v26 }
 0x148   : > { %v384_v32 = vadd.f32 %v792_v29, %v378_v30 }
 0x14a   : > { %834 = vmatmul.mubr.msk.f32.vlgmr.msra.gmra.mrb[0].mxu0 %vm358_vm0, %v384_v32  ;;  %845 = vmatmul.mubr.msk.f32.vlgmr.msra.gmra.mrb[0].mxu1 %vm358_vm0, %v384_v32 }
 0x14b   : > { %883 = vmatpush3.bf16.msra.mxu0 %v882_v31  ;;  %855 = vmatprep.mubr.msk.f32.mxu0 %vm919_vm1, %v920_v18 }
 0x14c   : > { %884 = vmatprep.subr.bf16.mxu0 %v918_v10  ;;  %866 = vmatprep.mubr.msk.f32.mxu1 %vm919_vm1, %v920_v18 }
 0x14d   : > { %889 = vmatpush3.bf16.msra.mxu1 %v888_v38 }
 0x14e   : > { %890 = vmatprep.subr.bf16.mxu1 %v918_v10 }
 0x14f   : > { %886 = vmatpush3.bf16.msra.mxu0 %v885_v35 }
 0x151   : > { %892 = vmatpush3.bf16.msra.mxu1 %v891_v50 }
 0x21d   : > { %v465_v41 = vpop.f32.mrb[0].mxu0  ;;  %v546_v42 = vpop.f32.mrb[0].mxu1 }
 0x21e   : > { %v466_v43 = vadd.f32 %v793_v39, %v465_v41  ;;  %v547_v44 = vadd.f32 %v795_v40, %v546_v42  ;;  %v835_v45 = vpop.f32.mrb[1].mxu0  ;;  %v846_v46 = vpop.f32.mrb[1].mxu1 }
 0x220   : > { %726 = vst [vmem:[%s356_s22] sm:$0xff] %v466_v43  ;;  %v550_v47 = vmax.f32 %v547_v44, 0.0 }
 0x222   : > { %856 = vmatmul.mubr.msk.f32.vlgmr.msra.gmra.mrb[2].mxu0 %vm358_vm0, %v550_v47 }
 0x2f5   : > { %v631_v52 = vpop.f32.mrb[2].mxu0 }
 0x2f6   : > { %v632_v53 = vadd.f32 %v797_v51, %v631_v52  ;;  %v857_v54 = vpop.f32.mrb[3].mxu0 }
 0x2f8   : > { %v635_v55 = vmax.f32 %v632_v53, 0.0 }
 0x2fa   : > { %867 = vmatmul.mubr.msk.f32.vlgmr.msra.gmra.mrb[2].mxu1 %vm358_vm0, %v635_v55 }
 0x3cd   : > { %v716_v57 = vpop.f32.mrb[2].mxu1 }
 0x3ce   : > { %v717_v58 = vadd.f32 %v799_v56, %v716_v57  ;;  %v868_v59 = vpop.f32.mrb[3].mxu1 }
 0x3d0   : > { %v801_v60 = vmul.f32 -1.442695, %v717_v58 }
 0x3d2   : > { %906 = vpow2.f32 %v801_v60 }
 0x3dc   : > { %v907_v61 = vpop.eup %906 }
 0x3dd   : > { %v723_v62 = vadd.f32 1.0, %v907_v61 }
 0x3df   : > { %908 = vrcp.f32 %v723_v62 }
 0x3e9   : > { %v909_v63 = vpop.eup %908 }
 0x3ea   : > { %727 = vst [vmem:[%s356_s22 + $0x8] sm:$0xff] %v909_v63 }
 0x3eb PF: > { %s20_s13 = sadd.s32 1, %s916_s13  }
 0x3ec   : > { %p17_p4 = scmp.ge.s32.totalorder %s20_s13, 4  }
 0x3ee   :  { %19 = sbr.rel (!%p17_p4) target bundleno = 1 (0x1), region = 90 }

// kernel: detr_forward.14
= control target key start
LH: loop header
LB: loop body
LE: loop exit
PB: predicated region body
PF: predicated region fallthrough
CT: control target
= control target key end

     0   :  { %s2779_s30 = smov 0   ;;  %s3143_s0 = inlined_call_operand.vmem [shape: f32[2,8,32], index: 0, kind: input, shape index: {}]   ;;  %s3144_s1 = inlined_call_operand.vmem [shape: f32[1,8,32], index: 1, kind: input, shape index: {}]   ;;  %s3145_s2 = inlined_call_operand.vmem [shape: f32[2,64,32], index: 2, kind: input, shape index: {}]   ;;  %s3146_s3 = inlined_call_operand.vmem [shape: f32[1,64,32], index: 3, kind: input, shape index: {}]   ;;  %s3147_s4 = inlined_call_operand.vmem [shape: f32[32,96], index: 4, kind: input, shape index: {}]   ;;  %s3148_s5 = inlined_call_operand.vmem [shape: f32[1,96], index: 5, kind: input, shape index: {}]   ;;  %s3149_s6 = inlined_call_operand.vmem [shape: f32[32,32], index: 6, kind: input, shape index: {}]   ;;  %s3150_s7 = inlined_call_operand.vmem [shape: f32[1,32], index: 7, kind: input, shape index: {}]   ;;  %s3151_s8 = inlined_call_operand.vmem [shape: f32[2,32], index: 8, kind: input, shape index: {}]   ;;  %s3152_s9 = inlined_call_operand.vmem [shape: f32[2,8,32], index: 9, kind: output, shape index: {}]  }
   0x1 LB: > { %s1989_s10 = sadd.s32 4294967295, %s2719_s30   ;;  %p1993_p0 = scmp.ge.s32.totalorder %s2719_s30, 1  ;;  %s2719_s30 = sphi %s2779_s30, %s19_s30  }
   0x2   : > { %p296_p1 = scmp.lt.s32.totalorder %s2719_s30, 3 }
   0x4   : > { %p297_p2 = pnand %p1993_p0, %p296_p1 }
   0x5   : > { %v375_v0 = vld [vmem:[%s3147_s4] sm:$0xff] (!%p297_p2)  ;;  %v376_v1 = vld [vmem:[%s3147_s4 + $0x8] sm:$0xff] (!%p297_p2)  ;;  %v377_v2 = vld [vmem:[%s3147_s4 + $0x10] sm:$0xff] (!%p297_p2)  ;;  %p335_p3 = scmp.lt.s32.totalorder (!%p297_p2), %s1989_s10, 1  ;;  %s2721_s19 = smov (!%p297_p2), 96   ;;  %vm386_vm0 = vcmask (!%p297_p2), 261120  }
   0x6   : > { %300 = sbr.rel (%p297_p2) target bundleno = 3224 (0xc98), region = 56  ;;  %v2796_v3 = vpack.i.bf16 (!%p297_p2), %v376_v1, %v375_v0  ;;  %v378_v4 = vld [vmem:[%s3147_s4 + $0x18] sm:$0xff] (!%p297_p2)  ;;  %v359_v6 = vld [vmem:[%s3146_s3] sm:$0xff] (!%p297_p2)  ;;  %v2399_v9 = vpack.c.bf16 (!%p297_p2), %v376_v1, %v375_v0  ;;  %v2722_v11 = vmov (!%p297_p2), 0.0|0.0   ;;  %vm2723_vm1 = vmmov (!%p297_p2), 0   ;;  %v360_v25 = vld [vmem:[%s3146_s3 + $0x8] sm:$0xff] (!%p297_p2) }
   0x7   : > { %v2804_v5 = vpack.i.bf16 (!%p297_p2), %v378_v4, %v377_v2  ;;  %v2822_v10 = vld [vmem:[%s3148_s5] ss:$0 sm:$0xff] (!%p297_p2)  ;;  %2398 = vmatprep.subr.bf16.mxu0 (!%p297_p2), %v2722_v11  ;;  %v2402_v12 = vpack.c.bf16 (!%p297_p2), %v378_v4, %v377_v2  ;;  %v2724_v13 = vmov (!%p297_p2), 0.0   ;;  %v361_v28 = vld [vmem:[%s3146_s3 + $0x10] sm:$0xff] (!%p297_p2)  ;;  %v362_v32 = vld [vmem:[%s3146_s3 + $0x18] sm:$0xff] (!%p297_p2)  ;;  %vm764_vm2 = vcmask (!%p297_p2), 64512  }
   0x8   : > { %2556 = vrot.lane.b32.xlu0 (!%p297_p2), %v2796_v3, %s2721_s19  ;;  %476 = vrot.lane.b32.xlu1 (!%p297_p2), %v2822_v10, %s2721_s19  ;;  %v357_v15 = vld [vmem:[%s3144_s1] sm:$0xff] (!%p297_p2)  ;;  %v364_v38 = vld [vmem:[%s3146_s3 + $0x28] sm:$0xff] (!%p297_p2)  ;;  %vm2907_vm3 = vmpackc.low (!%p297_p2), %vm764_vm2, %vm764_vm2  ;;  %vm863_vm4 = vcmask (!%p297_p2), 523264   ;;  %s2727_s15 = smov (!%p297_p2), 112   ;;  %s2728_s16 = smov (!%p297_p2), 104  }
   0x9   : > { %2400 = vmatpush3.bf16.msra.mxu0 (!%p297_p2), %v2399_v9  ;;  %2183 = vmatprep.mubr.msk.f32.mxu0 (!%p297_p2), %vm2723_vm1, %v2724_v13  ;;  %v363_v34 = vld [vmem:[%s3146_s3 + $0x20] sm:$0xff] (!%p297_p2)  ;;  %v365_v40 = vld [vmem:[%s3146_s3 + $0x30] sm:$0xff] (!%p297_p2)  ;;  %v366_v44 = vld [vmem:[%s3146_s3 + $0x38] sm:$0xff] (!%p297_p2) }
   0xa   : > { %2401 = vmatprep.subr.bf16.mxu0 (!%p297_p2), %v2722_v11 }
   0xc   : > { %2561 = vrot.lane.b32.xlu0 (!%p297_p2), %v2804_v5, %s2721_s19 }
   0xd   : > { %s3156_s10 = smov (!%p335_p3, %s1989_s10), 1  ;;  %2403 = vmatpush3.bf16.msra.mxu0 %v2402_v12 }
   0xe   : > { %s2065_s20 = sshll.u32 %s3156_s10, 6  ;;  %s1994_s26 = sshll.u32 %s3156_s10, 3 }
   0xf   : > { %s2813_s25 = scalar_lea.vmem %s3145_s2, %s2065_s20  ;;  %s338_s12 = scalar_lea.vmem %s3143_s0, %s1994_s26 }
  0x10   : > { %v349_v7 = vld [vmem:[%s2813_s25] sm:$0xff]  ;;  %v2843_v24 = vld [vmem:[%s2813_s25 + $0x8] sm:$0xff]  ;;  %v2849_v27 = vld [vmem:[%s2813_s25 + $0x10] sm:$0xff]  ;;  %s347_s13 = scalar_lea.vmem %s3152_s9, %s1994_s26 }
  0x11   : > { %v367_v8 = vadd.f32 %v359_v6, %v349_v7  ;;  %v2833_v14 = vld [vmem:[%s338_s12] sm:$0xff]  ;;  %v368_v29 = vadd.f32 %v360_v25, %v2843_v24  ;;  %v369_v30 = vadd.f32 %v361_v28, %v2849_v27  ;;  %v2857_v31 = vld [vmem:[%s2813_s25 + $0x18] sm:$0xff]  ;;  %v2874_v37 = vld [vmem:[%s2813_s25 + $0x28] sm:$0xff]  ;;  %s2725_s12 = smov 64  }
  0x12   : > { %v358_v16 = vadd.f32 %v357_v15, %v2833_v14  ;;  %v2863_v33 = vld [vmem:[%s2813_s25 + $0x20] sm:$0xff]  ;;  %v370_v35 = vadd.f32 %v362_v32, %v2857_v31  ;;  %v2880_v39 = vld [vmem:[%s2813_s25 + $0x30] sm:$0xff]  ;;  %v372_v41 = vadd.f32 %v364_v38, %v2874_v37  ;;  %v2890_v43 = vld [vmem:[%s2813_s25 + $0x38] sm:$0xff]  ;;  %2566 = vrot.lane.b32.xlu1 %v2796_v3, %s2725_s12  ;;  %s2726_s25 = smov 120  }
  0x13   : > { %2194 = vmatprep.mubr.msk.f32.mxu1 %vm386_vm0, %v367_v8  ;;  %v371_v36 = vadd.f32 %v363_v34, %v2863_v33  ;;  %v373_v42 = vadd.f32 %v365_v40, %v2880_v39  ;;  %v374_v45 = vadd.f32 %v366_v44, %v2890_v43  ;;  %2571 = vrot.lane.b32.xlu0 %v2804_v5, %s2725_s12 }
  0x14   : > { %2184 = vmatmul.mubr.msk.f32.vlgmr.msra.gmra.mrb[0].mxu0 %vm386_vm0, %v358_v16 }
  0x15   : > { %2214 = vmatprep.mubr.msk.f32.mxu0 %vm386_vm0, %v349_v7 }
  0x7a   : > { %v2557_v17 = vpop.permute.xlu0 %2556  ;;  %v477_v48 = vpop.permute.xlu1 %476 }
  0x7b   : > { %v2559_v18 = vunpack.i.h.bf16 %v2557_v17  ;;  %v2558_v19 = vunpack.i.l.bf16 %v2557_v17 }
  0x7d   : > { %v2404_v20 = vpack.c.bf16 %v2559_v18, %v2558_v19 }
  0x7e   : > { %v2562_v21 = vpop.permute.xlu0 %2561 }
  0x7f   : > { %v2564_v22 = vunpack.i.h.bf16 %v2562_v21  ;;  %v2563_v23 = vunpack.i.l.bf16 %v2562_v21  ;;  %2405 = vmatprep.subr.bf16.mxu1 %v2404_v20 }
  0x80   : > { %2407 = vmatpush3.bf16.msra.mxu1 %v2404_v20 }
  0x81   : > { %v2408_v26 = vpack.c.bf16 %v2564_v22, %v2563_v23 }
  0x83   : > { %2409 = vmatprep.subr.bf16.mxu1 %v2408_v26 }
  0x84   : > { %2411 = vmatpush3.bf16.msra.mxu1 %v2408_v26  ;;  %v2567_v15 = vpop.permute.xlu1 %2566 }
  0x85   : > { %2420 = vmatprep.subr.bf16.mxu1 %v2722_v11  ;;  %v2572_v16 = vpop.permute.xlu0 %2571  ;;  %v2569_v17 = vunpack.i.h.bf16 %v2567_v15  ;;  %v2568_v18 = vunpack.i.l.bf16 %v2567_v15 }
  0x86   : > { %v2574_v19 = vunpack.i.h.bf16 %v2572_v16  ;;  %v2573_v20 = vunpack.i.l.bf16 %v2572_v16 }
  0x87   : > { %2195 = vmatmul.mubr.msk.f32.vlgmr.msra.gmra.mrb[0].mxu1 %vm386_vm0, %v368_v29  ;;  %v2412_v21 = vpack.c.bf16 %v2569_v17, %v2568_v18 }
  0x88   : > { %2197 = vmatprep.mubr.msk.f32.mxu1 %vm386_vm0, %v369_v30  ;;  %v2416_v22 = vpack.c.bf16 %v2574_v19, %v2573_v20 }
  0x89   : > { %2413 = vmatprep.subr.bf16.mxu0 %v2412_v21 }
  0x8a   : > { %2415 = vmatpush3.bf16.msra.mxu0 %v2412_v21 }
  0x8b   : > { %2198 = vmatmul.mubr.msk.f32.gmra.mrb[2].mxu1 %vm386_vm0, %v370_v35  ;;  %2417 = vmatprep.subr.bf16.mxu0 %v2416_v22 }
  0x8c   : > { %2200 = vmatprep.mubr.msk.f32.mxu1 %vm386_vm0, %v371_v36 }
  0x8e   : > { %2419 = vmatpush3.bf16.msra.mxu0 %v2416_v22 }
  0x8f   : > { %2201 = vmatmul.mubr.msk.f32.gmra.mrb[4].mxu1 %vm386_vm0, %v372_v41  ;;  %2436 = vmatprep.subr.bf16.mxu0 %v2722_v11 }
  0x90   : > { %2203 = vmatprep.mubr.msk.f32.mxu1 %vm386_vm0, %v373_v42 }
  0x91   : > { %2215 = vmatmul.mubr.msk.f32.vlgmr.msra.gmra.mrb[2].mxu0 %vm386_vm0, %v2843_v24 }
  0x92   : > { %2217 = vmatprep.mubr.msk.f32.mxu0 %vm386_vm0, %v2849_v27 }
  0x93   : > { %2204 = vmatmul.mubr.msk.f32.gmra.mrb[6].mxu1 %vm386_vm0, %v374_v45 }
  0x94   : > { %2242 = vmatprep.mubr.msk.f32.mxu1 %vm2723_vm1, %v2724_v13 }
  0x95   : > { %2218 = vmatmul.mubr.msk.f32.gmra.mrb[4].mxu0 %vm386_vm0, %v2857_v31 }
  0x96   : > { %2220 = vmatprep.mubr.msk.f32.mxu0 %vm386_vm0, %v2863_v33 }
  0x99   : > { %2221 = vmatmul.mubr.msk.f32.gmra.mrb[6].mxu0 %vm386_vm0, %v2874_v37 }
  0x9a   : > { %2223 = vmatprep.mubr.msk.f32.mxu0 %vm386_vm0, %v2880_v39 }
  0x9d   : > { %2224 = vmatmul.mubr.msk.f32.gmra.mrb[8].mxu0 %vm386_vm0, %v2890_v43 }
  0x9e   : > { %2261 = vmatprep.mubr.msk.f32.mxu0 %vm2723_vm1, %v2724_v13 }
  0xe7   : > { %v456_v46 = vpop.f32.mrb[0].mxu0 }
  0xe8   : > { %v2185_v47 = vpop.f32.mrb[1].mxu0  ;;  %v2932_v12 = vadd.f32 %v2822_v10, %v456_v46 }
 0x15a   : > { %v2196_v49 = vpop.f32.mrb[0].mxu1 }
 0x15b   : > { %v575_v50 = vadd.f32 %v2196_v49, %v477_v48  ;;  %v569_v51 = vpop.f32.mrb[1].mxu1 }
 0x15c   : > { %v570_v52 = vadd.f32 %v569_v51, %v477_v48 }
 0x15e   : > { %v2421_v54 = vpack.c.bf16 %v575_v50, %v570_v52  ;;  %v2199_v55 = vpop.f32.mrb[2].mxu1  ;;  %v2911_v56 = vpack.i.bf16 %v575_v50, %v570_v52 }
 0x15f   : > { %v585_v57 = vadd.f32 %v2199_v55, %v477_v48  ;;  %v579_v58 = vpop.f32.mrb[3].mxu1 }
 0x160   : > { %v580_v59 = vadd.f32 %v579_v58, %v477_v48  ;;  %2423 = vmatpush3.bf16.xpose.msk.msra.mxu1 %vm2907_vm3, %v2421_v54 }
 0x161   : > { %2424 = vmatprep.subr.bf16.mxu1 %v2722_v11 }
 0x162   : > { %v2425_v60 = vpack.c.bf16 %v585_v57, %v580_v59  ;;  %v2202_v61 = vpop.f32.mrb[4].mxu1  ;;  %v2916_v62 = vpack.i.bf16 %v585_v57, %v580_v59 }
 0x163   : > { %v595_v63 = vadd.f32 %v2202_v61, %v477_v48  ;;  %v589_v0 = vpop.f32.mrb[5].mxu1  ;;  %v752_v61 = vld [vmem:[%s3149_s6] sm:$0xff] }
 0x164   : > { %v590_v1 = vadd.f32 %v589_v0, %v477_v48  ;;  %v2216_v27 = vpop.f32.mrb[2].mxu0 }
 0x165   : > { %v713_v28 = vpop.f32.mrb[3].mxu0 }
 0x166   : > { %v2429_v2 = vpack.c.bf16 %v595_v63, %v590_v1  ;;  %v2205_v3 = vpop.f32.mrb[6].mxu1  ;;  %v2918_v4 = vpack.i.bf16 %v595_v63, %v590_v1 }
 0x167   : > { %v605_v5 = vadd.f32 %v2205_v3, %v477_v48  ;;  %v599_v6 = vpop.f32.mrb[7].mxu1 }
 0x168   : > { %v600_v7 = vadd.f32 %v599_v6, %v477_v48  ;;  %2427 = vmatpush3.bf16.xpose.msk.msra.mxu1 %vm2907_vm3, %v2425_v60  ;;  %v2219_v29 = vpop.f32.mrb[4].mxu0 }
 0x169   : > { %2428 = vmatprep.subr.bf16.mxu1 %v2722_v11  ;;  %v723_v35 = vpop.f32.mrb[5].mxu0 }
 0x16a   : > { %v2433_v8 = vpack.c.bf16 %v605_v5, %v600_v7  ;;  %v2923_v9 = vpack.i.bf16 %v605_v5, %v600_v7 }
 0x16c   : > { %v2222_v36 = vpop.f32.mrb[6].mxu0 }
 0x16d   : > { %v733_v37 = vpop.f32.mrb[7].mxu0 }
 0x170   : > { %2431 = vmatpush3.bf16.xpose.msk.msra.mxu1 %vm2907_vm3, %v2429_v2  ;;  %v2225_v38 = vpop.f32.mrb[8].mxu0 }
 0x171   : > { %2432 = vmatprep.subr.bf16.mxu1 %v2722_v11  ;;  %v743_v39 = vpop.f32.mrb[9].mxu0 }
 0x178   : > { %2435 = vmatpush3.bf16.xpose.msk.msra.mxu1 %vm2907_vm3, %v2433_v8 }
 0x179   : > { %2464 = vmatprep.subr.bf16.mxu1 %v2722_v11 }
 0x17f   : > { %2243 = vmatmul.mubr.msk.f32.vlgmr.msra.gmra.mrb[8].mxu1 %vm764_vm2, %v2932_v12 }
 0x180   : > { %2304 = vmatprep.mubr.msk.f32.mxu1 %vm2723_vm1, %v2724_v13 }
 0x252   : > { %v858_v23 = vpop.f32.mrb[8].mxu1 }
 0x253   : > { %v862_v24 = vmul.f32 0.35355338, %v858_v23  ;;  %v2244_v25 = vpop.f32.mrb[9].mxu1 }
 0x255   : > { %v864_v26 = vsel %vm863_vm4, %v862_v24, -inf }
 0x256   : > { %865 = vmax.xlane.f32.xlu1 %v864_v26 }
 0x267   : > { %2576 = vrot.lane.b32.xlu1 %v2911_v56, %s2726_s25 }
 0x26b   : > { %2581 = vrot.lane.b32.xlu1 %v2916_v62, %s2726_s25 }
 0x26f   : > { %2591 = vrot.lane.b32.xlu1 %v2923_v9, %s2726_s25 }
 0x2e3   : > { %v866_v30 = vpop.xlane.xlu1 %865 }
 0x2e4   : > { %v867_v31 = vsub.f32 %v862_v24, %v866_v30 }
 0x2e6   : > { %v868_v32 = vmul.f32 1.442695, %v867_v31 }
 0x2e7   : > { %v2577_v6 = vpop.permute.xlu1 %2576 }
 0x2e8   : > { %2695 = vpow2.f32 %v868_v32  ;;  %v2579_v7 = vunpack.i.h.bf16 %v2577_v6  ;;  %v2578_v8 = vunpack.i.l.bf16 %v2577_v6 }
 0x2ea   : > { %v2449_v15 = vpack.c.bf16 %v2579_v7, %v2578_v8 }
 0x2eb   : > { %v2582_v17 = vpop.permute.xlu1 %2581 }
 0x2ec   : > { %v2584_v19 = vunpack.i.h.bf16 %v2582_v17  ;;  %v2583_v20 = vunpack.i.l.bf16 %v2582_v17 }
 0x2ee   : > { %v2453_v21 = vpack.c.bf16 %v2584_v19, %v2583_v20 }
 0x2ef   : > { %v2592_v25 = vpop.permute.xlu1 %2591 }
 0x2f0   : > { %v2594_v26 = vunpack.i.h.bf16 %v2592_v25 }
 0x2f2   : > { %v2696_v33 = vpop.eup %2695 }
 0x2f3   : > { %v870_v34 = vsel %vm863_vm4, %v2696_v33, 0.0 }
 0x2f4   : > { %871 = vadd.xlane.f32.xlu0 %v870_v34 }
 0x30a   : > { %620 = vrot.lane.b32.xlu0 %v2822_v10, %s2725_s12 }
 0x30e   : > { %2586 = vrot.lane.b32.xlu0 %v2918_v4, %s2726_s25 }
 0x312   : > { %1022 = vrot.lane.b32.xlu0 %v2932_v12, %s2726_s25 }
 0x381   : > { %v872_v40 = vpop.xlane.xlu0 %871 }
 0x382   : > { %2697 = vrcp.f32 %v872_v40 }
 0x385   : > { %v621_v41 = vpop.permute.xlu0 %620 }
 0x386   : > { %v744_v42 = vadd.f32 %v743_v39, %v621_v41  ;;  %v714_v43 = vadd.f32 %v713_v28, %v621_v41  ;;  %v719_v44 = vadd.f32 %v2216_v27, %v621_v41  ;;  %v724_v45 = vadd.f32 %v723_v35, %v621_v41 }
 0x387   : > { %v729_v46 = vadd.f32 %v2219_v29, %v621_v41  ;;  %v734_v47 = vadd.f32 %v733_v37, %v621_v41  ;;  %v739_v48 = vadd.f32 %v2222_v36, %v621_v41  ;;  %v749_v49 = vadd.f32 %v2225_v38, %v621_v41 }
 0x388   : > { %v2969_v50 = vpack.i.bf16 %v719_v44, %v714_v43  ;;  %v2437_v51 = vpack.c.bf16 %v719_v44, %v714_v43  ;;  %v2593_v27 = vunpack.i.l.bf16 %v2592_v25 }
 0x389   : > { %v2440_v10 = vpack.c.bf16 %v729_v46, %v724_v45  ;;  %v2443_v52 = vpack.c.bf16 %v739_v48, %v734_v47  ;;  %v2446_v54 = vpack.c.bf16 %v749_v49, %v744_v42  ;;  %v2971_v55 = vpack.i.bf16 %v729_v46, %v724_v45  ;;  %v2587_v63 = vpop.permute.xlu0 %2586  ;;  %v753_v46 = vld [vmem:[%s3149_s6 + $0x8] sm:$0xff] }
 0x38a   : > { %2596 = vrot.lane.b32.xlu0 %v2969_v50, %s2726_s25  ;;  %2438 = vmatpush3.bf16.msra.mxu0 %v2437_v51  ;;  %v2975_v57 = vpack.i.bf16 %v739_v48, %v734_v47  ;;  %v2977_v58 = vpack.i.bf16 %v749_v49, %v744_v42  ;;  %v2589_v22 = vunpack.i.h.bf16 %v2587_v63  ;;  %v2588_v23 = vunpack.i.l.bf16 %v2587_v63 }
 0x38b   : > { %2439 = vmatprep.subr.bf16.mxu0 %v2722_v11  ;;  %v2461_v28 = vpack.c.bf16 %v2594_v26, %v2593_v27 }
 0x38c   : > { %v2698_v59 = vpop.eup %2697  ;;  %v2457_v24 = vpack.c.bf16 %v2589_v22, %v2588_v23 }
 0x38d   : > { %v874_v60 = vmul.f32 %v2698_v59, %v2696_v33  ;;  %v1023_v0 = vpop.permute.xlu0 %1022 }
 0x38e   : > { %2441 = vmatpush3.bf16.msra.mxu0 %v2440_v10 }
 0x38f   : > { %2442 = vmatprep.subr.bf16.mxu0 %v2722_v11 }
 0x392   : > { %2444 = vmatpush3.bf16.msra.mxu0 %v2443_v52 }
 0x393   : > { %2445 = vmatprep.subr.bf16.mxu0 %v2722_v11 }
 0x396   : > { %2447 = vmatpush3.bf16.msra.mxu0 %v2446_v54 }
 0x397   : > { %2264 = vmatprep.subr.mxu0 %v2724_v13 }
 0x399   : > { %2262 = vmatmul.mubr.msk.f32.vlgmr.msra.gmra.mrb[10].mxu0 %vm863_vm4, %v874_v60 }
 0x39a   : > { %2265 = vmatpush3.msra.mxu0 %v752_v61  ;;  %2266 = vmatprep.mubr.msk.f32.mxu0 %vm2723_vm1, %v2724_v13 }
 0x39b   : > { %2448 = vmatprep.subr.bf16.mxu0 %v2722_v11 }
 0x3fc   : > { %v2597_v1 = vpop.permute.xlu0 %2596 }
 0x3fd   : > { %v2599_v2 = vunpack.i.h.bf16 %v2597_v1  ;;  %v2598_v3 = vunpack.i.l.bf16 %v2597_v1 }
 0x3ff   : > { %v2465_v5 = vpack.c.bf16 %v2599_v2, %v2598_v3 }
 0x401   : > { %2466 = vmatpush3.bf16.msra.mxu1 %v2465_v5 }
 0x402   : > { %2467 = vmatprep.subr.bf16.mxu1 %v2722_v11 }
 0x46c   : > { %v944_v16 = vpop.f32.mrb[10].mxu0 }
 0x46d   : > { %v2263_v18 = vpop.f32.mrb[11].mxu0  ;;  %2267 = vmatmul.mubr.msk.f32.vlgmr.msra.gmra.mrb[12].mxu0 %vm764_vm2, %v944_v16 }
 0x46e   : > { %2451 = vmatpush3.bf16.xpose.msk.msra.mxu0 %vm2907_vm3, %v2449_v15  ;;  %2285 = vmatprep.mubr.msk.f32.mxu0 %vm2723_vm1, %v2724_v13 }
 0x46f   : > { %2452 = vmatprep.subr.bf16.mxu0 %v2722_v11 }
 0x476   : > { %2455 = vmatpush3.bf16.xpose.msk.msra.mxu0 %vm2907_vm3, %v2453_v21 }
 0x477   : > { %2456 = vmatprep.subr.bf16.mxu0 %v2722_v11 }
 0x47e   : > { %2459 = vmatpush3.bf16.xpose.msk.msra.mxu0 %vm2907_vm3, %v2457_v24 }
 0x47f   : > { %2460 = vmatprep.subr.bf16.mxu0 %v2722_v11 }
 0x486   : > { %2463 = vmatpush3.bf16.xpose.msk.msra.mxu0 %vm2907_vm3, %v2461_v28 }
 0x487   : > { %2307 = vmatprep.subr.mxu0 %v2724_v13 }
 0x48d   : > { %2286 = vmatmul.mubr.msk.f32.vlgmr.msra.gmra.mrb[14].mxu0 %vm764_vm2, %v1023_v0 }
 0x48e   : > { %2309 = vmatprep.mubr.msk.f32.mxu0 %vm2723_vm1, %v2724_v13  ;;  %2308 = vmatpush3.msra.mxu0 %v753_v46 }
 0x48f   : > { %2492 = vmatprep.subr.bf16.mxu0 %v2722_v11 }
 0x560   : > { %v1124_v29 = vpop.f32.mrb[14].mxu0 }
 0x561   : > { %v1128_v30 = vmul.f32 0.35355338, %v1124_v29  ;;  %v2287_v31 = vpop.f32.mrb[15].mxu0 }
 0x563   : > { %v1129_v32 = vsel %vm863_vm4, %v1128_v30, -inf }
 0x564   : > { %1130 = vmax.xlane.f32.xlu1 %v1129_v32 }
 0x575   : > { %2601 = vrot.lane.b32.xlu1 %v2971_v55, %s2726_s25 }
 0x579   : > { %2606 = vrot.lane.b32.xlu1 %v2975_v57, %s2726_s25 }
 0x57d   : > { %2616 = vrot.lane.b32.xlu1 %v2911_v56, %s2727_s15 }
 0x581   : > { %2626 = vrot.lane.b32.xlu1 %v2918_v4, %s2727_s15 }
 0x585   : > { %1319 = vrot.lane.b32.xlu1 %v2932_v12, %s2727_s15 }
 0x589   : > { %2641 = vrot.lane.b32.xlu1 %v2916_v62, %s2728_s16 }
 0x58d   : > { %2651 = vrot.lane.b32.xlu1 %v2923_v9, %s2728_s16 }
 0x5f1   : > { %v1131_v33 = vpop.xlane.xlu1 %1130 }
 0x5f2   : > { %v1132_v34 = vsub.f32 %v1128_v30, %v1131_v33 }
 0x5f4   : > { %v1133_v35 = vmul.f32 1.442695, %v1132_v34 }
 0x5f5   : > { %v2602_v36 = vpop.permute.xlu1 %2601 }
 0x5f6   : > { %2699 = vpow2.f32 %v1133_v35  ;;  %v2604_v37 = vunpack.i.h.bf16 %v2602_v36  ;;  %v2603_v38 = vunpack.i.l.bf16 %v2602_v36 }
 0x5f8   : > { %v2468_v39 = vpack.c.bf16 %v2604_v37, %v2603_v38 }
 0x5f9   : > { %v2607_v40 = vpop.permute.xlu1 %2606 }
 0x5fa   : > { %v2609_v41 = vunpack.i.h.bf16 %v2607_v40  ;;  %v2608_v42 = vunpack.i.l.bf16 %v2607_v40  ;;  %2469 = vmatpush3.bf16.msra.mxu1 %v2468_v39 }
 0x5fb   : > { %2470 = vmatprep.subr.bf16.mxu1 %v2722_v11 }
 0x5fc   : > { %v2471_v43 = vpack.c.bf16 %v2609_v41, %v2608_v42 }
 0x5fe   : > { %2472 = vmatpush3.bf16.msra.mxu1 %v2471_v43 }
 0x5ff   : > { %2473 = vmatprep.subr.bf16.mxu1 %v2722_v11 }
 0x600   : > { %v2700_v44 = vpop.eup %2699 }
 0x601   : > { %v1135_v45 = vsel %vm863_vm4, %v2700_v44, 0.0 }
 0x602   : > { %1136 = vadd.xlane.f32.xlu0 %v1135_v45 }
 0x618   : > { %2611 = vrot.lane.b32.xlu0 %v2977_v58, %s2726_s25 }
 0x61c   : > { %2621 = vrot.lane.b32.xlu0 %v2916_v62, %s2727_s15 }
 0x620   : > { %2631 = vrot.lane.b32.xlu0 %v2923_v9, %s2727_s15 }
 0x624   : > { %2636 = vrot.lane.b32.xlu0 %v2911_v56, %s2728_s16 }
 0x628   : > { %2646 = vrot.lane.b32.xlu0 %v2918_v4, %s2728_s16  ;;  %v2617_v4 = vpop.permute.xlu1 %2616 }
 0x629   : > { %v2619_v49 = vunpack.i.h.bf16 %v2617_v4  ;;  %v2618_v51 = vunpack.i.l.bf16 %v2617_v4 }
 0x62b   : > { %v2477_v52 = vpack.c.bf16 %v2619_v49, %v2618_v51 }
 0x62c   : > { %1608 = vrot.lane.b32.xlu0 %v2932_v12, %s2728_s16  ;;  %v2627_v63 = vpop.permute.xlu1 %2626 }
 0x62d   : > { %v2629_v0 = vunpack.i.h.bf16 %v2627_v63  ;;  %v2628_v1 = vunpack.i.l.bf16 %v2627_v63 }
 0x62f   : > { %v2485_v2 = vpack.c.bf16 %v2629_v0, %v2628_v1 }
 0x630   : > { %2656 = vrot.lane.b32.xlu0 %v2969_v50, %s2727_s15  ;;  %v1320_v15 = vpop.permute.xlu1 %1319 }
 0x634   : > { %v2642_v19 = vpop.permute.xlu1 %2641 }
 0x635   : > { %v2644_v20 = vunpack.i.h.bf16 %v2642_v19  ;;  %v2643_v21 = vunpack.i.l.bf16 %v2642_v19 }
 0x637   : > { %v2509_v22 = vpack.c.bf16 %v2644_v20, %v2643_v21 }
 0x638   : > { %v2652_v27 = vpop.permute.xlu1 %2651 }
 0x639   : > { %v2654_v28 = vunpack.i.h.bf16 %v2652_v27  ;;  %v2653_v29 = vunpack.i.l.bf16 %v2652_v27 }
 0x63b   : > { %v2517_v30 = vpack.c.bf16 %v2654_v28, %v2653_v29 }
 0x68f   : > { %v1137_v62 = vpop.xlane.xlu0 %1136 }
 0x690   : > { %2701 = vrcp.f32 %v1137_v62 }
 0x693   : > { %v2612_v9 = vpop.permute.xlu0 %2611 }
 0x694   : > { %v2614_v56 = vunpack.i.h.bf16 %v2612_v9  ;;  %v2613_v47 = vunpack.i.l.bf16 %v2612_v9 }
 0x696   : > { %v2474_v48 = vpack.c.bf16 %v2614_v56, %v2613_v47 }
 0x697   : > { %v2622_v54 = vpop.permute.xlu0 %2621 }
 0x698   : > { %2475 = vmatpush3.bf16.msra.mxu1 %v2474_v48  ;;  %v2624_v59 = vunpack.i.h.bf16 %v2622_v54  ;;  %v2623_v60 = vunpack.i.l.bf16 %v2622_v54 }
 0x699   : > { %2476 = vmatprep.subr.bf16.mxu1 %v2722_v11 }
 0x69a   : > { %v2702_v12 = vpop.eup %2701  ;;  %v2481_v61 = vpack.c.bf16 %v2624_v59, %v2623_v60 }
 0x69b   : > { %v1139_v10 = vmul.f32 %v2702_v12, %v2700_v44  ;;  %v2632_v3 = vpop.permute.xlu0 %2631 }
 0x69c   : > { %v2634_v5 = vunpack.i.h.bf16 %v2632_v3  ;;  %v2633_v6 = vunpack.i.l.bf16 %v2632_v3 }
 0x69d   : > { %2305 = vmatmul.mubr.msk.f32.vlgmr.msra.gmra.mrb[10].mxu1 %vm863_vm4, %v1139_v10 }
 0x69e   : > { %2328 = vmatprep.mubr.msk.f32.mxu1 %vm2723_vm1, %v2724_v13  ;;  %v2489_v7 = vpack.c.bf16 %v2634_v5, %v2633_v6  ;;  %v754_v5 = vld [vmem:[%s3149_s6 + $0x10] sm:$0xff] }
 0x69f   : > { %v2637_v8 = vpop.permute.xlu0 %2636 }
 0x6a0   : > { %v2639_v16 = vunpack.i.h.bf16 %v2637_v8  ;;  %v2638_v17 = vunpack.i.l.bf16 %v2637_v8 }
 0x6a1   : > { %2479 = vmatpush3.bf16.xpose.msk.msra.mxu1 %vm2907_vm3, %v2477_v52 }
 0x6a2   : > { %2480 = vmatprep.subr.bf16.mxu1 %v2722_v11  ;;  %v2505_v18 = vpack.c.bf16 %v2639_v16, %v2638_v17 }
 0x6a3   : > { %v2647_v23 = vpop.permute.xlu0 %2646 }
 0x6a4   : > { %v2649_v24 = vunpack.i.h.bf16 %v2647_v23  ;;  %v2648_v25 = vunpack.i.l.bf16 %v2647_v23 }
 0x6a6   : > { %v2513_v26 = vpack.c.bf16 %v2649_v24, %v2648_v25 }
 0x6a7   : > { %v1609_v31 = vpop.permute.xlu0 %1608 }
 0x6a9   : > { %2483 = vmatpush3.bf16.xpose.msk.msra.mxu1 %vm2907_vm3, %v2481_v61 }
 0x6aa   : > { %2484 = vmatprep.subr.bf16.mxu1 %v2722_v11 }
 0x6ab   : > { %v2657_v32 = vpop.permute.xlu0 %2656 }
 0x6ac   : > { %v2659_v33 = vunpack.i.h.bf16 %v2657_v32  ;;  %v2658_v34 = vunpack.i.l.bf16 %v2657_v32  ;;  %v755_v32 = vld [vmem:[%s3149_s6 + $0x18] sm:$0xff] }
 0x6ae   : > { %v2493_v35 = vpack.c.bf16 %v2659_v33, %v2658_v34 }
 0x6b1   : > { %2487 = vmatpush3.bf16.xpose.msk.msra.mxu1 %vm2907_vm3, %v2485_v2 }
 0x6b2   : > { %2488 = vmatprep.subr.bf16.mxu1 %v2722_v11 }
 0x6b9   : > { %2491 = vmatpush3.bf16.xpose.msk.msra.mxu1 %vm2907_vm3, %v2489_v7 }
 0x6ba   : > { %2504 = vmatprep.subr.bf16.mxu1 %v2722_v11 }
 0x6c0   : > { %2329 = vmatmul.mubr.msk.f32.vlgmr.msra.gmra.mrb[12].mxu1 %vm764_vm2, %v1320_v15 }
 0x6c1   : > { %2507 = vmatpush3.bf16.xpose.msk.msra.mxu1 %vm2907_vm3, %v2505_v18  ;;  %2371 = vmatprep.mubr.msk.f32.mxu1 %vm2723_vm1, %v2724_v13 }
 0x6c2   : > { %2508 = vmatprep.subr.bf16.mxu1 %v2722_v11 }
 0x6c9   : > { %2511 = vmatpush3.bf16.xpose.msk.msra.mxu1 %vm2907_vm3, %v2509_v22 }
 0x6ca   : > { %2512 = vmatprep.subr.bf16.mxu1 %v2722_v11 }
 0x6d1   : > { %2515 = vmatpush3.bf16.xpose.msk.msra.mxu1 %vm2907_vm3, %v2513_v26 }
 0x6d2   : > { %2516 = vmatprep.subr.bf16.mxu1 %v2722_v11 }
 0x6d9   : > { %2519 = vmatpush3.bf16.xpose.msk.msra.mxu1 %vm2907_vm3, %v2517_v30 }
 0x6e0   : > { %2372 = vmatmul.mubr.msk.f32.vlgmr.msra.gmra.mrb[14].mxu1 %vm764_vm2, %v1609_v31 }
 0x770   : > { %v1241_v36 = vpop.f32.mrb[10].mxu1 }
 0x771   : > { %v2306_v37 = vpop.f32.mrb[11].mxu1  ;;  %2310 = vmatmul.mubr.msk.f32.vlgmr.msra.gmra.mrb[12].mxu0 %vm764_vm2, %v1241_v36 }
 0x772   : > { %2494 = vmatpush3.bf16.msra.mxu0 %v2493_v35  ;;  %2347 = vmatprep.mubr.msk.f32.mxu0 %vm2723_vm1, %v2724_v13 }
 0x773   : > { %2495 = vmatprep.subr.bf16.mxu0 %v2722_v11 }
 0x793   : > { %v1421_v38 = vpop.f32.mrb[12].mxu1 }
 0x794   : > { %v1425_v53 = vmul.f32 0.35355338, %v1421_v38  ;;  %v2330_v39 = vpop.f32.mrb[13].mxu1 }
 0x796   : > { %v1426_v40 = vsel %vm863_vm4, %v1425_v53, -inf }
 0x797   : > { %1427 = vmax.xlane.f32.xlu1 %v1426_v40 }
 0x7a8   : > { %2661 = vrot.lane.b32.xlu1 %v2971_v55, %s2727_s15 }
 0x7ac   : > { %2666 = vrot.lane.b32.xlu1 %v2975_v57, %s2727_s15 }
 0x7b3   : > { %v1710_v41 = vpop.f32.mrb[14].mxu1 }
 0x7b4   : > { %v2373_v42 = vpop.f32.mrb[15].mxu1  ;;  %v1714_v43 = vmul.f32 0.35355338, %v1710_v41 }
 0x7b6   : > { %v1715_v44 = vsel %vm863_vm4, %v1714_v43, -inf }
 0x7d0   : > { %1716 = vmax.xlane.f32.xlu1 %v1715_v44 }
 0x7e1   : > { %2681 = vrot.lane.b32.xlu1 %v2971_v55, %s2728_s16 }
 0x7e5   : > { %2686 = vrot.lane.b32.xlu1 %v2975_v57, %s2728_s16 }
 0x824   : > { %v1428_v45 = vpop.xlane.xlu1 %1427 }
 0x825   : > { %v1429_v46 = vsub.f32 %v1425_v53, %v1428_v45 }
 0x827   : > { %v1430_v62 = vmul.f32 1.442695, %v1429_v46 }
 0x828   : > { %v2662_v9 = vpop.permute.xlu1 %2661 }
 0x829   : > { %2703 = vpow2.f32 %v1430_v62  ;;  %v2664_v56 = vunpack.i.h.bf16 %v2662_v9  ;;  %v2663_v47 = vunpack.i.l.bf16 %v2662_v9  ;;  %v2062_v9 = vld [vmem:[%s3151_s8 + $0x1] ss:$0 sm:$0xff] }
 0x82b   : > { %v2496_v48 = vpack.c.bf16 %v2664_v56, %v2663_v47 }
 0x82c   : > { %v2667_v4 = vpop.permute.xlu1 %2666 }
 0x82d   : > { %v2669_v12 = vunpack.i.h.bf16 %v2667_v4  ;;  %v2668_v49 = vunpack.i.l.bf16 %v2667_v4  ;;  %2497 = vmatpush3.bf16.msra.mxu0 %v2496_v48 }
 0x82e   : > { %2498 = vmatprep.subr.bf16.mxu0 %v2722_v11 }
 0x82f   : > { %v2499_v51 = vpack.c.bf16 %v2669_v12, %v2668_v49 }
 0x831   : > { %2500 = vmatpush3.bf16.msra.mxu0 %v2499_v51 }
 0x832   : > { %2501 = vmatprep.subr.bf16.mxu0 %v2722_v11 }
 0x833   : > { %v2704_v55 = vpop.eup %2703 }
 0x834   : > { %v1432_v57 = vsel %vm863_vm4, %v2704_v55, 0.0 }
 0x835   : > { %1433 = vadd.xlane.f32.xlu0 %v1432_v57 }
 0x84b   : > { %2671 = vrot.lane.b32.xlu0 %v2977_v58, %s2727_s15 }
 0x84f   : > { %2676 = vrot.lane.b32.xlu0 %v2969_v50, %s2728_s16 }
 0x85d   : > { %v1717_v10 = vpop.xlane.xlu1 %1716 }
 0x85e   : > { %v1718_v52 = vsub.f32 %v1714_v43, %v1717_v10 }
 0x860   : > { %v1719_v54 = vmul.f32 1.442695, %v1718_v52 }
 0x861   : > { %v2682_v6 = vpop.permute.xlu1 %2681 }
 0x862   : > { %2705 = vpow2.f32 %v1719_v54  ;;  %v2684_v16 = vunpack.i.h.bf16 %v2682_v6  ;;  %v2683_v17 = vunpack.i.l.bf16 %v2682_v6 }
 0x864   : > { %v2524_v22 = vpack.c.bf16 %v2684_v16, %v2683_v17 }
 0x865   : > { %v2687_v20 = vpop.permute.xlu1 %2686 }
 0x866   : > { %v2689_v23 = vunpack.i.h.bf16 %v2687_v20  ;;  %v2688_v24 = vunpack.i.l.bf16 %v2687_v20 }
 0x868   : > { %v2527_v26 = vpack.c.bf16 %v2689_v23, %v2688_v24 }
 0x86c   : > { %v2706_v59 = vpop.eup %2705 }
 0x86d   : > { %v1721_v60 = vsel %vm863_vm4, %v2706_v59, 0.0 }
 0x86e   : > { %1722 = vadd.xlane.f32.xlu0 %v1721_v60 }
 0x884   : > { %2691 = vrot.lane.b32.xlu0 %v2977_v58, %s2728_s16 }
 0x8c2   : > { %v1434_v61 = vpop.xlane.xlu0 %1433 }
 0x8c3   : > { %2707 = vrcp.f32 %v1434_v61 }
 0x8c6   : > { %v2672_v63 = vpop.permute.xlu0 %2671 }
 0x8c7   : > { %v2674_v0 = vunpack.i.h.bf16 %v2672_v63  ;;  %v2673_v1 = vunpack.i.l.bf16 %v2672_v63 }
 0x8c9   : > { %v2502_v2 = vpack.c.bf16 %v2674_v0, %v2673_v1 }
 0x8ca   : > { %v2677_v58 = vpop.permute.xlu0 %2676 }
 0x8cb   : > { %2503 = vmatpush3.bf16.msra.mxu0 %v2502_v2  ;;  %v2679_v7 = vunpack.i.h.bf16 %v2677_v58  ;;  %v2678_v8 = vunpack.i.l.bf16 %v2677_v58 }
 0x8cc   : > { %2350 = vmatprep.subr.mxu0 %v2724_v13 }
 0x8cd   : > { %v2708_v50 = vpop.eup %2707  ;;  %v2521_v18 = vpack.c.bf16 %v2679_v7, %v2678_v8 }
 0x8ce   : > { %v1436_v3 = vmul.f32 %v2708_v50, %v2704_v55 }
 0x8d0   : > { %2348 = vmatmul.mubr.msk.f32.vlgmr.msra.gmra.mrb[16].mxu0 %vm863_vm4, %v1436_v3 }
 0x8d1   : > { %2351 = vmatpush3.msra.mxu0 %v754_v5  ;;  %2352 = vmatprep.mubr.msk.f32.mxu0 %vm2723_vm1, %v2724_v13 }
 0x8d2   : > { %2520 = vmatprep.subr.bf16.mxu0 %v2722_v11 }
 0x8fb   : > { %v1723_v15 = vpop.xlane.xlu0 %1722 }
 0x8fc   : > { %2709 = vrcp.f32 %v1723_v15 }
 0x8ff   : > { %v2692_v25 = vpop.permute.xlu0 %2691 }
 0x900   : > { %v2694_v27 = vunpack.i.h.bf16 %v2692_v25  ;;  %v2693_v28 = vunpack.i.l.bf16 %v2692_v25 }
 0x902   : > { %v2530_v30 = vpack.c.bf16 %v2694_v27, %v2693_v28 }
 0x906   : > { %v2710_v29 = vpop.eup %2709 }
 0x907   : > { %v1725_v31 = vmul.f32 %v2710_v29, %v2706_v59 }
 0x9a3   : > { %v1530_v19 = vpop.f32.mrb[16].mxu0 }
 0x9a4   : > { %v2349_v21 = vpop.f32.mrb[17].mxu0  ;;  %2353 = vmatmul.mubr.msk.f32.vlgmr.msra.gmra.mrb[12].mxu0 %vm764_vm2, %v1530_v19 }
 0x9a5   : > { %2522 = vmatpush3.bf16.msra.mxu0 %v2521_v18  ;;  %2390 = vmatprep.mubr.msk.f32.mxu0 %vm2723_vm1, %v2724_v13 }
 0x9a6   : > { %2523 = vmatprep.subr.bf16.mxu0 %v2722_v11 }
 0x9a9   : > { %2525 = vmatpush3.bf16.msra.mxu0 %v2524_v22 }
 0x9aa   : > { %2526 = vmatprep.subr.bf16.mxu0 %v2722_v11 }
 0x9ad   : > { %2528 = vmatpush3.bf16.msra.mxu0 %v2527_v26 }
 0x9ae   : > { %2529 = vmatprep.subr.bf16.mxu0 %v2722_v11  ;;  %v2016_v11 = vld [vmem:[%s3150_s7] ss:$0 sm:$0xff] }
 0x9af   : > { %v763_v35 = vadd.f32 %v2016_v11, %v2833_v14  ;;  %v2061_v14 = vld [vmem:[%s3151_s8] ss:$0 sm:$0xff] }
 0x9b1   : > { %2531 = vmatpush3.bf16.msra.mxu0 %v2530_v30 }
 0x9b2   : > { %2393 = vmatprep.subr.mxu0 %v2724_v13 }
 0x9b4   : > { %2391 = vmatmul.mubr.msk.f32.vlgmr.msra.gmra.mrb[18].mxu0 %vm863_vm4, %v1725_v31 }
 0x9b5   : > { %2394 = vmatpush3.msra.mxu0 %v755_v32  ;;  %2395 = vmatprep.mubr.msk.f32.mxu0 %vm2723_vm1, %v2724_v13 }
 0xa87   : > { %v1819_v33 = vpop.f32.mrb[18].mxu0 }
 0xa88   : > { %v2392_v34 = vpop.f32.mrb[19].mxu0  ;;  %2396 = vmatmul.mubr.msk.f32.vlgmr.msra.gmra.mrb[12].mxu0 %vm764_vm2, %v1819_v33 }
 0xb5b   : > { %v1892_v36 = vpop.f32.mrb[12].mxu0 }
 0xb5c   : > { %v2532_v37 = vadd.f32 %v1892_v36, %v763_v35  ;;  %v2397_v38 = vpop.f32.mrb[13].mxu0 }
 0xb5e   : > { %v1897_v53 = vsel %vm386_vm0, %v2532_v37, 0.0 }
 0xb5f   : > { %1898 = vadd.xlane.f32.xlu1 %v1897_v53 }
 0xbec   : > { %v1899_v39 = vpop.xlane.xlu1 %1898 }
 0xbed   : > { %v1901_v40 = vmul.f32 0.03125, %v1899_v39 }
 0xbef   : > { %v1902_v13 = vsub.f32 %v2532_v37, %v1901_v40 }
 0xbf1   : > { %v1903_v41 = vmul.f32 %v1902_v13, %v1902_v13 }
 0xbf3   : > { %v1904_v42 = vsel %vm386_vm0, %v1903_v41, 0.0 }
 0xbf4   : > { %1905 = vadd.xlane.f32.xlu0 %v1904_v42 }
 0xc81   : > { %v1906_v43 = vpop.xlane.xlu0 %1905 }
 0xc82   : > { %v1907_v44 = vmul.f32 0.03125, %v1906_v43 }
 0xc84   : > { %v1908_v45 = vadd.f32 1e-05, %v1907_v44 }
 0xc86   : > { %2711 = vrsqrt.f32 %v1908_v45 }
 0xc90   : > { %v2712_v46 = vpop.eup %2711 }
 0xc91   : > { %v1910_v62 = vmul.f32 %v2712_v46, %v1902_v13 }
 0xc93   : > { %v1916_v56 = vmul.f32 %v2061_v14, %v1910_v62 }
 0xc95   : > { %v1922_v47 = vadd.f32 %v2062_v9, %v1916_v56 }
 0xc97   : > { %1923 = vst.msk [vmem:[%s347_s13] sm:$0xff] %vm386_vm0, %v1922_v47 }
 0xc98 PF: > { %s19_s30 = sadd.s32 1, %s2719_s30  }
 0xc99   : > { %p16_p4 = scmp.ge.s32.totalorder %s19_s30, 4  }
 0xc9b   :  { %18 = sbr.rel (!%p16_p4) target bundleno = 1 (0x1), region = 89 }

</bundles_post_ra>
